<compile_context>
chip_gen: v5e
topology: v5e:2x2
jax: 0.10.0
libtpu: 0.0.40
codegen_flags: <defaults>
</compile_context>

<pallas_src>
import jax
import jax.numpy as jnp
import numpy as np
from jax import lax
from jax.experimental import pallas as pl
from jax.experimental.pallas import tpu as pltpu

EPS = 1e-5
VMEM_LIMIT = 48 * 1024 * 1024  # fits v7x (64 MiB physical); plenty of headroom on v5e/v6e.


def _round_up(x, m):
    return ((x + m - 1) // m) * m


def _row_tile(total, cap=512):
    """Largest divisor of `total` that is a multiple of 8 and <= cap (fallback: total)."""
    best = None
    d = 8
    while d <= min(total, cap):
        if total % d == 0:
            best = d
        d += 8
    return best if best is not None else total


# --------------------------- pass 1: depthwise + BN1 stats ---------------------------
def _make_dw_kernel(*, K, s, C, Hout, WoC):
    def kernel(xph_ref, dww_ref, dwb_ref, hpre_ref, st_ref):
        # K independent accumulators (one per kh) to break the serial add chain.
        accs = [None] * K
        slab_cache = {}
        for kh in range(K):
            for kw in range(K):
                ph = (kh % s) * s + (kw % s)
                dh, dw = kh // s, kw // s
                key = (ph, dh)
                if key not in slab_cache:
                    # one row-offset load per distinct (phase, row-shift)
                    slab_cache[key] = xph_ref[ph, 0, dh:dh + Hout, :]   # (Hout, Wflat)
                sl = slab_cache[key]
                tap = sl[:, dw * C:dw * C + WoC]                        # static lane shift
                t = kh * K + kw
                term = tap * dww_ref[t:t + 1, :]
                accs[kh] = term if accs[kh] is None else accs[kh] + term
        hpre = accs[0]
        for kh in range(1, K):
            hpre = hpre + accs[kh]
        hpre = hpre + dwb_ref[...]                                      # (Hout, WoC)
        hpre_ref[0, :, :] = hpre
        # per-lane partial BN1 stats (folded to per-channel on the tiny wrapper side)
        st_ref[0, 0:1, :] = jnp.sum(hpre, axis=0, keepdims=True)
        st_ref[0, 1:2, :] = jnp.sum(hpre * hpre, axis=0, keepdims=True)
    return kernel


# --------------------------- pass 2: SE squeeze + excitation -------------------------
def _make_se_kernel(*, C, inv_HW):
    def kernel(hpre_ref, sc_ref, sh_ref, fold_ref, w1_ref, b1_ref, w2_ref, b2_ref,
               gate_ref):
        h = hpre_ref[0, :, :] * sc_ref[...] + sh_ref[...]               # BN1 affine
        h = h * jax.nn.sigmoid(h)                                       # Swish
        pooled = jnp.sum(h, axis=0, keepdims=True)                      # (1, WoC)
        pc = jnp.dot(pooled, fold_ref[...],
                     preferred_element_type=jnp.float32) * inv_HW       # (1, C) GAP
        z = jnp.maximum(
            jnp.dot(pc, w1_ref[...], preferred_element_type=jnp.float32) + b1_ref[...],
            0.0)                                                        # (1, Cr)
        g = jax.nn.sigmoid(
            jnp.dot(z, w2_ref[...], preferred_element_type=jnp.float32) + b2_ref[...])
        gate_ref[0, :, :] = jnp.broadcast_to(g, (8, C))                 # (8, C) per image
    return kernel


# --------------- pass 3: BN1 affine + Swish + gate + 1x1 projection + BN2 stats ------
def _make_proj_kernel(*, mm_dtype):
    def kernel(hp_ref, sc_ref, sh_ref, gate_ref, pw_ref, pwb_ref, y_ref, st_ref):
        h = hp_ref[0, :, :] * sc_ref[...] + sh_ref[...]                 # (R3, C)
        h = h * jax.nn.sigmoid(h)
        h = h * gate_ref[0, 0:1, :]
        # per-pixel projection: (R3, C) x (C, Cout) -- bf16 MXU operands, f32 accumulate
        y = jnp.dot(h.astype(mm_dtype), pw_ref[...],
                    preferred_element_type=jnp.float32) + pwb_ref[...]  # (R3, Cout)
        y_ref[0, :, :] = y
        st_ref[0, 0, 0:1, :] = jnp.sum(y, axis=0, keepdims=True)
        st_ref[0, 0, 1:2, :] = jnp.sum(y * y, axis=0, keepdims=True)
    return kernel


# --------------------------- pass 4: BN2 affine + residual ---------------------------
def _make_bn2_kernel(*, residual):
    if residual:
        def kernel(y_ref, sc_ref, sh_ref, x_ref, out_ref):
            out_ref[0, :, :] = (y_ref[0, :, :] * sc_ref[...] + sh_ref[...]
                                + x_ref[0, :, :])
    else:
        def kernel(y_ref, sc_ref, sh_ref, out_ref):
            out_ref[0, :, :] = y_ref[0, :, :] * sc_ref[...] + sh_ref[...]
    return kernel


# ------------------------------------ wrapper ----------------------------------------
def mbconv1_pallas(x_nchw, p, *, kernel_size, stride, use_bf16_mxu=True):
    N, C, H, W = x_nchw.shape
    K, s = kernel_size, stride
    pad = 1 if K == 3 else 2
    Cout = p["pw_w"].shape[0]
    Cr = p["se_w1"].shape[0]
    residual = (C == Cout) and (s == 1)

    Hout = (H + 2 * pad - K) // s + 1
    Wout = (W + 2 * pad - K) // s + 1
    HW = Hout * Wout
    WoC = Wout * C
    WoCo = Wout * Cout
    Mpix = N * HW
    mmdt = jnp.bfloat16 if use_bf16_mxu else jnp.float32
    f32 = jnp.float32

    x_nhwc = jnp.transpose(x_nchw, (0, 2, 3, 1)).astype(f32)

    # ---- zero-pad + space-to-depth phase decomposition (handles stride>1) ------------
    dmax = (K - 1) // s
    Hs, Ws = Hout + dmax, Wout + dmax
    Hs_pad = _round_up(Hs, 8)                    # sublane-friendly dh row shifts
    Wflat = _round_up(Ws * C, 128)               # lane-dense slab
    Hp = max(H + 2 * pad, s * Hs)
    Wp = max(W + 2 * pad, s * Ws)
    xp = jnp.pad(x_nhwc, ((0, 0), (pad, Hp - H - pad), (pad, Wp - W - pad), (0, 0)))
    phases = jnp.stack([xp[:, rh::s, rw::s, :][:, :Hs, :Ws, :]
                        for rh in range(s) for rw in range(s)])          # (s*s,N,Hs,Ws,C)
    phases = phases.reshape(s * s, N, Hs, Ws * C)
    phases = jnp.pad(phases, ((0, 0), (0, 0), (0, Hs_pad - Hs), (0, Wflat - Ws * C)))

    # depthwise weights / bias in the flat (W', C) lane layout
    dw_w = p["dw_w"][:, 0, :, :]                                         # (C, K, K)
    dww = jnp.stack([jnp.tile(dw_w[:, kh, kw], Wout)
                     for kh in range(K) for kw in range(K)])             # (K*K, WoC)
    dwb = jnp.tile(p["dw_b"], Wout).reshape(1, WoC)

    # ---- pass 1: depthwise conv + BN1 per-lane partial stats (grid over images) ------
    hpre, st1 = pl.pallas_call(
        _make_dw_kernel(K=K, s=s, C=C, Hout=Hout, WoC=WoC),
        out_shape=(jax.ShapeDtypeStruct((N, Hout, WoC), f32),
                   jax.ShapeDtypeStruct((N, 2, WoC), f32)),
        grid=(N,),
        in_specs=[pl.BlockSpec((s * s, 1, Hs_pad, Wflat), lambda n: (0, n, 0, 0)),
                  pl.BlockSpec((K * K, WoC), lambda n: (0, 0)),
                  pl.BlockSpec((1, WoC), lambda n: (0, 0))],
        out_specs=(pl.BlockSpec((1, Hout, WoC), lambda n: (n, 0, 0)),
                   pl.BlockSpec((1, 2, WoC), lambda n: (n, 0, 0))),
        compiler_params=pltpu.CompilerParams(dimension_semantics=("parallel",),
                                             vmem_limit_bytes=VMEM_LIMIT),
    )(phases, dww, dwb)

    # ---- BN1 statistics (tiny wrapper math on (2, WoC) floats) ------------------------
    st1 = jnp.sum(st1, axis=0).reshape(2, Wout, C).sum(axis=1)           # (2, C)
    mu1 = st1[0] / Mpix
    var1 = jnp.maximum(st1[1] / Mpix - mu1 * mu1, 0.0)
    scale1 = p["bn1_g"] * lax.rsqrt(var1 + EPS)
    shift1 = p["bn1_b"] - mu1 * scale1
    sc1f = jnp.tile(scale1, Wout).reshape(1, WoC)      # flat-lane form (pass 2)
    sh1f = jnp.tile(shift1, Wout).reshape(1, WoC)
    sc1c = scale1.reshape(1, C)                        # per-channel form (pass 3)
    sh1c = shift1.reshape(1, C)

    # ---- pass 2: SE squeeze + excitation gate (grid over images) ----------------------
    Fc = jnp.tile(jnp.eye(C, dtype=f32), (Wout, 1))                      # (WoC, C) fold
    w1t = p["se_w1"][:, :, 0, 0].T                                       # (C, Cr)
    w2t = p["se_w2"][:, :, 0, 0].T                                       # (Cr, C)
    seb1 = p["se_b1"].reshape(1, Cr)
    seb2 = p["se_b2"].reshape(1, C)
    gate = pl.pallas_call(
        _make_se_kernel(C=C, inv_HW=1.0 / HW),
        out_shape=jax.ShapeDtypeStruct((N, 8, C), f32),
        grid=(N,),
        in_specs=[pl.BlockSpec((1, Hout, WoC), lambda n: (n, 0, 0)),
                  pl.BlockSpec((1, WoC), lambda n: (0, 0)),
                  pl.BlockSpec((1, WoC), lambda n: (0, 0)),
                  pl.BlockSpec((WoC, C), lambda n: (0, 0)),
                  pl.BlockSpec((C, Cr), lambda n: (0, 0)),
                  pl.BlockSpec((1, Cr), lambda n: (0, 0)),
                  pl.BlockSpec((Cr, C), lambda n: (0, 0)),
                  pl.BlockSpec((1, C), lambda n: (0, 0))],
        out_specs=pl.BlockSpec((1, 8, C), lambda n: (n, 0, 0)),
        compiler_params=pltpu.CompilerParams(dimension_semantics=("parallel",),
                                             vmem_limit_bytes=VMEM_LIMIT),
    )(hpre, sc1f, sh1f, Fc, w1t, seb1, w2t, seb2)

    # ---- pass 3: apply + per-pixel 1x1 projection + BN2 partial stats -----------------
    R3 = _row_tile(HW, 512)                      # 256-512 pixel-row tiles at real sizes
    tpi3 = HW // R3
    hpre_px = hpre.reshape(N, HW, C)             # free, contiguity-preserving view
    pw_t = p["pw_w"][:, :, 0, 0].T.astype(mmdt)  # (C, Cout), bf16 MXU operand
    pwb = p["pw_b"].reshape(1, Cout)
    y_px, st2 = pl.pallas_call(
        _make_proj_kernel(mm_dtype=mmdt),
        out_shape=(jax.ShapeDtypeStruct((N, HW, Cout), f32),
                   jax.ShapeDtypeStruct((N, tpi3, 2, Cout), f32)),
        grid=(N, tpi3),
        in_specs=[pl.BlockSpec((1, R3, C), lambda n, t: (n, t, 0)),
                  pl.BlockSpec((1, C), lambda n, t: (0, 0)),
                  pl.BlockSpec((1, C), lambda n, t: (0, 0)),
                  pl.BlockSpec((1, 8, C), lambda n, t: (n, 0, 0)),
                  pl.BlockSpec((C, Cout), lambda n, t: (0, 0)),
                  pl.BlockSpec((1, Cout), lambda n, t: (0, 0))],
        out_specs=(pl.BlockSpec((1, R3, Cout), lambda n, t: (n, t, 0)),
                   pl.BlockSpec((1, 1, 2, Cout), lambda n, t: (n, t, 0, 0))),
        compiler_params=pltpu.CompilerParams(
            dimension_semantics=("parallel", "parallel"),
            vmem_limit_bytes=VMEM_LIMIT),
    )(hpre_px, sc1c, sh1c, gate, pw_t, pwb)

    # ---- BN2 statistics (tiny wrapper math) -------------------------------------------
    st2 = jnp.sum(st2, axis=(0, 1))                                      # (2, Cout)
    mu2 = st2[0] / Mpix
    var2 = jnp.maximum(st2[1] / Mpix - mu2 * mu2, 0.0)
    scale2 = p["bn2_g"] * lax.rsqrt(var2 + EPS)
    shift2 = p["bn2_b"] - mu2 * scale2
    sc2f = jnp.tile(scale2, Wout).reshape(1, WoCo)
    sh2f = jnp.tile(shift2, Wout).reshape(1, WoCo)

    # ---- pass 4: BN2 affine + residual, lane-dense flat stores ------------------------
    R4 = _row_tile(Hout, 512)
    tr4 = Hout // R4
    y_flat = y_px.reshape(N, Hout, WoCo)         # free view back to the flat lane layout
    args = [y_flat, sc2f, sh2f]
    in_specs = [pl.BlockSpec((1, R4, WoCo), lambda n, t: (n, t, 0)),
                pl.BlockSpec((1, WoCo), lambda n, t: (0, 0)),
                pl.BlockSpec((1, WoCo), lambda n, t: (0, 0))]
    if residual:
        args.append(x_nhwc.reshape(N, H, W * C))
        in_specs.append(pl.BlockSpec((1, R4, WoC), lambda n, t: (n, t, 0)))
    out_flat = pl.pallas_call(
        _make_bn2_kernel(residual=residual),
        out_shape=jax.ShapeDtypeStruct((N, Hout, WoCo), f32),
        grid=(N, tr4),
        in_specs=in_specs,
        out_specs=pl.BlockSpec((1, R4, WoCo), lambda n, t: (n, t, 0)),
        compiler_params=pltpu.CompilerParams(
            dimension_semantics=("parallel", "parallel"),
            vmem_limit_bytes=VMEM_LIMIT),
    )(*args)

    return jnp.transpose(out_flat.reshape(N, Hout, Wout, Cout), (0, 3, 1, 2))


mbconv1 = jax.jit(mbconv1_pallas,
                  static_argnames=("kernel_size", "stride", "use_bf16_mxu"))


# ---------------- pure-JAX reference (NCHW, mirrors the PyTorch module) ---------------
def _bn_ref(x, g, b):
    mu = jnp.mean(x, axis=(0, 2, 3), keepdims=True)
    var = jnp.mean((x - mu) ** 2, axis=(0, 2, 3), keepdims=True)
    return (x - mu) * lax.rsqrt(var + EPS) * g[None, :, None, None] + b[None, :, None, None]


def mbconv1_ref(x, p, *, kernel_size, stride):
    N, C, H, W = x.shape
    pad = 1 if kernel_size == 3 else 2
    Cout = p["pw_w"].shape[0]
    h = lax.conv_general_dilated(
        x, p["dw_w"], (stride, stride), [(pad, pad), (pad, pad)],
        feature_group_count=C, dimension_numbers=("NCHW", "OIHW", "NCHW"),
    ) + p["dw_b"][None, :, None, None]
    h = _bn_ref(h, p["bn1_g"], p["bn1_b"])
    h = h * jax.nn.sigmoid(h)
    pooled = jnp.mean(h, axis=(2, 3), keepdims=True)
    z = jnp.einsum("nchw,oc->nohw", pooled, p["se_w1"][:, :, 0, 0]) + p["se_b1"][None, :, None, None]
    z = jnp.maximum(z, 0.0)
    gate = jax.nn.sigmoid(
        jnp.einsum("nchw,oc->nohw", z, p["se_w2"][:, :, 0, 0]) + p["se_b2"][None, :, None, None])
    h = h * gate
    y = jnp.einsum("nchw,oc->nohw", h, p["pw_w"][:, :, 0, 0]) + p["pw_b"][None, :, None, None]
    y = _bn_ref(y, p["bn2_g"], p["bn2_b"])
    if C == Cout and stride == 1:
        y = y + x
    return y


# ---------------- deterministic synthetic parameters ----------------------------------
def init_params(key, C, Cout, K, r=4):
    Cr = int(C / r)
    ks = jax.random.split(key, 12)
    rnd = lambda k, shape, sc: sc * jax.random.normal(k, shape, jnp.float32)
    return dict(
        dw_w=rnd(ks[0], (C, 1, K, K), 0.2),      # Conv2d(C, C, K, groups=C)
        dw_b=rnd(ks[1], (C,), 0.1),
        bn1_g=1.0 + rnd(ks[2], (C,), 0.1),
        bn1_b=rnd(ks[3], (C,), 0.1),
        se_w1=rnd(ks[4], (Cr, C, 1, 1), 0.3),    # Conv2d(C, C//r, 1)
        se_b1=rnd(ks[5], (Cr,), 0.1),
        se_w2=rnd(ks[6], (C, Cr, 1, 1), 0.3),    # Conv2d(C//r, C, 1)
        se_b2=rnd(ks[7], (C,), 0.1),
        pw_w=rnd(ks[8], (Cout, C, 1, 1), 0.2),   # Conv2d(C, Cout, 1)
        pw_b=rnd(ks[9], (Cout,), 0.1),
        bn2_g=1.0 + rnd(ks[10], (Cout,), 0.1),
        bn2_b=rnd(ks[11], (Cout,), 0.1),
    )


if __name__ == "__main__":
    key = jax.random.PRNGKey(0)
    kx, kp1, kp2, kp3 = jax.random.split(key, 4)

    N, C, H, W = 2, 16, 16, 16
    x = jax.random.normal(kx, (N, C, H, W), jnp.float32)

    # Case 1: in_channels == out_channels, stride=1 -> residual; f32 MXU path (tight tol).
    p1 = init_params(kp1, C, C, 3)
    out1 = jax.block_until_ready(mbconv1(x, p1, kernel_size=3, stride=1, use_bf16_mxu=False))
    ref1 = mbconv1_ref(x, p1, kernel_size=3, stride=1)
    np.testing.assert_allclose(np.asarray(out1), np.asarray(ref1), rtol=2e-3, atol=2e-3)

    # Case 2: in != out channels, stride=1 -> no residual; bf16 MXU operands (f32 accum).
    p2 = init_params(kp2, C, 24, 3)
    out2 = jax.block_until_ready(mbconv1(x, p2, kernel_size=3, stride=1, use_bf16_mxu=True))
    ref2 = mbconv1_ref(x, p2, kernel_size=3, stride=1)
    np.testing.assert_allclose(np.asarray(out2), np.asarray(ref2), rtol=2e-2, atol=2e-2)

    # Case 3: stride=2 (space-to-depth phase path), no residual; bf16 MXU operands.
    p3 = init_params(kp3, C, 24, 3)
    out3 = jax.block_until_ready(mbconv1(x, p3, kernel_size=3, stride=2, use_bf16_mxu=True))
    ref3 = mbconv1_ref(x, p3, kernel_size=3, stride=2)
    np.testing.assert_allclose(np.asarray(out3), np.asarray(ref3), rtol=2e-2, atol=2e-2)

    print("KERNEL_OK")
</pallas_src>

<mosaic_0001>
module attributes {stable_mosaic.version = 11 : i64} {
  func.func @kernel(%arg0: i32, %arg1: memref<1x1x24x384xf32, #tpu.memory_space<vmem>>, %arg2: memref<9x256xf32, #tpu.memory_space<vmem>>, %arg3: memref<1x256xf32, #tpu.memory_space<vmem>>, %arg4: memref<1x16x256xf32, #tpu.memory_space<vmem>>, %arg5: memref<1x2x256xf32, #tpu.memory_space<vmem>>) attributes {dimension_semantics = [#tpu.dimension_semantics<parallel>], iteration_bounds = array<i64: 2>, scalar_prefetch = 0 : i64, scratch_operands = 0 : i64, tpu.core_type = #tpu.core_type<tc>, window_params = [{transform_indices = @transform_0, window_bounds = array<i64: 1, 1, 24, 384>}, {pipeline_mode = #tpu.pipeline_mode<synchronous>, transform_indices = @transform_1, window_bounds = array<i64: 9, 256>}, {pipeline_mode = #tpu.pipeline_mode<synchronous>, transform_indices = @transform_2, window_bounds = array<i64: 1, 256>}, {transform_indices = @transform_3, window_bounds = array<i64: 1, 16, 256>}, {transform_indices = @transform_4, window_bounds = array<i64: 1, 2, 256>}]} {
    %c0 = arith.constant 0 : index
    %c0_0 = arith.constant 0 : index
    %c0_1 = arith.constant 0 : index
    %c0_2 = arith.constant 0 : index
    %0 = vector.load %arg1[%c0, %c0_0, %c0_1, %c0_2] : memref<1x1x24x384xf32, #tpu.memory_space<vmem>>, vector<1x1x16x384xf32>
    %1 = vector.shape_cast %0 : vector<1x1x16x384xf32> to vector<16x384xf32>
    %2 = vector.extract_strided_slice %1 {offsets = [0, 0], sizes = [16, 256], strides = [1, 1]} : vector<16x384xf32> to vector<16x256xf32>
    %c0_3 = arith.constant 0 : index
    %c0_4 = arith.constant 0 : index
    %3 = vector.load %arg2[%c0_3, %c0_4] : memref<9x256xf32, #tpu.memory_space<vmem>>, vector<1x256xf32>
    %4 = vector.broadcast %3 : vector<1x256xf32> to vector<16x256xf32>
    %5 = arith.mulf %2, %4 : vector<16x256xf32>
    %6 = vector.extract_strided_slice %1 {offsets = [0, 16], sizes = [16, 256], strides = [1, 1]} : vector<16x384xf32> to vector<16x256xf32>
    %c1 = arith.constant 1 : index
    %c0_5 = arith.constant 0 : index
    %7 = vector.load %arg2[%c1, %c0_5] : memref<9x256xf32, #tpu.memory_space<vmem>>, vector<1x256xf32>
    %8 = vector.broadcast %7 : vector<1x256xf32> to vector<16x256xf32>
    %9 = arith.mulf %6, %8 : vector<16x256xf32>
    %10 = arith.addf %5, %9 : vector<16x256xf32>
    %11 = vector.extract_strided_slice %1 {offsets = [0, 32], sizes = [16, 256], strides = [1, 1]} : vector<16x384xf32> to vector<16x256xf32>
    %c2 = arith.constant 2 : index
    %c0_6 = arith.constant 0 : index
    %12 = vector.load %arg2[%c2, %c0_6] : memref<9x256xf32, #tpu.memory_space<vmem>>, vector<1x256xf32>
    %13 = vector.broadcast %12 : vector<1x256xf32> to vector<16x256xf32>
    %14 = arith.mulf %11, %13 : vector<16x256xf32>
    %15 = arith.addf %10, %14 : vector<16x256xf32>
    %c0_7 = arith.constant 0 : index
    %c0_8 = arith.constant 0 : index
    %c1_9 = arith.constant 1 : index
    %c0_10 = arith.constant 0 : index
    %16 = vector.load %arg1[%c0_7, %c0_8, %c1_9, %c0_10] : memref<1x1x24x384xf32, #tpu.memory_space<vmem>>, vector<1x1x16x384xf32>
    %17 = vector.shape_cast %16 : vector<1x1x16x384xf32> to vector<16x384xf32>
    %18 = vector.extract_strided_slice %17 {offsets = [0, 0], sizes = [16, 256], strides = [1, 1]} : vector<16x384xf32> to vector<16x256xf32>
    %c3 = arith.constant 3 : index
    %c0_11 = arith.constant 0 : index
    %19 = vector.load %arg2[%c3, %c0_11] : memref<9x256xf32, #tpu.memory_space<vmem>>, vector<1x256xf32>
    %20 = vector.broadcast %19 : vector<1x256xf32> to vector<16x256xf32>
    %21 = arith.mulf %18, %20 : vector<16x256xf32>
    %22 = vector.extract_strided_slice %17 {offsets = [0, 16], sizes = [16, 256], strides = [1, 1]} : vector<16x384xf32> to vector<16x256xf32>
    %c4 = arith.constant 4 : index
    %c0_12 = arith.constant 0 : index
    %23 = vector.load %arg2[%c4, %c0_12] : memref<9x256xf32, #tpu.memory_space<vmem>>, vector<1x256xf32>
    %24 = vector.broadcast %23 : vector<1x256xf32> to vector<16x256xf32>
    %25 = arith.mulf %22, %24 : vector<16x256xf32>
    %26 = arith.addf %21, %25 : vector<16x256xf32>
    %27 = vector.extract_strided_slice %17 {offsets = [0, 32], sizes = [16, 256], strides = [1, 1]} : vector<16x384xf32> to vector<16x256xf32>
    %c5 = arith.constant 5 : index
    %c0_13 = arith.constant 0 : index
    %28 = vector.load %arg2[%c5, %c0_13] : memref<9x256xf32, #tpu.memory_space<vmem>>, vector<1x256xf32>
    %29 = vector.broadcast %28 : vector<1x256xf32> to vector<16x256xf32>
    %30 = arith.mulf %27, %29 : vector<16x256xf32>
    %31 = arith.addf %26, %30 : vector<16x256xf32>
    %c0_14 = arith.constant 0 : index
    %c0_15 = arith.constant 0 : index
    %c2_16 = arith.constant 2 : index
    %c0_17 = arith.constant 0 : index
    %32 = vector.load %arg1[%c0_14, %c0_15, %c2_16, %c0_17] : memref<1x1x24x384xf32, #tpu.memory_space<vmem>>, vector<1x1x16x384xf32>
    %33 = vector.shape_cast %32 : vector<1x1x16x384xf32> to vector<16x384xf32>
    %34 = vector.extract_strided_slice %33 {offsets = [0, 0], sizes = [16, 256], strides = [1, 1]} : vector<16x384xf32> to vector<16x256xf32>
    %c6 = arith.constant 6 : index
    %c0_18 = arith.constant 0 : index
    %35 = vector.load %arg2[%c6, %c0_18] : memref<9x256xf32, #tpu.memory_space<vmem>>, vector<1x256xf32>
    %36 = vector.broadcast %35 : vector<1x256xf32> to vector<16x256xf32>
    %37 = arith.mulf %34, %36 : vector<16x256xf32>
    %38 = vector.extract_strided_slice %33 {offsets = [0, 16], sizes = [16, 256], strides = [1, 1]} : vector<16x384xf32> to vector<16x256xf32>
    %c7 = arith.constant 7 : index
    %c0_19 = arith.constant 0 : index
    %39 = vector.load %arg2[%c7, %c0_19] : memref<9x256xf32, #tpu.memory_space<vmem>>, vector<1x256xf32>
    %40 = vector.broadcast %39 : vector<1x256xf32> to vector<16x256xf32>
    %41 = arith.mulf %38, %40 : vector<16x256xf32>
    %42 = arith.addf %37, %41 : vector<16x256xf32>
    %43 = vector.extract_strided_slice %33 {offsets = [0, 32], sizes = [16, 256], strides = [1, 1]} : vector<16x384xf32> to vector<16x256xf32>
    %c8 = arith.constant 8 : index
    %c0_20 = arith.constant 0 : index
    %44 = vector.load %arg2[%c8, %c0_20] : memref<9x256xf32, #tpu.memory_space<vmem>>, vector<1x256xf32>
    %45 = vector.broadcast %44 : vector<1x256xf32> to vector<16x256xf32>
    %46 = arith.mulf %43, %45 : vector<16x256xf32>
    %47 = arith.addf %42, %46 : vector<16x256xf32>
    %48 = arith.addf %15, %31 : vector<16x256xf32>
    %49 = arith.addf %48, %47 : vector<16x256xf32>
    %c0_21 = arith.constant 0 : index
    %c0_22 = arith.constant 0 : index
    %50 = vector.load %arg3[%c0_21, %c0_22] : memref<1x256xf32, #tpu.memory_space<vmem>>, vector<1x256xf32>
    %51 = vector.broadcast %50 : vector<1x256xf32> to vector<16x256xf32>
    %52 = arith.addf %49, %51 : vector<16x256xf32>
    %c0_23 = arith.constant 0 : index
    %c0_24 = arith.constant 0 : index
    %c0_25 = arith.constant 0 : index
    %53 = vector.load %arg4[%c0_23, %c0_24, %c0_25] : memref<1x16x256xf32, #tpu.memory_space<vmem>>, vector<1x16x256xf32>
    %54 = vector.shape_cast %53 : vector<1x16x256xf32> to vector<16x256xf32>
    %55 = vector.shape_cast %52 : vector<16x256xf32> to vector<1x16x256xf32>
    tpu.vector_store %arg4[%c0_23, %c0_24, %c0_25], %55 {strides = array<i32>} : memref<1x16x256xf32, #tpu.memory_space<vmem>>, vector<1x16x256xf32>,
    %cst = arith.constant dense<0.000000e+00> : vector<256xf32>
    %56 = vector.multi_reduction <add>, %52, %cst [0] : vector<16x256xf32> to vector<256xf32>
    %57 = vector.shape_cast %56 : vector<256xf32> to vector<1x256xf32>
    %c0_26 = arith.constant 0 : index
    %c0_27 = arith.constant 0 : index
    %c0_28 = arith.constant 0 : index
    %58 = vector.load %arg5[%c0_26, %c0_27, %c0_28] : memref<1x2x256xf32, #tpu.memory_space<vmem>>, vector<1x1x256xf32>
    %59 = vector.shape_cast %58 : vector<1x1x256xf32> to vector<1x256xf32>
    %60 = vector.shape_cast %57 : vector<1x256xf32> to vector<1x1x256xf32>
    tpu.vector_store %arg5[%c0_26, %c0_27, %c0_28], %60 {strides = array<i32>} : memref<1x2x256xf32, #tpu.memory_space<vmem>>, vector<1x1x256xf32>,
    %61 = arith.mulf %52, %52 : vector<16x256xf32>
    %cst_29 = arith.constant dense<0.000000e+00> : vector<256xf32>
    %62 = vector.multi_reduction <add>, %61, %cst_29 [0] : vector<16x256xf32> to vector<256xf32>
    %63 = vector.shape_cast %62 : vector<256xf32> to vector<1x256xf32>
    %c0_30 = arith.constant 0 : index
    %c1_31 = arith.constant 1 : index
    %c0_32 = arith.constant 0 : index
    %64 = vector.load %arg5[%c0_30, %c1_31, %c0_32] : memref<1x2x256xf32, #tpu.memory_space<vmem>>, vector<1x1x256xf32>
    %65 = vector.shape_cast %64 : vector<1x1x256xf32> to vector<1x256xf32>
    %66 = vector.shape_cast %63 : vector<1x256xf32> to vector<1x1x256xf32>
    tpu.vector_store %arg5[%c0_30, %c1_31, %c0_32], %66 {strides = array<i32>} : memref<1x2x256xf32, #tpu.memory_space<vmem>>, vector<1x1x256xf32>,
    return
  }
  func.func @transform_0(%arg0: i32) -> (i32, i32, i32, i32) {
    %c0_i32 = arith.constant 0 : i32
    %c0_i32_0 = arith.constant 0 : i32
    %c0_i32_1 = arith.constant 0 : i32
    %c0_i32_2 = arith.constant 0 : i32
    return %c0_i32, %arg0, %c0_i32_0, %c0_i32_1 : i32, i32, i32, i32
  }
  func.func @transform_1(%arg0: i32) -> (i32, i32) {
    %c0_i32 = arith.constant 0 : i32
    %c0_i32_0 = arith.constant 0 : i32
    %c0_i32_1 = arith.constant 0 : i32
    return %c0_i32, %c0_i32_0 : i32, i32
  }
  func.func @transform_2(%arg0: i32) -> (i32, i32) {
    %c0_i32 = arith.constant 0 : i32
    %c0_i32_0 = arith.constant 0 : i32
    %c0_i32_1 = arith.constant 0 : i32
    return %c0_i32, %c0_i32_0 : i32, i32
  }
  func.func @transform_3(%arg0: i32) -> (i32, i32, i32) {
    %c0_i32 = arith.constant 0 : i32
    %c0_i32_0 = arith.constant 0 : i32
    %c0_i32_1 = arith.constant 0 : i32
    return %arg0, %c0_i32, %c0_i32_0 : i32, i32, i32
  }
  func.func @transform_4(%arg0: i32) -> (i32, i32, i32) {
    %c0_i32 = arith.constant 0 : i32
    %c0_i32_0 = arith.constant 0 : i32
    %c0_i32_1 = arith.constant 0 : i32
    return %arg0, %c0_i32, %c0_i32_0 : i32, i32, i32
  }
}

module attributes {stable_mosaic.version = 11 : i64} {
  func.func @kernel(%arg0: i32, %arg1: memref<1x16x256xf32, #tpu.memory_space<vmem>>, %arg2: memref<1x256xf32, #tpu.memory_space<vmem>>, %arg3: memref<1x256xf32, #tpu.memory_space<vmem>>, %arg4: memref<256x16xf32, #tpu.memory_space<vmem>>, %arg5: memref<16x4xf32, #tpu.memory_space<vmem>>, %arg6: memref<1x4xf32, #tpu.memory_space<vmem>>, %arg7: memref<4x16xf32, #tpu.memory_space<vmem>>, %arg8: memref<1x16xf32, #tpu.memory_space<vmem>>, %arg9: memref<1x8x16xf32, #tpu.memory_space<vmem>>) attributes {dimension_semantics = [#tpu.dimension_semantics<parallel>], iteration_bounds = array<i64: 2>, scalar_prefetch = 0 : i64, scratch_operands = 0 : i64, tpu.core_type = #tpu.core_type<tc>, window_params = [{transform_indices = @transform_0, window_bounds = array<i64: 1, 16, 256>}, {pipeline_mode = #tpu.pipeline_mode<synchronous>, transform_indices = @transform_1, window_bounds = array<i64: 1, 256>}, {pipeline_mode = #tpu.pipeline_mode<synchronous>, transform_indices = @transform_2, window_bounds = array<i64: 1, 256>}, {pipeline_mode = #tpu.pipeline_mode<synchronous>, transform_indices = @transform_3, window_bounds = array<i64: 256, 16>}, {pipeline_mode = #tpu.pipeline_mode<synchronous>, transform_indices = @transform_4, window_bounds = array<i64: 16, 4>}, {pipeline_mode = #tpu.pipeline_mode<synchronous>, transform_indices = @transform_5, window_bounds = array<i64: 1, 4>}, {pipeline_mode = #tpu.pipeline_mode<synchronous>, transform_indices = @transform_6, window_bounds = array<i64: 4, 16>}, {pipeline_mode = #tpu.pipeline_mode<synchronous>, transform_indices = @transform_7, window_bounds = array<i64: 1, 16>}, {transform_indices = @transform_8, window_bounds = array<i64: 1, 8, 16>}]} {
    %c0 = arith.constant 0 : index
    %c0_0 = arith.constant 0 : index
    %c0_1 = arith.constant 0 : index
    %0 = vector.load %arg1[%c0, %c0_0, %c0_1] : memref<1x16x256xf32, #tpu.memory_space<vmem>>, vector<1x16x256xf32>
    %1 = vector.shape_cast %0 : vector<1x16x256xf32> to vector<16x256xf32>
    %c0_2 = arith.constant 0 : index
    %c0_3 = arith.constant 0 : index
    %2 = vector.load %arg2[%c0_2, %c0_3] : memref<1x256xf32, #tpu.memory_space<vmem>>, vector<1x256xf32>
    %3 = vector.broadcast %2 : vector<1x256xf32> to vector<16x256xf32>
    %4 = arith.mulf %1, %3 : vector<16x256xf32>
    %c0_4 = arith.constant 0 : index
    %c0_5 = arith.constant 0 : index
    %5 = vector.load %arg3[%c0_4, %c0_5] : memref<1x256xf32, #tpu.memory_space<vmem>>, vector<1x256xf32>
    %6 = vector.broadcast %5 : vector<1x256xf32> to vector<16x256xf32>
    %7 = arith.addf %4, %6 : vector<16x256xf32>
    %8 = arith.negf %7 : vector<16x256xf32>
    %9 = math.exp %8 : vector<16x256xf32>
    %cst = arith.constant 1.000000e+00 : f32
    %10 = vector.broadcast %cst : f32 to vector<16x256xf32>
    %11 = arith.addf %10, %9 : vector<16x256xf32>
    %12 = arith.divf %10, %11 : vector<16x256xf32>
    %13 = arith.mulf %7, %12 : vector<16x256xf32>
    %cst_6 = arith.constant dense<0.000000e+00> : vector<256xf32>
    %14 = vector.multi_reduction <add>, %13, %cst_6 [0] : vector<16x256xf32> to vector<256xf32>
    %15 = vector.shape_cast %14 : vector<256xf32> to vector<1x256xf32>
    %c0_7 = arith.constant 0 : index
    %c0_8 = arith.constant 0 : index
    %16 = vector.load %arg4[%c0_7, %c0_8] : memref<256x16xf32, #tpu.memory_space<vmem>>, vector<256x16xf32>
    %cst_9 = arith.constant dense<0.000000e+00> : vector<1x16xf32>
    %17 = tpu.matmul %15, %16, %cst_9 {dimension_numbers = #tpu.dot_dimension_numbers<[1], [0], [0], [1], [0, 0, 1, 1], [], []>} : vector<1x256xf32>, vector<256x16xf32>, vector<1x16xf32> -> vector<1x16xf32>
    %cst_10 = arith.constant 3.906250e-03 : f32
    %18 = vector.broadcast %cst_10 : f32 to vector<1x16xf32>
    %19 = arith.mulf %17, %18 : vector<1x16xf32>
    %c0_11 = arith.constant 0 : index
    %c0_12 = arith.constant 0 : index
    %20 = vector.load %arg5[%c0_11, %c0_12] : memref<16x4xf32, #tpu.memory_space<vmem>>, vector<16x4xf32>
    %cst_13 = arith.constant dense<0.000000e+00> : vector<1x4xf32>
    %21 = tpu.matmul %19, %20, %cst_13 {dimension_numbers = #tpu.dot_dimension_numbers<[1], [0], [0], [1], [0, 0, 1, 1], [], []>} : vector<1x16xf32>, vector<16x4xf32>, vector<1x4xf32> -> vector<1x4xf32>
    %c0_14 = arith.constant 0 : index
    %c0_15 = arith.constant 0 : index
    %22 = vector.load %arg6[%c0_14, %c0_15] : memref<1x4xf32, #tpu.memory_space<vmem>>, vector<1x4xf32>
    %23 = arith.addf %21, %22 : vector<1x4xf32>
    %cst_16 = arith.constant 0.000000e+00 : f32
    %24 = vector.broadcast %cst_16 : f32 to vector<1x4xf32>
    %25 = arith.maximumf %23, %24 : vector<1x4xf32>
    %c0_17 = arith.constant 0 : index
    %c0_18 = arith.constant 0 : index
    %26 = vector.load %arg7[%c0_17, %c0_18] : memref<4x16xf32, #tpu.memory_space<vmem>>, vector<4x16xf32>
    %cst_19 = arith.constant dense<0.000000e+00> : vector<1x16xf32>
    %27 = tpu.matmul %25, %26, %cst_19 {dimension_numbers = #tpu.dot_dimension_numbers<[1], [0], [0], [1], [0, 0, 1, 1], [], []>} : vector<1x4xf32>, vector<4x16xf32>, vector<1x16xf32> -> vector<1x16xf32>
    %c0_20 = arith.constant 0 : index
    %c0_21 = arith.constant 0 : index
    %28 = vector.load %arg8[%c0_20, %c0_21] : memref<1x16xf32, #tpu.memory_space<vmem>>, vector<1x16xf32>
    %29 = arith.addf %27, %28 : vector<1x16xf32>
    %30 = arith.negf %29 : vector<1x16xf32>
    %31 = math.exp %30 : vector<1x16xf32>
    %cst_22 = arith.constant 1.000000e+00 : f32
    %32 = vector.broadcast %cst_22 : f32 to vector<1x16xf32>
    %33 = arith.addf %32, %31 : vector<1x16xf32>
    %34 = arith.divf %32, %33 : vector<1x16xf32>
    %35 = vector.shape_cast %34 : vector<1x16xf32> to vector<1x16xf32>
    %36 = vector.broadcast %35 : vector<1x16xf32> to vector<8x16xf32>
    %c0_23 = arith.constant 0 : index
    %c0_24 = arith.constant 0 : index
    %c0_25 = arith.constant 0 : index
    %37 = vector.load %arg9[%c0_23, %c0_24, %c0_25] : memref<1x8x16xf32, #tpu.memory_space<vmem>>, vector<1x8x16xf32>
    %38 = vector.shape_cast %37 : vector<1x8x16xf32> to vector<8x16xf32>
    %39 = vector.shape_cast %36 : vector<8x16xf32> to vector<1x8x16xf32>
    tpu.vector_store %arg9[%c0_23, %c0_24, %c0_25], %39 {strides = array<i32>} : memref<1x8x16xf32, #tpu.memory_space<vmem>>, vector<1x8x16xf32>,
    return
  }
  func.func @transform_0(%arg0: i32) -> (i32, i32, i32) {
    %c0_i32 = arith.constant 0 : i32
    %c0_i32_0 = arith.constant 0 : i32
    %c0_i32_1 = arith.constant 0 : i32
    return %arg0, %c0_i32, %c0_i32_0 : i32, i32, i32
  }
  func.func @transform_1(%arg0: i32) -> (i32, i32) {
    %c0_i32 = arith.constant 0 : i32
    %c0_i32_0 = arith.constant 0 : i32
    %c0_i32_1 = arith.constant 0 : i32
    return %c0_i32, %c0_i32_0 : i32, i32
  }
  func.func @transform_2(%arg0: i32) -> (i32, i32) {
    %c0_i32 = arith.constant 0 : i32
    %c0_i32_0 = arith.constant 0 : i32
    %c0_i32_1 = arith.constant 0 : i32
    return %c0_i32, %c0_i32_0 : i32, i32
  }
  func.func @transform_3(%arg0: i32) -> (i32, i32) {
    %c0_i32 = arith.constant 0 : i32
    %c0_i32_0 = arith.constant 0 : i32
    %c0_i32_1 = arith.constant 0 : i32
    return %c0_i32, %c0_i32_0 : i32, i32
  }
  func.func @transform_4(%arg0: i32) -> (i32, i32) {
    %c0_i32 = arith.constant 0 : i32
    %c0_i32_0 = arith.constant 0 : i32
    %c0_i32_1 = arith.constant 0 : i32
    return %c0_i32, %c0_i32_0 : i32, i32
  }
  func.func @transform_5(%arg0: i32) -> (i32, i32) {
    %c0_i32 = arith.constant 0 : i32
    %c0_i32_0 = arith.constant 0 : i32
    %c0_i32_1 = arith.constant 0 : i32
    return %c0_i32, %c0_i32_0 : i32, i32
  }
  func.func @transform_6(%arg0: i32) -> (i32, i32) {
    %c0_i32 = arith.constant 0 : i32
    %c0_i32_0 = arith.constant 0 : i32
    %c0_i32_1 = arith.constant 0 : i32
    return %c0_i32, %c0_i32_0 : i32, i32
  }
  func.func @transform_7(%arg0: i32) -> (i32, i32) {
    %c0_i32 = arith.constant 0 : i32
    %c0_i32_0 = arith.constant 0 : i32
    %c0_i32_1 = arith.constant 0 : i32
    return %c0_i32, %c0_i32_0 : i32, i32
  }
  func.func @transform_8(%arg0: i32) -> (i32, i32, i32) {
    %c0_i32 = arith.constant 0 : i32
    %c0_i32_0 = arith.constant 0 : i32
    %c0_i32_1 = arith.constant 0 : i32
    return %arg0, %c0_i32, %c0_i32_0 : i32, i32, i32
  }
}

module attributes {stable_mosaic.version = 11 : i64} {
  func.func @kernel(%arg0: i32, %arg1: i32, %arg2: memref<1x256x16xf32, #tpu.memory_space<vmem>>, %arg3: memref<1x16xf32, #tpu.memory_space<vmem>>, %arg4: memref<1x16xf32, #tpu.memory_space<vmem>>, %arg5: memref<1x8x16xf32, #tpu.memory_space<vmem>>, %arg6: memref<16x16xf32, #tpu.memory_space<vmem>>, %arg7: memref<1x16xf32, #tpu.memory_space<vmem>>, %arg8: memref<1x256x16xf32, #tpu.memory_space<vmem>>, %arg9: memref<1x1x2x16xf32, #tpu.memory_space<vmem>>) attributes {dimension_semantics = [#tpu.dimension_semantics<parallel>, #tpu.dimension_semantics<parallel>], iteration_bounds = array<i64: 2, 1>, scalar_prefetch = 0 : i64, scratch_operands = 0 : i64, tpu.core_type = #tpu.core_type<tc>, window_params = [{transform_indices = @transform_0, window_bounds = array<i64: 1, 256, 16>}, {pipeline_mode = #tpu.pipeline_mode<synchronous>, transform_indices = @transform_1, window_bounds = array<i64: 1, 16>}, {pipeline_mode = #tpu.pipeline_mode<synchronous>, transform_indices = @transform_2, window_bounds = array<i64: 1, 16>}, {transform_indices = @transform_3, window_bounds = array<i64: 1, 8, 16>}, {pipeline_mode = #tpu.pipeline_mode<synchronous>, transform_indices = @transform_4, window_bounds = array<i64: 16, 16>}, {pipeline_mode = #tpu.pipeline_mode<synchronous>, transform_indices = @transform_5, window_bounds = array<i64: 1, 16>}, {transform_indices = @transform_6, window_bounds = array<i64: 1, 256, 16>}, {transform_indices = @transform_7, window_bounds = array<i64: 1, 1, 2, 16>}]} {
    %c0 = arith.constant 0 : index
    %c0_0 = arith.constant 0 : index
    %c0_1 = arith.constant 0 : index
    %0 = vector.load %arg2[%c0, %c0_0, %c0_1] : memref<1x256x16xf32, #tpu.memory_space<vmem>>, vector<1x256x16xf32>
    %1 = vector.shape_cast %0 : vector<1x256x16xf32> to vector<256x16xf32>
    %c0_2 = arith.constant 0 : index
    %c0_3 = arith.constant 0 : index
    %2 = vector.load %arg3[%c0_2, %c0_3] : memref<1x16xf32, #tpu.memory_space<vmem>>, vector<1x16xf32>
    %3 = vector.broadcast %2 : vector<1x16xf32> to vector<256x16xf32>
    %4 = arith.mulf %1, %3 : vector<256x16xf32>
    %c0_4 = arith.constant 0 : index
    %c0_5 = arith.constant 0 : index
    %5 = vector.load %arg4[%c0_4, %c0_5] : memref<1x16xf32, #tpu.memory_space<vmem>>, vector<1x16xf32>
    %6 = vector.broadcast %5 : vector<1x16xf32> to vector<256x16xf32>
    %7 = arith.addf %4, %6 : vector<256x16xf32>
    %8 = arith.negf %7 : vector<256x16xf32>
    %9 = math.exp %8 : vector<256x16xf32>
    %cst = arith.constant 1.000000e+00 : f32
    %10 = vector.broadcast %cst : f32 to vector<256x16xf32>
    %11 = arith.addf %10, %9 : vector<256x16xf32>
    %12 = arith.divf %10, %11 : vector<256x16xf32>
    %13 = arith.mulf %7, %12 : vector<256x16xf32>
    %c0_6 = arith.constant 0 : index
    %c0_7 = arith.constant 0 : index
    %c0_8 = arith.constant 0 : index
    %14 = vector.load %arg5[%c0_6, %c0_7, %c0_8] : memref<1x8x16xf32, #tpu.memory_space<vmem>>, vector<1x1x16xf32>
    %15 = vector.shape_cast %14 : vector<1x1x16xf32> to vector<1x16xf32>
    %16 = vector.broadcast %15 : vector<1x16xf32> to vector<256x16xf32>
    %17 = arith.mulf %13, %16 : vector<256x16xf32>
    %c0_9 = arith.constant 0 : index
    %c0_10 = arith.constant 0 : index
    %18 = vector.load %arg6[%c0_9, %c0_10] : memref<16x16xf32, #tpu.memory_space<vmem>>, vector<16x16xf32>
    %cst_11 = arith.constant dense<0.000000e+00> : vector<256x16xf32>
    %19 = tpu.matmul %17, %18, %cst_11 {dimension_numbers = #tpu.dot_dimension_numbers<[1], [0], [0], [1], [0, 0, 1, 1], [], []>} : vector<256x16xf32>, vector<16x16xf32>, vector<256x16xf32> -> vector<256x16xf32>
    %c0_12 = arith.constant 0 : index
    %c0_13 = arith.constant 0 : index
    %20 = vector.load %arg7[%c0_12, %c0_13] : memref<1x16xf32, #tpu.memory_space<vmem>>, vector<1x16xf32>
    %21 = vector.broadcast %20 : vector<1x16xf32> to vector<256x16xf32>
    %22 = arith.addf %19, %21 : vector<256x16xf32>
    %c0_14 = arith.constant 0 : index
    %c0_15 = arith.constant 0 : index
    %c0_16 = arith.constant 0 : index
    %23 = vector.load %arg8[%c0_14, %c0_15, %c0_16] : memref<1x256x16xf32, #tpu.memory_space<vmem>>, vector<1x256x16xf32>
    %24 = vector.shape_cast %23 : vector<1x256x16xf32> to vector<256x16xf32>
    %25 = vector.shape_cast %22 : vector<256x16xf32> to vector<1x256x16xf32>
    tpu.vector_store %arg8[%c0_14, %c0_15, %c0_16], %25 {strides = array<i32>} : memref<1x256x16xf32, #tpu.memory_space<vmem>>, vector<1x256x16xf32>,
    %cst_17 = arith.constant dense<0.000000e+00> : vector<16xf32>
    %26 = vector.multi_reduction <add>, %22, %cst_17 [0] : vector<256x16xf32> to vector<16xf32>
    %27 = vector.shape_cast %26 : vector<16xf32> to vector<1x16xf32>
    %c0_18 = arith.constant 0 : index
    %c0_19 = arith.constant 0 : index
    %c0_20 = arith.constant 0 : index
    %c0_21 = arith.constant 0 : index
    %28 = vector.load %arg9[%c0_18, %c0_19, %c0_20, %c0_21] : memref<1x1x2x16xf32, #tpu.memory_space<vmem>>, vector<1x1x1x16xf32>
    %29 = vector.shape_cast %28 : vector<1x1x1x16xf32> to vector<1x16xf32>
    %30 = vector.shape_cast %27 : vector<1x16xf32> to vector<1x1x1x16xf32>
    tpu.vector_store %arg9[%c0_18, %c0_19, %c0_20, %c0_21], %30 {strides = array<i32>} : memref<1x1x2x16xf32, #tpu.memory_space<vmem>>, vector<1x1x1x16xf32>,
    %31 = arith.mulf %22, %22 : vector<256x16xf32>
    %cst_22 = arith.constant dense<0.000000e+00> : vector<16xf32>
    %32 = vector.multi_reduction <add>, %31, %cst_22 [0] : vector<256x16xf32> to vector<16xf32>
    %33 = vector.shape_cast %32 : vector<16xf32> to vector<1x16xf32>
    %c0_23 = arith.constant 0 : index
    %c0_24 = arith.constant 0 : index
    %c1 = arith.constant 1 : index
    %c0_25 = arith.constant 0 : index
    %34 = vector.load %arg9[%c0_23, %c0_24, %c1, %c0_25] : memref<1x1x2x16xf32, #tpu.memory_space<vmem>>, vector<1x1x1x16xf32>
    %35 = vector.shape_cast %34 : vector<1x1x1x16xf32> to vector<1x16xf32>
    %36 = vector.shape_cast %33 : vector<1x16xf32> to vector<1x1x1x16xf32>
    tpu.vector_store %arg9[%c0_23, %c0_24, %c1, %c0_25], %36 {strides = array<i32>} : memref<1x1x2x16xf32, #tpu.memory_space<vmem>>, vector<1x1x1x16xf32>,
    return
  }
  func.func @transform_0(%arg0: i32, %arg1: i32) -> (i32, i32, i32) {
    %c0_i32 = arith.constant 0 : i32
    %c0_i32_0 = arith.constant 0 : i32
    return %arg0, %arg1, %c0_i32 : i32, i32, i32
  }
  func.func @transform_1(%arg0: i32, %arg1: i32) -> (i32, i32) {
    %c0_i32 = arith.constant 0 : i32
    %c0_i32_0 = arith.constant 0 : i32
    %c0_i32_1 = arith.constant 0 : i32
    return %c0_i32, %c0_i32_0 : i32, i32
  }
  func.func @transform_2(%arg0: i32, %arg1: i32) -> (i32, i32) {
    %c0_i32 = arith.constant 0 : i32
    %c0_i32_0 = arith.constant 0 : i32
    %c0_i32_1 = arith.constant 0 : i32
    return %c0_i32, %c0_i32_0 : i32, i32
  }
  func.func @transform_3(%arg0: i32, %arg1: i32) -> (i32, i32, i32) {
    %c0_i32 = arith.constant 0 : i32
    %c0_i32_0 = arith.constant 0 : i32
    %c0_i32_1 = arith.constant 0 : i32
    return %arg0, %c0_i32, %c0_i32_0 : i32, i32, i32
  }
  func.func @transform_4(%arg0: i32, %arg1: i32) -> (i32, i32) {
    %c0_i32 = arith.constant 0 : i32
    %c0_i32_0 = arith.constant 0 : i32
    %c0_i32_1 = arith.constant 0 : i32
    return %c0_i32, %c0_i32_0 : i32, i32
  }
  func.func @transform_5(%arg0: i32, %arg1: i32) -> (i32, i32) {
    %c0_i32 = arith.constant 0 : i32
    %c0_i32_0 = arith.constant 0 : i32
    %c0_i32_1 = arith.constant 0 : i32
    return %c0_i32, %c0_i32_0 : i32, i32
  }
  func.func @transform_6(%arg0: i32, %arg1: i32) -> (i32, i32, i32) {
    %c0_i32 = arith.constant 0 : i32
    %c0_i32_0 = arith.constant 0 : i32
    return %arg0, %arg1, %c0_i32 : i32, i32, i32
  }
  func.func @transform_7(%arg0: i32, %arg1: i32) -> (i32, i32, i32, i32) {
    %c0_i32 = arith.constant 0 : i32
    %c0_i32_0 = arith.constant 0 : i32
    %c0_i32_1 = arith.constant 0 : i32
    return %arg0, %arg1, %c0_i32, %c0_i32_0 : i32, i32, i32, i32
  }
}

module attributes {stable_mosaic.version = 11 : i64} {
  func.func @kernel(%arg0: i32, %arg1: i32, %arg2: memref<1x16x256xf32, #tpu.memory_space<vmem>>, %arg3: memref<1x256xf32, #tpu.memory_space<vmem>>, %arg4: memref<1x256xf32, #tpu.memory_space<vmem>>, %arg5: memref<1x16x256xf32, #tpu.memory_space<vmem>>, %arg6: memref<1x16x256xf32, #tpu.memory_space<vmem>>) attributes {dimension_semantics = [#tpu.dimension_semantics<parallel>, #tpu.dimension_semantics<parallel>], iteration_bounds = array<i64: 2, 1>, scalar_prefetch = 0 : i64, scratch_operands = 0 : i64, tpu.core_type = #tpu.core_type<tc>, window_params = [{transform_indices = @transform_0, window_bounds = array<i64: 1, 16, 256>}, {pipeline_mode = #tpu.pipeline_mode<synchronous>, transform_indices = @transform_1, window_bounds = array<i64: 1, 256>}, {pipeline_mode = #tpu.pipeline_mode<synchronous>, transform_indices = @transform_2, window_bounds = array<i64: 1, 256>}, {transform_indices = @transform_3, window_bounds = array<i64: 1, 16, 256>}, {transform_indices = @transform_4, window_bounds = array<i64: 1, 16, 256>}]} {
    %c0 = arith.constant 0 : index
    %c0_0 = arith.constant 0 : index
    %c0_1 = arith.constant 0 : index
    %0 = vector.load %arg2[%c0, %c0_0, %c0_1] : memref<1x16x256xf32, #tpu.memory_space<vmem>>, vector<1x16x256xf32>
    %1 = vector.shape_cast %0 : vector<1x16x256xf32> to vector<16x256xf32>
    %c0_2 = arith.constant 0 : index
    %c0_3 = arith.constant 0 : index
    %2 = vector.load %arg3[%c0_2, %c0_3] : memref<1x256xf32, #tpu.memory_space<vmem>>, vector<1x256xf32>
    %3 = vector.broadcast %2 : vector<1x256xf32> to vector<16x256xf32>
    %4 = arith.mulf %1, %3 : vector<16x256xf32>
    %c0_4 = arith.constant 0 : index
    %c0_5 = arith.constant 0 : index
    %5 = vector.load %arg4[%c0_4, %c0_5] : memref<1x256xf32, #tpu.memory_space<vmem>>, vector<1x256xf32>
    %6 = vector.broadcast %5 : vector<1x256xf32> to vector<16x256xf32>
    %7 = arith.addf %4, %6 : vector<16x256xf32>
    %c0_6 = arith.constant 0 : index
    %c0_7 = arith.constant 0 : index
    %c0_8 = arith.constant 0 : index
    %8 = vector.load %arg5[%c0_6, %c0_7, %c0_8] : memref<1x16x256xf32, #tpu.memory_space<vmem>>, vector<1x16x256xf32>
    %9 = vector.shape_cast %8 : vector<1x16x256xf32> to vector<16x256xf32>
    %10 = arith.addf %7, %9 : vector<16x256xf32>
    %c0_9 = arith.constant 0 : index
    %c0_10 = arith.constant 0 : index
    %c0_11 = arith.constant 0 : index
    %11 = vector.load %arg6[%c0_9, %c0_10, %c0_11] : memref<1x16x256xf32, #tpu.memory_space<vmem>>, vector<1x16x256xf32>
    %12 = vector.shape_cast %11 : vector<1x16x256xf32> to vector<16x256xf32>
    %13 = vector.shape_cast %10 : vector<16x256xf32> to vector<1x16x256xf32>
    tpu.vector_store %arg6[%c0_9, %c0_10, %c0_11], %13 {strides = array<i32>} : memref<1x16x256xf32, #tpu.memory_space<vmem>>, vector<1x16x256xf32>,
    return
  }
  func.func @transform_0(%arg0: i32, %arg1: i32) -> (i32, i32, i32) {
    %c0_i32 = arith.constant 0 : i32
    %c0_i32_0 = arith.constant 0 : i32
    return %arg0, %arg1, %c0_i32 : i32, i32, i32
  }
  func.func @transform_1(%arg0: i32, %arg1: i32) -> (i32, i32) {
    %c0_i32 = arith.constant 0 : i32
    %c0_i32_0 = arith.constant 0 : i32
    %c0_i32_1 = arith.constant 0 : i32
    return %c0_i32, %c0_i32_0 : i32, i32
  }
  func.func @transform_2(%arg0: i32, %arg1: i32) -> (i32, i32) {
    %c0_i32 = arith.constant 0 : i32
    %c0_i32_0 = arith.constant 0 : i32
    %c0_i32_1 = arith.constant 0 : i32
    return %c0_i32, %c0_i32_0 : i32, i32
  }
  func.func @transform_3(%arg0: i32, %arg1: i32) -> (i32, i32, i32) {
    %c0_i32 = arith.constant 0 : i32
    %c0_i32_0 = arith.constant 0 : i32
    return %arg0, %arg1, %c0_i32 : i32, i32, i32
  }
  func.func @transform_4(%arg0: i32, %arg1: i32) -> (i32, i32, i32) {
    %c0_i32 = arith.constant 0 : i32
    %c0_i32_0 = arith.constant 0 : i32
    return %arg0, %arg1, %c0_i32 : i32, i32, i32
  }
}

</mosaic_0001>

<bundles_post_ra>
// kernel: tile.89
= control target key start
LH: loop header
LB: loop body
LE: loop exit
PB: predicated region body
PF: predicated region fallthrough
CT: control target
= control target key end

     0   :  { %s28_s0 = inlined_call_operand.vmem [shape: f32[16], index: 0, kind: input, shape index: {}]   ;;  %s29_s1 = inlined_call_operand.vmem [shape: f32[16,16], index: 1, kind: output, shape index: {}]  }
   0x1   :  { %v4_v0 = vld [vmem:[%s28_s0] ss:$0 sm:$0xff] }
   0x2   :  { %5 = vst [vmem:[%s29_s1] sm:$0xff] %v4_v0 }
   0x3   :  { %8 = vst [vmem:[%s29_s1 + $0x8] sm:$0xff] %v4_v0 }

// kernel: tile.100
= control target key start
LH: loop header
LB: loop body
LE: loop exit
PB: predicated region body
PF: predicated region fallthrough
CT: control target
= control target key end

     0   :  { %s7_s6 = smov 3  ;;  %s21_s9 = smov 3  ;;  %vm4_vm0 = vcmask 130048   ;;  %vm11_vm1 = vcmask 1048448   ;;  %vm18_vm2 = vcmask 917248   ;;  %vm25_vm3 = vcmask 786048   ;;  %s129_s0 = inlined_call_operand.vmem [shape: f32[16,16], index: 0, kind: input, shape index: {}]   ;;  %s130_s1 = inlined_call_operand.vmem [shape: f32[1,256], index: 1, kind: output, shape index: {}]  }
   0x1   :  { %v67_v0 = vld [vmem:[%s129_s0 + $0x7] ss:$8 sm:%s7_s6]   ;;  %s82_s10 = smov 112   ;;  %v69_v1 = vld [vmem:[%s129_s0 + $0x5] ss:$8 sm:%s21_s9]   ;;  %s83_s13 = smov 80  }
   0x2   :  { %9 = vrot.lane.b32.xlu0 %v67_v0, %s82_s10  ;;  %23 = vrot.lane.b32.xlu1 %v69_v1, %s83_s13  ;;  %s14_s14 = smov 3  ;;  %s28_s15 = smov 3  ;;  %vm32_vm4 = vcmask 654848   ;;  %vm39_vm5 = vcmask 523648   ;;  %vm46_vm6 = vcmask 392448   ;;  %vm53_vm7 = vcmask 261248  }
   0x3   :  { %s35_s16 = smov 3  ;;  %v68_v3 = vld [vmem:[%s129_s0 + $0x6] ss:$8 sm:%s14_s14]   ;;  %s84_s21 = smov 48   ;;  %v70_v4 = vld [vmem:[%s129_s0 + $0x4] ss:$8 sm:%s28_s15]  }
   0x4   :  { %v71_v2 = vld [vmem:[%s129_s0 + $0x3] ss:$8 sm:%s35_s16]   ;;  %s42_s24 = smov 3  ;;  %s85_s25 = smov 96  }
   0x5   :  { %37 = vrot.lane.b32.xlu2 %v71_v2, %s84_s21  ;;  %s86_s26 = smov 64   ;;  %s49_s27 = smov 3  ;;  %v72_v5 = vld [vmem:[%s129_s0 + $0x2] ss:$8 sm:%s42_s24]  }
   0x6   :  { %v73_v6 = vld [vmem:[%s129_s0 + $0x1] ss:$8 sm:%s49_s27]   ;;  %s87_s3 = smov 32   ;;  %s88_s4 = smov 16  }
   0x7   :  { %s2_s5 = smov 3 }
   0x8   :  { %v3_v7 = vld [vmem:[%s129_s0] ss:$8 sm:%s2_s5]  }
   0x9   :  { %5 = vst.msk [vmem:[#allocation0] ss:$8 sm:$0x3] %vm4_vm0, %v3_v7  }
   0xa   :  { %16 = vrot.lane.b32.xlu0 %v68_v3, %s85_s25  ;;  %30 = vrot.lane.b32.xlu1 %v70_v4, %s86_s26 }
   0xd   :  { %44 = vrot.lane.b32.xlu2 %v72_v5, %s87_s3 }
  0x12   :  { %51 = vrot.lane.b32.xlu0 %v73_v6, %s88_s4 }
  0x5f   :  { %v38_v8 = vpop.permute.xlu2 %37  }
  0x67   :  { %v45_v9 = vpop.permute.xlu2 %44  }
  0x74   :  { %v10_v10 = vpop.permute.xlu0 %9   ;;  %v24_v11 = vpop.permute.xlu1 %23  }
  0x75   :  { %12 = vst.msk [vmem:[#allocation0] ss:$8 sm:$0x3] %vm11_vm1, %v10_v10  }
  0x7c   :  { %v17_v12 = vpop.permute.xlu0 %16   ;;  %v31_v13 = vpop.permute.xlu1 %30  }
  0x7d   :  { %19 = vst.msk [vmem:[#allocation0] ss:$8 sm:$0x3] %vm18_vm2, %v17_v12  }
  0x7e   :  { %26 = vst.msk [vmem:[#allocation0] ss:$8 sm:$0x3] %vm25_vm3, %v24_v11  }
  0x7f   :  { %33 = vst.msk [vmem:[#allocation0] ss:$8 sm:$0x3] %vm32_vm4, %v31_v13  }
  0x80   :  { %40 = vst.msk [vmem:[#allocation0] ss:$8 sm:$0x3] %vm39_vm5, %v38_v8  }
  0x81   :  { %47 = vst.msk [vmem:[#allocation0] ss:$8 sm:$0x3] %vm46_vm6, %v45_v9  }
  0x84   :  { %v52_v14 = vpop.permute.xlu0 %51  }
  0x85   :  { %54 = vst.msk [vmem:[#allocation0] ss:$8 sm:$0x3] %vm53_vm7, %v52_v14  }
  0x8c   :  { %v57_v15 = vld [vmem:[#allocation0] sm:$0x1]  ;;  %v62_v16 = vld [vmem:[#allocation0 + $0x8] sm:$0x1] }
  0x8d   :  { %60 = vst [vmem:[%s130_s1] sm:$0x1] %v57_v15 }
  0x8e   :  { %74 = vst [vmem:[%s130_s1 + $0x1] sm:$0x1] %v62_v16 }

// kernel: mbconv1_pallas.4
= control target key start
LH: loop header
LB: loop body
LE: loop exit
PB: predicated region body
PF: predicated region fallthrough
CT: control target
= control target key end

     0   :  { %s913_s15 = smov 0   ;;  %s1225_s0 = inlined_call_operand.vmem [shape: f32[1,2,24,384], index: 0, kind: input, shape index: {}]   ;;  %s1226_s1 = inlined_call_operand.vmem [shape: f32[9,256], index: 1, kind: input, shape index: {}]   ;;  %s1227_s2 = inlined_call_operand.vmem [shape: f32[1,256], index: 2, kind: input, shape index: {}]   ;;  %s1228_s3 = inlined_call_operand.vmem [shape: f32[2,16,256], index: 3, kind: output, shape index: {0}]   ;;  %s1229_s4 = inlined_call_operand.vmem [shape: f32[2,2,256], index: 4, kind: output, shape index: {1}]  }
   0x1 LB: > { %s840_s16 = sadd.s32 4294967295, %s882_s15   ;;  %p844_p0 = scmp.ge.s32.totalorder %s882_s15, 1  ;;  %s882_s15 = sphi %s913_s15, %s15_s15  }
   0x2   : > { %p165_p1 = scmp.lt.s32.totalorder %s882_s15, 3 }
   0x4   : > { %p166_p2 = pnand %p844_p0, %p165_p1 }
   0x5   : > { %s884_s23 = smov (!%p166_p2), 16   ;;  %s885_s24 = smov (!%p166_p2), 32  }
   0x6   : > { %169 = sbr.rel (%p166_p2) target bundleno = 404 (0x194), region = 32  ;;  %p196_p3 = scmp.lt.s32.totalorder (!%p166_p2), %s840_s16, 1 }
   0x7   : > { %s886_s9 = smov (!%p166_p2), 112   ;;  %s887_s10 = smov (!%p166_p2), 96  }
   0xb   : > { %v850_v0 = vld [vmem:[%s1226_s1 + $0x1] ss:$8 sm:$0x3]  ;;  %v851_v2 = vld [vmem:[%s1226_s1 + $0x2] ss:$8 sm:$0x3] }
   0xc   : > { %v230_v1 = vperm.slane %v850_v0, 0  ;;  %v853_v3 = vld [vmem:[%s1226_s1 + $0x4] ss:$8 sm:$0x3]  ;;  %v281_v4 = vperm.slane %v851_v2, 0  ;;  %v231_v7 = vperm.slane %v850_v0, 1 }
   0xd   : > { %v354_v5 = vperm.slane %v853_v3, 0  ;;  %v856_v6 = vld [vmem:[%s1226_s1 + $0x7] ss:$8 sm:$0x3]  ;;  %v355_v8 = vperm.slane %v853_v3, 1  ;;  %v282_v11 = vperm.slane %v851_v2, 1 }
   0xe   : > { %232 = vrot.lane.b32.xlu0 %v230_v1, %s884_s23  ;;  %283 = vrot.lane.b32.xlu2 %v281_v4, %s885_s24  ;;  %v507_v9 = vperm.slane %v856_v6, 0  ;;  %v857_v10 = vld [vmem:[%s1226_s1 + $0x10] ss:$8 sm:$0x3]  ;;  %v508_v16 = vperm.slane %v856_v6, 1  ;;  %s1231_s16 = smov (!%p196_p3, %s840_s16), 1 }
   0xf   : > { %356 = vrot.lane.b32.xlu1 %v354_v5, %s884_s23  ;;  %v854_v12 = vld [vmem:[%s1226_s1 + $0x5] ss:$8 sm:$0x3]  ;;  %v575_v14 = vperm.slane %v857_v10, 1  ;;  %v574_v17 = vperm.slane %v857_v10, 0  ;;  %s863_s5 = smul.u32 72, %s1231_s16 }
  0x10   : > { %v421_v13 = vperm.slane %v854_v12, 0  ;;  %v422_v15 = vperm.slane %v854_v12, 1  ;;  %vm236_vm0 = vcmask 130048   ;;  %vm287_vm1 = vcmask 261120   ;;  %s861_s21 = sshll.u32 %s1231_s16, 5  ;;  %s862_s25 = sshll.u32 %s1231_s16, 2 }
  0x11   : > { %s949_s8 = scalar_lea.vmem %s1225_s0, %s863_s5  ;;  %vm265_vm2 = vcmask 916480   ;;  %vm316_vm3 = vcmask 785408   ;;  %vm644_vm4 = vcmask 1046528   ;;  %vm669_vm5 = vcmask 1045504   ;;  %s210_s28 = scalar_lea.vmem %s1229_s4, %s862_s25 }
  0x12   : > { %v952_v18 = vld [vmem:[%s949_s8] sm:$0xff]  ;;  %v213_v21 = vld [vmem:[%s949_s8 + $0x10] sm:$0xff]  ;;  %v958_v22 = vld [vmem:[%s949_s8 + $0x28] sm:$0xff]  ;;  %vm719_vm6 = vcmask 1040384  }
  0x13   : > { %v966_v27 = vld [vmem:[%s949_s8 + $0x18] sm:$0xff]  ;;  %v331_v33 = vld [vmem:[%s949_s8 + $0x10] sm:$0xfe]  ;;  %v986_v38 = vld [vmem:[%s949_s8] sm:$0xfe] }
  0x14   : > { %v337_v42 = vld [vmem:[%s949_s8 + $0x40] sm:$0x1]  ;;  %v1003_v50 = vld [vmem:[%s949_s8 + $0x30] sm:$0x1]  ;;  %v1007_v52 = vld [vmem:[%s949_s8 + $0x8] sm:$0xff] }
  0x15   : > { %v995_v46 = vld [vmem:[%s949_s8 + $0x40] sm:$0x3]  ;;  %v1016_v57 = vld [vmem:[%s949_s8 + $0x8] sm:$0xfe]  ;;  %v487_v1 = vld [vmem:[%s949_s8 + $0x10] sm:$0xfc] }
  0x16   : > { %234 = vrot.lane.b32.xlu0 %v231_v7, %s884_s23  ;;  %358 = vrot.lane.b32.xlu2 %v355_v8, %s884_s23  ;;  %v1027_v63 = vld [vmem:[%s949_s8 + $0x20] sm:$0xff]  ;;  %v1035_v2 = vld [vmem:[%s949_s8 + $0x38] sm:$0x1] }
  0x17   : > { %509 = vrot.lane.b32.xlu1 %v507_v9, %s884_s23 }
  0x1e   : > { %285 = vrot.lane.b32.xlu0 %v282_v11, %s885_s24  ;;  %423 = vrot.lane.b32.xlu2 %v421_v13, %s885_s24 }
  0x1f   : > { %578 = vrot.lane.b32.xlu1 %v575_v14, %s885_s24 }
  0x26   : > { %425 = vrot.lane.b32.xlu0 %v422_v15, %s885_s24  ;;  %511 = vrot.lane.b32.xlu2 %v508_v16, %s884_s23  ;;  %v1060_v16 = vld [vmem:[%s949_s8 + $0x38] sm:$0x3] }
  0x2e   : > { %576 = vrot.lane.b32.xlu0 %v574_v17, %s885_s24  ;;  %v1063_v17 = vld [vmem:[%s949_s8 + $0x8] sm:$0xfc]  ;;  %s1206_s24 = scalar_lea.vmem %s1228_s3, %s861_s21 }
  0x68   : > { %v960_v23 = vpop.permute.xlu2 %283 }
  0x69   : > { %v292_v28 = vmul.f32 %v960_v23, %v952_v18  ;;  %v295_v36 = vmul.f32 %v960_v23, %v966_v27 }
  0x70   : > { %v359_v32 = vpop.permute.xlu2 %358 }
  0x71   : > { %v366_v34 = vmul.f32 %v359_v32, %v331_v33  ;;  %v369_v44 = vmul.f32 %v359_v32, %v958_v22  ;;  %v372_v49 = vmul.f32 %v359_v32, %v337_v42 }
  0x78   : > { %v424_v37 = vpop.permute.xlu2 %423 }
  0x79   : > { %v431_v58 = vmul.f32 %v424_v37, %v986_v38  ;;  %v434_v61 = vmul.f32 %v424_v37, %v966_v27  ;;  %v437_v4 = vmul.f32 %v424_v37, %v1003_v50 }
  0x80   : > { %v233_v19 = vpop.permute.xlu0 %232  ;;  %v512_v45 = vpop.permute.xlu2 %511 }
  0x81   : > { %v241_v20 = vmul.f32 %v233_v19, %v952_v18  ;;  %v244_v30 = vmul.f32 %v233_v19, %v966_v27  ;;  %v357_v40 = vpop.permute.xlu1 %356  ;;  %v525_v47 = vmul.f32 %v512_v45, %v995_v46  ;;  %v522_v62 = vmul.f32 %v512_v45, %v958_v22 }
  0x82   : > { %v364_v41 = vmul.f32 %v357_v40, %v986_v38  ;;  %v367_v48 = vmul.f32 %v357_v40, %v966_v27  ;;  %v370_v53 = vmul.f32 %v357_v40, %v1003_v50  ;;  %v360_v56 = vsel %vm236_vm0, %v357_v40, %v359_v32 }
  0x83   : > { %253 = vrot.lane.b32.xlu1 %v241_v20, %s886_s9  ;;  %v365_v60 = vmul.f32 %v360_v56, %v1016_v57  ;;  %v368_v0 = vmul.f32 %v360_v56, %v1027_v63  ;;  %v519_v3 = vmul.f32 %v512_v45, %v487_v1  ;;  %v371_v5 = vmul.f32 %v360_v56, %v1035_v2 }
  0x88   : > { %v235_v24 = vpop.permute.xlu0 %234 }
  0x89   : > { %v243_v25 = vmul.f32 %v235_v24, %v213_v21  ;;  %v246_v26 = vmul.f32 %v235_v24, %v958_v22  ;;  %v237_v51 = vsel %vm236_vm0, %v233_v19, %v235_v24  ;;  %v510_v14 = vpop.permute.xlu1 %509  ;;  %v1072_v24 = vld [vmem:[%s949_s8] sm:$0xfc] }
  0x8a   : > { %v242_v55 = vmul.f32 %v237_v51, %v1007_v52  ;;  %v245_v8 = vmul.f32 %v1027_v63, %v237_v51  ;;  %v513_v15 = vsel %vm236_vm0, %v510_v14, %v512_v45 }
  0x8b   : > { %257 = vrot.lane.b32.xlu2 %v243_v25, %s886_s9  ;;  %263 = vrot.lane.b32.xlu1 %v246_v26, %s886_s9  ;;  %v524_v19 = vmul.f32 %v513_v15, %v1060_v16  ;;  %v518_v20 = vmul.f32 %v513_v15, %v1063_v17  ;;  %v1075_v25 = vld [vmem:[%s949_s8 + $0x30] sm:$0x3]  ;;  %v517_v26 = vmul.f32 %v510_v14, %v1072_v24 }
  0x90   : > { %v970_v29 = vpop.permute.xlu0 %285 }
  0x91   : > { %v294_v31 = vmul.f32 %v970_v29, %v213_v21  ;;  %v297_v35 = vmul.f32 %v970_v29, %v958_v22  ;;  %v288_v6 = vsel %vm287_vm1, %v960_v23, %v970_v29  ;;  %v521_v21 = vmul.f32 %v513_v15, %v1027_v63 }
  0x92   : > { %v293_v9 = vmul.f32 %v288_v6, %v1007_v52  ;;  %v296_v12 = vmul.f32 %v1027_v63, %v288_v6  ;;  %v520_v29 = vmul.f32 %v510_v14, %v966_v27 }
  0x93   : > { %308 = vrot.lane.b32.xlu0 %v294_v31, %s887_s10  ;;  %259 = vrot.lane.b32.xlu2 %v244_v30, %s886_s9  ;;  %v579_v30 = vpop.permute.xlu1 %578 }
  0x94   : > { %304 = vrot.lane.b32.xlu1 %v292_v28, %s887_s10  ;;  %v523_v28 = vmul.f32 %v510_v14, %v1075_v25  ;;  %v589_v40 = vmul.f32 %v579_v30, %v958_v22 }
  0x98   : > { %v426_v39 = vpop.permute.xlu0 %425 }
  0x99   : > { %v439_v43 = vmul.f32 %v426_v39, %v337_v42  ;;  %v433_v54 = vmul.f32 %v426_v39, %v331_v33  ;;  %v436_v59 = vmul.f32 %v426_v39, %v958_v22  ;;  %v427_v7 = vsel %vm287_vm1, %v424_v37, %v426_v39 }
  0x9a   : > { %v432_v10 = vmul.f32 %v427_v7, %v1016_v57  ;;  %v438_v11 = vmul.f32 %v427_v7, %v1035_v2  ;;  %v435_v13 = vmul.f32 %v427_v7, %v1027_v63 }
  0x9b   : > { %314 = vrot.lane.b32.xlu0 %v297_v35, %s887_s10  ;;  %386 = vrot.lane.b32.xlu2 %v366_v34, %s886_s9 }
  0x9c   : > { %310 = vrot.lane.b32.xlu1 %v295_v36, %s887_s10  ;;  %v586_v36 = vmul.f32 %v579_v30, %v487_v1 }
  0xa0   : > { %v577_v31 = vpop.permute.xlu0 %576 }
  0xa1   : > { %v580_v33 = vsel %vm287_vm1, %v577_v31, %v579_v30  ;;  %v584_v45 = vmul.f32 %v577_v31, %v1072_v24 }
  0xa2   : > { %v585_v34 = vmul.f32 %v580_v33, %v1063_v17  ;;  %v588_v35 = vmul.f32 %v580_v33, %v1027_v63  ;;  %v591_v42 = vmul.f32 %v580_v33, %v1060_v16 }
  0xa3   : > { %382 = vrot.lane.b32.xlu0 %v364_v41, %s886_s9  ;;  %392 = vrot.lane.b32.xlu2 %v369_v44, %s886_s9  ;;  %v592_v41 = vmul.f32 %v579_v30, %v995_v46 }
  0xa4   : > { %465 = vrot.lane.b32.xlu1 %v439_v43, %s887_s10 }
  0xab   : > { %388 = vrot.lane.b32.xlu0 %v367_v48, %s886_s9  ;;  %398 = vrot.lane.b32.xlu2 %v372_v49, %s886_s9  ;;  %v587_v48 = vmul.f32 %v577_v31, %v966_v27 }
  0xac   : > { %551 = vrot.lane.b32.xlu1 %v525_v47, %s886_s9  ;;  %v590_v47 = vmul.f32 %v577_v31, %v1075_v25 }
  0xb3   : > { %394 = vrot.lane.b32.xlu0 %v370_v53, %s886_s9  ;;  %453 = vrot.lane.b32.xlu2 %v433_v54, %s887_s10 }
  0xb4   : > { %255 = vrot.lane.b32.xlu1 %v242_v55, %s886_s9 }
  0xbb   : > { %449 = vrot.lane.b32.xlu0 %v431_v58, %s887_s10  ;;  %459 = vrot.lane.b32.xlu2 %v436_v59, %s887_s10 }
  0xbc   : > { %384 = vrot.lane.b32.xlu1 %v365_v60, %s886_s9 }
  0xc3   : > { %455 = vrot.lane.b32.xlu0 %v434_v61, %s887_s10  ;;  %545 = vrot.lane.b32.xlu2 %v522_v62, %s886_s9  ;;  %v217_v62 = vld [vmem:[%s1226_s1] ss:$8 sm:$0x3] }
  0xc4   : > { %390 = vrot.lane.b32.xlu1 %v368_v0, %s886_s9 }
  0xcb   : > { %539 = vrot.lane.b32.xlu0 %v519_v3, %s886_s9  ;;  %461 = vrot.lane.b32.xlu2 %v437_v4, %s887_s10  ;;  %v219_v3 = vperm.slane %v217_v62, 0  ;;  %v220_v4 = vperm.slane %v217_v62, 1 }
  0xcc   : > { %396 = vrot.lane.b32.xlu1 %v371_v5, %s886_s9 }
  0xd3   : > { %261 = vrot.lane.b32.xlu0 %v245_v8, %s886_s9  ;;  %306 = vrot.lane.b32.xlu2 %v293_v9, %s887_s10  ;;  %v224_v8 = vmul.f32 %v220_v4, %v1007_v52  ;;  %v223_v9 = vmul.f32 %v219_v3, %v952_v18  ;;  %v852_v18 = vld [vmem:[%s1226_s1 + $0x3] ss:$8 sm:$0x3] }
  0xd4   : > { %451 = vrot.lane.b32.xlu1 %v432_v10, %s887_s10  ;;  %v342_v30 = vperm.slane %v852_v18, 1 }
  0xdb   : > { %463 = vrot.lane.b32.xlu0 %v438_v11, %s887_s10  ;;  %312 = vrot.lane.b32.xlu2 %v296_v12, %s887_s10 }
  0xdc   : > { %457 = vrot.lane.b32.xlu1 %v435_v13, %s887_s10 }
  0xe3   : > { %549 = vrot.lane.b32.xlu0 %v524_v19, %s886_s9  ;;  %537 = vrot.lane.b32.xlu2 %v518_v20, %s886_s9 }
  0xe4   : > { %543 = vrot.lane.b32.xlu1 %v521_v21, %s886_s9 }
  0xe5   : > { %v258_v23 = vpop.permute.xlu2 %257 }
  0xeb   : > { %535 = vrot.lane.b32.xlu0 %v517_v26, %s886_s9  ;;  %547 = vrot.lane.b32.xlu2 %v523_v28, %s886_s9 }
  0xec   : > { %541 = vrot.lane.b32.xlu1 %v520_v29, %s886_s9  ;;  %v341_v29 = vperm.slane %v852_v18, 0 }
  0xed   : > { %v1083_v32 = vpop.permute.xlu2 %259 }
  0xf3   : > { %604 = vrot.lane.b32.xlu0 %v585_v34, %s887_s10  ;;  %610 = vrot.lane.b32.xlu2 %v588_v35, %s887_s10  ;;  %v345_v34 = vmul.f32 %v341_v29, %v986_v38  ;;  %v346_v35 = vmul.f32 %v342_v30, %v1016_v57  ;;  %v347_v38 = vmul.f32 %v341_v29, %v966_v27 }
  0xf4   : > { %606 = vrot.lane.b32.xlu1 %v586_v36, %s887_s10 }
  0xf5   : > { %v387_v37 = vpop.permute.xlu2 %386  ;;  %v254_v39 = vpop.permute.xlu1 %253 }
  0xfb   : > { %612 = vrot.lane.b32.xlu0 %v589_v40, %s887_s10  ;;  %618 = vrot.lane.b32.xlu2 %v592_v41, %s887_s10 }
  0xfc   : > { %616 = vrot.lane.b32.xlu1 %v591_v42, %s887_s10 }
  0xfd   : > { %v1097_v43 = vpop.permute.xlu2 %392  ;;  %v264_v44 = vpop.permute.xlu1 %263 }
 0x103   : > { %602 = vrot.lane.b32.xlu0 %v584_v45, %s887_s10  ;;  %614 = vrot.lane.b32.xlu2 %v590_v47, %s887_s10 }
 0x104   : > { %608 = vrot.lane.b32.xlu1 %v587_v48, %s887_s10 }
 0x105   : > { %v309_v22 = vpop.permute.xlu0 %308  ;;  %v1105_v46 = vpop.permute.xlu2 %398 }
 0x106   : > { %v305_v49 = vpop.permute.xlu1 %304 }
 0x10d   : > { %v315_v51 = vpop.permute.xlu0 %314  ;;  %v454_v53 = vpop.permute.xlu2 %453 }
 0x10e   : > { %v1107_v54 = vpop.permute.xlu1 %310 }
 0x115   : > { %v383_v55 = vpop.permute.xlu0 %382  ;;  %v1109_v56 = vpop.permute.xlu2 %459 }
 0x116   : > { %v1111_v58 = vpop.permute.xlu1 %465 }
 0x11d   : > { %v389_v59 = vpop.permute.xlu0 %388  ;;  %v1113_v60 = vpop.permute.xlu2 %545 }
 0x11e   : > { %v1115_v61 = vpop.permute.xlu1 %551 }
 0x125   : > { %v395_v0 = vpop.permute.xlu0 %394  ;;  %v462_v1 = vpop.permute.xlu2 %461 }
 0x126   : > { %v256_v5 = vpop.permute.xlu1 %255 }
 0x127   : > { %v266_v6 = vsel %vm265_vm2, %v254_v39, %v256_v5  ;;  %v267_v7 = vsel %vm265_vm2, %v256_v5, %v258_v23  ;;  %v226_v39 = vmul.f32 %v1027_v63, %v220_v4  ;;  %v349_v4 = vmul.f32 %v341_v29, %v1003_v50 }
 0x128   : > { %v274_v10 = vadd.f32 %v266_v6, %v223_v9  ;;  %v275_v11 = vadd.f32 %v267_v7, %v224_v8  ;;  %v350_v5 = vmul.f32 %v342_v30, %v1035_v2 }
 0x12d   : > { %v450_v12 = vpop.permute.xlu0 %449  ;;  %v307_v13 = vpop.permute.xlu2 %306 }
 0x12e   : > { %v317_v14 = vsel %vm316_vm3, %v305_v49, %v307_v13  ;;  %v318_v15 = vsel %vm316_vm3, %v307_v13, %v309_v22  ;;  %v385_v19 = vpop.permute.xlu1 %384 }
 0x12f   : > { %v1126_v20 = vadd.f32 %v317_v14, %v274_v10  ;;  %v1128_v21 = vadd.f32 %v318_v15, %v275_v11  ;;  %v400_v23 = vsel %vm265_vm2, %v383_v55, %v385_v19  ;;  %v401_v36 = vsel %vm265_vm2, %v385_v19, %v387_v37 }
 0x130   : > { %v412_v41 = vadd.f32 %v400_v23, %v345_v34  ;;  %v413_v42 = vadd.f32 %v401_v36, %v346_v35  ;;  %v348_v37 = vmul.f32 %v342_v30, %v1027_v63 }
 0x135   : > { %v456_v26 = vpop.permute.xlu0 %455  ;;  %v313_v33 = vpop.permute.xlu2 %312 }
 0x136   : > { %v391_v52 = vpop.permute.xlu1 %390  ;;  %v320_v55 = vsel %vm316_vm3, %v313_v33, %v315_v51 }
 0x137   : > { %v403_v9 = vsel %vm265_vm2, %v391_v52, %v1097_v43 }
 0x13d   : > { %v1134_v28 = vpop.permute.xlu0 %539  ;;  %v1149_v7 = vpop.permute.xlu2 %537 }
 0x13e   : > { %v397_v31 = vpop.permute.xlu1 %396 }
 0x13f   : > { %v404_v8 = vsel %vm265_vm2, %v395_v0, %v397_v31  ;;  %v405_v51 = vsel %vm265_vm2, %v397_v31, %v1105_v46 }
 0x140   : > { %v416_v2 = vadd.f32 %v404_v8, %v349_v4  ;;  %v417_v11 = vadd.f32 %v405_v51, %v350_v5 }
 0x145   : > { %v262_v40 = vpop.permute.xlu0 %261  ;;  %v548_v35 = vpop.permute.xlu2 %547 }
 0x146   : > { %v269_v45 = vsel %vm265_vm2, %v262_v40, %v264_v44  ;;  %v452_v47 = vpop.permute.xlu1 %451  ;;  %v402_v44 = vsel %vm265_vm2, %v389_v59, %v391_v52  ;;  %v268_v50 = vsel %vm265_vm2, %v1083_v32, %v262_v40  ;;  %v415_v59 = vadd.f32 %v403_v9, %v348_v37 }
 0x147   : > { %v277_v48 = vadd.f32 %v269_v45, %v226_v39  ;;  %v467_v22 = vsel %vm316_vm3, %v450_v12, %v452_v47  ;;  %v468_v49 = vsel %vm316_vm3, %v452_v47, %v454_v53  ;;  %v225_v53 = vmul.f32 %v219_v3, %v966_v27 }
 0x148   : > { %v479_v57 = vadd.f32 %v467_v22, %v412_v41  ;;  %v480_v62 = vadd.f32 %v468_v49, %v413_v42  ;;  %v414_v10 = vadd.f32 %v402_v44, %v347_v38  ;;  %v319_v52 = vsel %vm316_vm3, %v1107_v54, %v313_v33  ;;  %v855_v49 = vld [vmem:[%s1226_s1 + $0x6] ss:$8 sm:$0x3] }
 0x149   : > { %v328_v6 = vadd.f32 %v320_v55, %v277_v48  ;;  %v276_v13 = vadd.f32 %v268_v50, %v225_v53  ;;  %v495_v55 = vperm.slane %v855_v49, 1  ;;  %v494_v51 = vperm.slane %v855_v49, 0 }
 0x14a   : > { %v648_v30 = vrot.slane %v480_v62, 1 }
 0x14b   : > { %v327_v34 = vadd.f32 %v319_v52, %v276_v13  ;;  %v501_v37 = vmul.f32 %v495_v55, %v1027_v63  ;;  %v503_v4 = vmul.f32 %v495_v55, %v1060_v16  ;;  %v688_v16 = vld [vmem:[%s1227_s2] sm:$0x3] }
 0x14d   : > { %v464_v12 = vpop.permute.xlu0 %463  ;;  %v611_v48 = vpop.permute.xlu2 %610 }
 0x14e   : > { %v471_v14 = vsel %vm316_vm3, %v462_v1, %v464_v12  ;;  %v472_v0 = vsel %vm316_vm3, %v464_v12, %v1111_v58  ;;  %v458_v46 = vpop.permute.xlu1 %457  ;;  %v645_v1 = vrot.slane %v479_v57, 1  ;;  %v498_v12 = vmul.f32 %v494_v51, %v1072_v24 }
 0x14f   : > { %v483_v15 = vadd.f32 %v471_v14, %v416_v2  ;;  %v484_v3 = vadd.f32 %v472_v0, %v417_v11  ;;  %v469_v19 = vsel %vm316_vm3, %v456_v26, %v458_v46  ;;  %v470_v43 = vsel %vm316_vm3, %v458_v46, %v1109_v56 }
 0x150   : > { %v481_v32 = vadd.f32 %v469_v19, %v414_v10  ;;  %v482_v23 = vadd.f32 %v470_v43, %v415_v59  ;;  %v502_v2 = vmul.f32 %v494_v51, %v1075_v25  ;;  %v500_v46 = vmul.f32 %v494_v51, %v966_v27 }
 0x151   : > { %v651_v18 = vrot.slane %v483_v15, 1  ;;  %v653_v29 = vrot.slane %v484_v3, 1  ;;  %v691_v15 = vperm.slane %v688_v16, 1 }
 0x152   : > { %v646_v31 = vrot.slane %v481_v32, 1  ;;  %v649_v58 = vrot.slane %v482_v23, 1 }
 0x154   : > { %v647_v36 = vsel %vm644_vm4, %v645_v1, %v646_v31  ;;  %v650_v39 = vsel %vm644_vm4, %v648_v30, %v649_v58  ;;  %v652_v26 = vsel %vm644_vm4, %v646_v31, %v651_v18  ;;  %v654_v40 = vsel %vm644_vm4, %v649_v58, %v653_v29 }
 0x155   : > { %v1168_v56 = vadd.f32 %v647_v36, %v1126_v20  ;;  %v660_v41 = vadd.f32 %v650_v39, %v1128_v21  ;;  %v1171_v42 = vadd.f32 %v652_v26, %v327_v34  ;;  %v662_v54 = vadd.f32 %v654_v40, %v328_v6  ;;  %v550_v33 = vpop.permute.xlu0 %549  ;;  %v619_v62 = vpop.permute.xlu2 %618 }
 0x156   : > { %v544_v45 = vpop.permute.xlu1 %543  ;;  %v499_v20 = vmul.f32 %v495_v55, %v1063_v17  ;;  %v554_v21 = vsel %vm265_vm2, %v1149_v7, %v1134_v28  ;;  %v558_v8 = vsel %vm265_vm2, %v550_v33, %v1115_v61  ;;  %v557_v11 = vsel %vm265_vm2, %v548_v35, %v550_v33 }
 0x157   : > { %v556_v5 = vsel %vm265_vm2, %v544_v45, %v1113_v60  ;;  %v570_v50 = vadd.f32 %v558_v8, %v503_v4  ;;  %v569_v32 = vadd.f32 %v557_v11, %v502_v2 }
 0x158   : > { %v566_v44 = vadd.f32 %v554_v21, %v499_v20  ;;  %v568_v17 = vadd.f32 %v556_v5, %v501_v37 }
 0x15d   : > { %v536_v47 = vpop.permute.xlu0 %535  ;;  %v615_v0 = vpop.permute.xlu2 %614 }
 0x15e   : > { %v542_v22 = vpop.permute.xlu1 %541  ;;  %v553_v14 = vsel %vm265_vm2, %v536_v47, %v1149_v7 }
 0x15f   : > { %v555_v19 = vsel %vm265_vm2, %v542_v22, %v544_v45  ;;  %v565_v52 = vadd.f32 %v553_v14, %v498_v12  ;;  %v690_v22 = vperm.slane %v688_v16, 0 }
 0x160   : > { %v567_v18 = vadd.f32 %v555_v19, %v500_v46 }
 0x165   : > { %v605_v38 = vpop.permute.xlu0 %604 }
 0x166   : > { %v607_v57 = vpop.permute.xlu1 %606 }
 0x167   : > { %v621_v6 = vsel %vm316_vm3, %v605_v38, %v607_v57 }
 0x168   : > { %v633_v53 = vadd.f32 %v621_v6, %v566_v44 }
 0x16a   : > { %v673_v59 = vrot.slane %v633_v53, 2 }
 0x16d   : > { %v613_v9 = vpop.permute.xlu0 %612 }
 0x16e   : > { %v623_v28 = vsel %vm316_vm3, %v611_v48, %v613_v9  ;;  %v617_v63 = vpop.permute.xlu1 %616 }
 0x16f   : > { %v635_v60 = vadd.f32 %v623_v28, %v568_v17  ;;  %v625_v10 = vsel %vm316_vm3, %v617_v63, %v619_v62  ;;  %v624_v43 = vsel %vm316_vm3, %v615_v0, %v617_v63 }
 0x170   : > { %v637_v61 = vadd.f32 %v625_v10, %v570_v50  ;;  %v636_v1 = vadd.f32 %v624_v43, %v569_v32  ;;  %v722_v10 = vlaneseq }
 0x171   : > { %v674_v13 = vrot.slane %v635_v60, 2 }
 0x172   : > { %v678_v3 = vrot.slane %v637_v61, 2  ;;  %v676_v33 = vrot.slane %v636_v1, 2  ;;  %vm724_vm7 = vcmp.lt.s32.totalorder %v722_v10, 256 }
 0x173   : > { %v675_v25 = vsel %vm669_vm5, %v673_v59, %v674_v13 }
 0x174   : > { %v685_v23 = vadd.f32 %v675_v25, %v660_v41  ;;  %v679_v24 = vsel %vm669_vm5, %v674_v13, %v678_v3 }
 0x175   : > { %v687_v27 = vadd.f32 %v679_v24, %v662_v54  ;;  %v603_v7 = vpop.permute.xlu0 %602 }
 0x176   : > { %v695_v29 = vadd.f32 %v691_v15, %v685_v23  ;;  %v620_v30 = vsel %vm316_vm3, %v603_v7, %v605_v38  ;;  %v609_v31 = vpop.permute.xlu1 %608 }
 0x177   : > { %v697_v58 = vadd.f32 %v691_v15, %v687_v27  ;;  %v632_v34 = vadd.f32 %v620_v30, %v565_v52  ;;  %v622_v35 = vsel %vm316_vm3, %v609_v31, %v611_v48 }
 0x178   : > { %699 = vst [vmem:[%s1206_s24 + $0x8] sm:$0xff] %v695_v29  ;;  %v728_v36 = vmul.f32 %v695_v29, %v695_v29  ;;  %v634_v39 = vadd.f32 %v622_v35, %v567_v18 }
 0x179   : > { %701 = vst [vmem:[%s1206_s24 + $0x18] sm:$0xff] %v697_v58  ;;  %v709_v26 = vadd.f32 %v697_v58, %v695_v29  ;;  %v730_v40 = vmul.f32 %v697_v58, %v697_v58  ;;  %v670_v41 = vrot.slane %v632_v34, 2 }
 0x17a   : > { %v671_v54 = vrot.slane %v634_v39, 2 }
 0x17b   : > { %v710_v45 = vrot.slane %v709_v26, 4  ;;  %v738_v47 = vadd.f32 %v730_v40, %v728_v36 }
 0x17c   : > { %v672_v49 = vsel %vm669_vm5, %v670_v41, %v671_v54  ;;  %v677_v55 = vsel %vm669_vm5, %v671_v54, %v676_v33 }
 0x17d   : > { %v711_v38 = vadd.f32 %v710_v45, %v709_v26  ;;  %v739_v48 = vrot.slane %v738_v47, 4  ;;  %v684_v57 = vadd.f32 %v672_v49, %v1168_v56  ;;  %v686_v20 = vadd.f32 %v677_v55, %v1171_v42 }
 0x17f   : > { %v712_v21 = vrot.slane %v711_v38, 2  ;;  %v740_v62 = vadd.f32 %v739_v48, %v738_v47  ;;  %v694_v37 = vadd.f32 %v690_v22, %v684_v57  ;;  %v696_v4 = vadd.f32 %v690_v22, %v686_v20 }
 0x181   : > { %v713_v5 = vadd.f32 %v712_v21, %v711_v38  ;;  %v741_v6 = vrot.slane %v740_v62, 2  ;;  %698 = vst [vmem:[%s1206_s24] sm:$0xff] %v694_v37  ;;  %v702_v44 = vadd.f32 %v696_v4, %v694_v37  ;;  %v727_v8 = vmul.f32 %v694_v37, %v694_v37 }
 0x182   : > { %700 = vst [vmem:[%s1206_s24 + $0x10] sm:$0xff] %v696_v4  ;;  %v729_v51 = vmul.f32 %v696_v4, %v696_v4 }
 0x183   : > { %v703_v17 = vrot.slane %v702_v44, 4  ;;  %v742_v53 = vadd.f32 %v741_v6, %v740_v62  ;;  %v714_v50 = vrot.slane %v713_v5, 1 }
 0x184   : > { %v731_v9 = vadd.f32 %v729_v51, %v727_v8 }
 0x185   : > { %v704_v28 = vadd.f32 %v703_v17, %v702_v44  ;;  %v743_v42 = vrot.slane %v742_v53, 1  ;;  %v715_v60 = vadd.f32 %v714_v50, %v713_v5 }
 0x186   : > { %v732_v56 = vrot.slane %v731_v9, 4 }
 0x187   : > { %v705_v63 = vrot.slane %v704_v28, 2  ;;  %v744_v12 = vadd.f32 %v743_v42, %v742_v53  ;;  %v718_v13 = vrot.slane %v715_v60, 7 }
 0x188   : > { %v733_v16 = vadd.f32 %v732_v56, %v731_v9 }
 0x189   : > { %v706_v2 = vadd.f32 %v705_v63, %v704_v28  ;;  %v747_v15 = vrot.slane %v744_v12, 7 }
 0x18a   : > { %v734_v61 = vrot.slane %v733_v16, 2 }
 0x18b   : > { %v707_v11 = vrot.slane %v706_v2, 1 }
 0x18c   : > { %v735_v59 = vadd.f32 %v734_v61, %v733_v16 }
 0x18d   : > { %v708_v14 = vadd.f32 %v707_v11, %v706_v2 }
 0x18e   : > { %v736_v0 = vrot.slane %v735_v59, 1 }
 0x18f   : > { %v720_v46 = vsel %vm719_vm6, %v708_v14, %v718_v13 }
 0x190   : > { %726 = vst.msk [vmem:[%s210_s28] ss:$2 sm:$0x3] %vm724_vm7, %v720_v46  ;;  %v737_v3 = vadd.f32 %v736_v0, %v735_v59 }
 0x192   : > { %v748_v19 = vsel %vm719_vm6, %v737_v3, %v747_v15 }
 0x193   : > { %858 = vst.msk [vmem:[%s210_s28 + $0x1] ss:$2 sm:$0x3] %vm724_vm7, %v748_v19 }
 0x194 PF: > { %s15_s15 = sadd.s32 1, %s882_s15  }
 0x195   : > { %p12_p4 = scmp.ge.s32.totalorder %s15_s15, 4  }
 0x197   :  { %14 = sbr.rel (!%p12_p4) target bundleno = 1 (0x1), region = 83 }

// kernel: mbconv1_pallas.5
= control target key start
LH: loop header
LB: loop body
LE: loop exit
PB: predicated region body
PF: predicated region fallthrough
CT: control target
= control target key end

     0   :  { %s727_s27 = smov 0   ;;  %s917_s0 = inlined_call_operand.vmem [shape: f32[2,16,256], index: 0, kind: input, shape index: {}]   ;;  %s918_s1 = inlined_call_operand.vmem [shape: f32[1,256], index: 1, kind: input, shape index: {}]   ;;  %s919_s2 = inlined_call_operand.vmem [shape: f32[1,256], index: 2, kind: input, shape index: {}]   ;;  %s920_s3 = inlined_call_operand.vmem [shape: f32[256,16], index: 3, kind: input, shape index: {}]   ;;  %s921_s4 = inlined_call_operand.vmem [shape: f32[16,4], index: 4, kind: input, shape index: {}]   ;;  %s922_s5 = inlined_call_operand.vmem [shape: f32[1,4], index: 5, kind: input, shape index: {}]   ;;  %s923_s6 = inlined_call_operand.vmem [shape: f32[4,16], index: 6, kind: input, shape index: {}]   ;;  %s924_s7 = inlined_call_operand.vmem [shape: f32[1,16], index: 7, kind: input, shape index: {}]   ;;  %s925_s8 = inlined_call_operand.vmem [shape: f32[2,8,16], index: 8, kind: output, shape index: {}]  }
   0x1 LB: > { %s627_s28 = sadd.s32 4294967295, %s680_s27   ;;  %p631_p0 = scmp.ge.s32.totalorder %s680_s27, 1  ;;  %s680_s27 = sphi %s727_s27, %s18_s27  }
   0x2   : > { %p262_p1 = scmp.lt.s32.totalorder %s680_s27, 3 }
   0x4   : > { %p263_p2 = pnand %p631_p0, %p262_p1 }
   0x5   : > { %p295_p3 = scmp.lt.s32.totalorder (!%p263_p2), %s627_s28, 1 }
   0x6   : > { %266 = sbr.rel (%p263_p2) target bundleno = 503 (0x1f7), region = 52 }
   0xb   : > { %v437_v0 = vld [vmem:[%s920_s3 + $0x78] sm:$0xff]  ;;  %v436_v2 = vld [vmem:[%s920_s3 + $0x70] sm:$0xff]  ;;  %v435_v4 = vld [vmem:[%s920_s3 + $0x68] sm:$0xff]  ;;  %s937_s28 = smov (!%p295_p3, %s627_s28), 1 }
   0xc   : > { %v453_v1 = vld [vmem:[%s920_s3 + $0xf8] sm:$0xff]  ;;  %454 = vmatpush.msra.mxu0 %v437_v0  ;;  %v452_v3 = vld [vmem:[%s920_s3 + $0xf0] sm:$0xff]  ;;  %v451_v5 = vld [vmem:[%s920_s3 + $0xe8] sm:$0xff]  ;;  %s645_s23 = sshll.u32 %s937_s28, 5  ;;  %s634_s9 = sshll.u32 %s937_s28, 3 }
   0xd   : > { %474 = vmatpush.msra.mxu1 %v453_v1  ;;  %v434_v6 = vld [vmem:[%s920_s3 + $0x60] sm:$0xff]  ;;  %v433_v8 = vld [vmem:[%s920_s3 + $0x58] sm:$0xff]  ;;  %s299_s10 = scalar_lea.vmem %s917_s0, %s645_s23  ;;  %v432_v10 = vld [vmem:[%s920_s3 + $0x50] sm:$0xff] }
   0xe   : > { %455 = vmatpush.msra.mxu0 %v436_v2  ;;  %v450_v7 = vld [vmem:[%s920_s3 + $0xe0] sm:$0xff]  ;;  %v449_v9 = vld [vmem:[%s920_s3 + $0xd8] sm:$0xff]  ;;  %v448_v11 = vld [vmem:[%s920_s3 + $0xd0] sm:$0xff] }
   0xf   : > { %475 = vmatpush.msra.mxu1 %v452_v3  ;;  %v431_v12 = vld [vmem:[%s920_s3 + $0x48] sm:$0xff]  ;;  %v430_v14 = vld [vmem:[%s920_s3 + $0x40] sm:$0xff]  ;;  %v306_v17 = vld [vmem:[%s299_s10 + $0x10] sm:$0xff] }
  0x10   : > { %456 = vmatpush.msra.mxu0 %v435_v4  ;;  %v447_v13 = vld [vmem:[%s920_s3 + $0xc8] sm:$0xff]  ;;  %v446_v15 = vld [vmem:[%s920_s3 + $0xc0] sm:$0xff]  ;;  %v307_v23 = vld [vmem:[%s299_s10 + $0x18] sm:$0xff] }
  0x11   : > { %476 = vmatpush.msra.mxu1 %v451_v5  ;;  %v304_v16 = vld [vmem:[%s299_s10] sm:$0xff]  ;;  %v305_v22 = vld [vmem:[%s299_s10 + $0x8] sm:$0xff]  ;;  %v429_v26 = vld [vmem:[%s920_s3 + $0x38] sm:$0xff]  ;;  %s303_s10 = scalar_lea.vmem %s925_s8, %s634_s9 }
  0x12   : > { %457 = vmatpush.msra.mxu0 %v434_v6  ;;  %v308_v18 = vld [vmem:[%s918_s1] sm:$0x3]  ;;  %v445_v27 = vld [vmem:[%s920_s3 + $0xb8] sm:$0xff]  ;;  %v428_v32 = vld [vmem:[%s920_s3 + $0x30] sm:$0xff] }
  0x13   : > { %477 = vmatpush.msra.mxu1 %v450_v7  ;;  %v318_v19 = vld [vmem:[%s919_s2] sm:$0x3]  ;;  %v310_v20 = vperm.slane %v308_v18, 0  ;;  %v311_v24 = vperm.slane %v308_v18, 1  ;;  %v444_v33 = vld [vmem:[%s920_s3 + $0xb0] sm:$0xff]  ;;  %v427_v38 = vld [vmem:[%s920_s3 + $0x28] sm:$0xff] }
  0x14   : > { %458 = vmatpush.msra.mxu0 %v433_v8  ;;  %v320_v21 = vperm.slane %v318_v19, 0  ;;  %v321_v25 = vperm.slane %v318_v19, 1  ;;  %v443_v39 = vld [vmem:[%s920_s3 + $0xa8] sm:$0xff]  ;;  %v426_v44 = vld [vmem:[%s920_s3 + $0x20] sm:$0xff]  ;;  %v425_v46 = vld [vmem:[%s920_s3 + $0x18] sm:$0xff] }
  0x15   : > { %478 = vmatpush.msra.mxu1 %v449_v9  ;;  %v314_v28 = vmul.f32 %v310_v20, %v304_v16  ;;  %v316_v29 = vmul.f32 %v310_v20, %v306_v17  ;;  %v315_v30 = vmul.f32 %v311_v24, %v305_v22  ;;  %v317_v31 = vmul.f32 %v311_v24, %v307_v23  ;;  %v442_v45 = vld [vmem:[%s920_s3 + $0xa0] sm:$0xff]  ;;  %v441_v47 = vld [vmem:[%s920_s3 + $0x98] sm:$0xff]  ;;  %v424_v48 = vld [vmem:[%s920_s3 + $0x10] sm:$0xff] }
  0x16   : > { %459 = vmatpush.msra.mxu0 %v432_v10  ;;  %v440_v49 = vld [vmem:[%s920_s3 + $0x90] sm:$0xff]  ;;  %v423_v51 = vld [vmem:[%s920_s3 + $0x8] sm:$0xff]  ;;  %v422_v56 = vld [vmem:[%s920_s3] sm:$0xff] }
  0x17   : > { %479 = vmatpush.msra.mxu1 %v448_v11  ;;  %v807_v34 = vadd.f32 %v320_v21, %v314_v28  ;;  %v809_v35 = vadd.f32 %v320_v21, %v316_v29  ;;  %v811_v36 = vadd.f32 %v321_v25, %v315_v30  ;;  %v813_v37 = vadd.f32 %v321_v25, %v317_v31  ;;  %v439_v52 = vld [vmem:[%s920_s3 + $0x88] sm:$0xff]  ;;  %v438_v57 = vld [vmem:[%s920_s3 + $0x80] sm:$0xff] }
  0x18   : > { %460 = vmatpush.msra.mxu0 %v431_v12 }
  0x19   : > { %480 = vmatpush.msra.mxu1 %v447_v13  ;;  %v635_v40 = vmul.f32 -1.442695, %v807_v34  ;;  %v637_v41 = vmul.f32 -1.442695, %v809_v35  ;;  %v636_v42 = vmul.f32 -1.442695, %v811_v36 }
  0x1a   : > { %461 = vmatpush.msra.mxu0 %v430_v14  ;;  %v638_v43 = vmul.f32 -1.442695, %v813_v37 }
  0x1b   : > { %481 = vmatpush.msra.mxu1 %v446_v15  ;;  %654 = vpow2.f32 %v635_v40 }
  0x1c   : > { %462 = vmatpush.msra.mxu0 %v429_v26  ;;  %656 = vpow2.f32 %v637_v41 }
  0x1d   : > { %482 = vmatpush.msra.mxu1 %v445_v27  ;;  %658 = vpow2.f32 %v636_v42 }
  0x1e   : > { %463 = vmatpush.msra.mxu0 %v428_v32  ;;  %660 = vpow2.f32 %v638_v43 }
  0x1f   : > { %483 = vmatpush.msra.mxu1 %v444_v33 }
  0x20   : > { %464 = vmatpush.msra.mxu0 %v427_v38 }
  0x21   : > { %484 = vmatpush.msra.mxu1 %v443_v39  ;;  %v655_v50 = vpop.eup %654 }
  0x22   : > { %465 = vmatpush.msra.mxu0 %v426_v44  ;;  %v657_v53 = vpop.eup %656  ;;  %v340_v54 = vadd.f32 1.0, %v655_v50 }
  0x23   : > { %485 = vmatpush.msra.mxu1 %v442_v45  ;;  %v659_v55 = vpop.eup %658  ;;  %v342_v58 = vadd.f32 1.0, %v657_v53 }
  0x24   : > { %466 = vmatpush.msra.mxu0 %v425_v46  ;;  %v661_v59 = vpop.eup %660  ;;  %662 = vrcp.f32 %v340_v54  ;;  %v341_v60 = vadd.f32 1.0, %v659_v55  ;;  %v353_v62 = vand.u32 2147483647, %v340_v54  ;;  %v355_v63 = vand.u32 2147483648, %v340_v54 }
  0x25   : > { %486 = vmatpush.msra.mxu1 %v441_v47  ;;  %664 = vrcp.f32 %v342_v58  ;;  %v343_v61 = vadd.f32 1.0, %v661_v59  ;;  %v383_v1 = vand.u32 2147483647, %v342_v58  ;;  %v385_v2 = vand.u32 2147483648, %v342_v58 }
  0x26   : > { %467 = vmatpush.msra.mxu0 %v424_v48  ;;  %666 = vrcp.f32 %v341_v60  ;;  %vm349_vm0 = vweird.f32 %v340_v54  ;;  %vm379_vm1 = vweird.f32 %v342_v58  ;;  %vm855_vm3 = vcmp.eq.f32.partialorder %v353_v62, 8.507059e+37 }
  0x27   : > { %487 = vmatpush.msra.mxu1 %v440_v49  ;;  %668 = vrcp.f32 %v343_v61  ;;  %v356_v8 = vor.u32 1.1754944e-38, %v355_v63  ;;  %vm859_vm5 = vcmp.eq.f32.partialorder %v383_v1, 8.507059e+37  ;;  %v386_v12 = vor.u32 1.1754944e-38, %v385_v2 }
  0x28   : > { %468 = vmatpush.msra.mxu0 %v423_v51  ;;  %vm364_vm6 = vweird.f32 %v341_v60  ;;  %v368_v16 = vand.u32 2147483647, %v341_v60  ;;  %v370_v19 = vand.u32 2147483648, %v341_v60  ;;  %vm394_vm8 = vweird.f32 %v343_v61 }
  0x29   : > { %488 = vmatpush.msra.mxu1 %v439_v52  ;;  %v400_v24 = vand.u32 2147483648, %v343_v61  ;;  %v398_v27 = vand.u32 2147483647, %v343_v61 }
  0x2a   : > { %469 = vmatpush.msra.mxu0 %v422_v56  ;;  %v663_v0 = vpop.eup %662  ;;  %vm875_vm12 = vcmp.eq.f32.partialorder %v368_v16, 8.507059e+37  ;;  %v371_v33 = vor.u32 1.1754944e-38, %v370_v19 }
  0x2b   : > { %489 = vmatpush.msra.mxu1 %v438_v57  ;;  %v665_v3 = vpop.eup %664  ;;  %v345_v4 = vmul.f32 %v663_v0, %v340_v54  ;;  %vm350_vm2 = vweird.f32 %v663_v0  ;;  %v401_v42 = vor.u32 1.1754944e-38, %v400_v24  ;;  %vm399_vm15 = vcmp.eq.f32.partialorder %v398_v27, 8.507059e+37 }
  0x2c   : > { %v375_v5 = vmul.f32 %v665_v3, %v342_v58  ;;  %v667_v9 = vpop.eup %666  ;;  %vm380_vm4 = vweird.f32 %v665_v3  ;;  %vm864_vm7 = vmor %vm349_vm0, %vm350_vm2  ;;  %vm498_vm0 = vcmask 130048   ;;  %vm525_vm2 = vcmask 31744  }
  0x2d   : > { %v346_v6 = vsub.f32 1.0, %v345_v4  ;;  %v669_v13 = vpop.eup %668  ;;  %v360_v15 = vmul.f32 %v667_v9, %v341_v60  ;;  %vm869_vm9 = vmor %vm379_vm1, %vm380_vm4  ;;  %vm365_vm10 = vweird.f32 %v667_v9  ;;  %vm529_vm1 = vcmask 1043456   ;;  %v497_v4 = vld [vmem:[%s922_s5] sm:$0x1] }
  0x2e   : > { %v376_v10 = vsub.f32 1.0, %v375_v5  ;;  %v390_v20 = vmul.f32 %v669_v13, %v343_v61  ;;  %vm395_vm11 = vweird.f32 %v669_v13  ;;  %vm366_vm13 = vmor %vm364_vm6, %vm365_vm10 }
  0x2f   : > { %v347_v14 = vmul.f32 %v663_v0, %v346_v6  ;;  %v361_v23 = vsub.f32 1.0, %v360_v15  ;;  %vm396_vm14 = vmor %vm394_vm8, %vm395_vm11 }
  0x30   : > { %v377_v18 = vmul.f32 %v665_v3, %v376_v10  ;;  %v391_v26 = vsub.f32 1.0, %v390_v20 }
  0x31   : > { %v348_v21 = vadd.f32 %v663_v0, %v347_v14  ;;  %v362_v29 = vmul.f32 %v667_v9, %v361_v23 }
  0x32   : > { %v378_v25 = vadd.f32 %v665_v3, %v377_v18  ;;  %v392_v38 = vmul.f32 %v669_v13, %v391_v26 }
  0x33   : > { %v352_v28 = vsel %vm864_vm7, %v663_v0, %v348_v21  ;;  %v363_v41 = vadd.f32 %v667_v9, %v362_v29 }
  0x34   : > { %v357_v31 = vsel %vm855_vm3, %v356_v8, %v352_v28  ;;  %v382_v32 = vsel %vm869_vm9, %v665_v3, %v378_v25  ;;  %v393_v44 = vadd.f32 %v669_v13, %v392_v38  ;;  %v523_v3 = vld [vmem:[%s923_s6] sm:$0xf] }
  0x35   : > { %v387_v39 = vsel %vm859_vm5, %v386_v12, %v382_v32  ;;  %v404_v40 = vmul.f32 %v357_v31, %v807_v34  ;;  %v367_v45 = vsel %vm366_vm13, %v667_v9, %v363_v41  ;;  %640 = vmatpush.msk.msra.mxu3 %vm529_vm1, %v523_v3  ;;  %v524_v8 = vld [vmem:[%s924_s7] sm:$0x1] }
  0x36   : > { %v406_v43 = vmul.f32 %v387_v39, %v809_v35  ;;  %v372_v47 = vsel %vm875_vm12, %v371_v33, %v367_v45  ;;  %v397_v48 = vsel %vm396_vm14, %v669_v13, %v393_v44 }
  0x37   : > { %v402_v49 = vsel %vm399_vm15, %v401_v42, %v397_v48  ;;  %v405_v50 = vmul.f32 %v372_v47, %v811_v36  ;;  %v496_v36 = vld [vmem:[%s921_s4 + $0x8] sm:$0xff] }
  0x38   : > { %v408_v46 = vadd.f32 %v406_v43, %v404_v40  ;;  %v407_v34 = vmul.f32 %v402_v49, %v813_v37  ;;  %516 = vmatpush.msra.mxu2 %v496_v36  ;;  %v495_v37 = vld [vmem:[%s921_s4] sm:$0xff] }
  0x3a   : > { %v409_v51 = vrot.slane %v408_v46, 4  ;;  %v415_v53 = vadd.f32 %v407_v34, %v405_v50  ;;  %517 = vmatpush.msra.mxu2 %v495_v37 }
  0x3c   : > { %v410_v52 = vadd.f32 %v409_v51, %v408_v46  ;;  %v416_v55 = vrot.slane %v415_v53, 4 }
  0x3e   : > { %v411_v54 = vrot.slane %v410_v52, 2  ;;  %v417_v35 = vadd.f32 %v416_v55, %v415_v53 }
  0x40   : > { %v412_v56 = vadd.f32 %v411_v54, %v410_v52  ;;  %v418_v58 = vrot.slane %v417_v35, 2 }
  0x42   : > { %v413_v57 = vrot.slane %v412_v56, 1  ;;  %v419_v60 = vadd.f32 %v418_v58, %v417_v35 }
  0x44   : > { %v414_v59 = vadd.f32 %v413_v57, %v412_v56  ;;  %v420_v61 = vrot.slane %v419_v60, 1 }
  0x46   : > { %470 = vmatmul.f32.vlgmr.msra.gmra.mxu0 %v414_v59  ;;  %v421_v62 = vadd.f32 %v420_v61, %v419_v60 }
  0x48   : > { %490 = vmatmul.f32.vlgmr.msra.gmra.mxu1 %v421_v62 }
  0xc3   : > { %v471_v63 = vpop.f32.mrf.mxu0 }
  0xc5   : > { %v491_v0 = vpop.f32.mrf.mxu1 }
  0xc6   : > { %v492_v1 = vadd.f32 %v491_v0, %v471_v63 }
  0xc8   : > { %v494_v2 = vmul.f32 0.00390625, %v492_v1 }
  0xca   : > { %639 = vmatmul.msk.f32.vlgmr.msra.gmra.mxu2 %vm498_vm0, %v494_v2 }
 0x14d   : > { %v519_v5 = vpop.f32.mrf.mxu2 }
 0x14e   : > { %v520_v6 = vadd.f32 %v519_v5, %v497_v4 }
 0x150   : > { %v522_v7 = vmax.f32 %v520_v6, 0.0 }
 0x152   : > { %641 = vmatmul.msk.f32.vlgmr.msra.gmra.mxu3 %vm525_vm2, %v522_v7 }
 0x1d5   : > { %v550_v9 = vpop.f32.mrf.mxu3 }
 0x1d6   : > { %v551_v10 = vadd.f32 %v550_v9, %v524_v8 }
 0x1d8   : > { %v642_v11 = vmul.f32 -1.442695, %v551_v10 }
 0x1da   : > { %670 = vpow2.f32 %v642_v11 }
 0x1e0   : > { %v671_v12 = vpop.eup %670 }
 0x1e1   : > { %v556_v13 = vadd.f32 1.0, %v671_v12 }
 0x1e3   : > { %672 = vrcp.f32 %v556_v13  ;;  %v568_v17 = vand.u32 2147483648, %v556_v13  ;;  %v566_v19 = vand.u32 2147483647, %v556_v13  ;;  %vm562_vm4 = vweird.f32 %v556_v13 }
 0x1e5   : > { %v569_v21 = vor.u32 1.1754944e-38, %v568_v17  ;;  %vm567_vm6 = vcmp.eq.f32.partialorder %v566_v19, 8.507059e+37 }
 0x1e9   : > { %v673_v14 = vpop.eup %672 }
 0x1ea   : > { %v558_v15 = vmul.f32 %v673_v14, %v556_v13  ;;  %vm563_vm3 = vweird.f32 %v673_v14 }
 0x1eb   : > { %vm564_vm5 = vmor %vm562_vm4, %vm563_vm3 }
 0x1ec   : > { %v559_v16 = vsub.f32 1.0, %v558_v15 }
 0x1ee   : > { %v560_v18 = vmul.f32 %v673_v14, %v559_v16 }
 0x1f0   : > { %v561_v20 = vadd.f32 %v673_v14, %v560_v18 }
 0x1f2   : > { %v565_v22 = vsel %vm564_vm5, %v673_v14, %v561_v20 }
 0x1f3   : > { %v570_v23 = vsel %vm567_vm6, %v569_v21, %v565_v22 }
 0x1f4   : > { %v572_v24 = vperm.slane %v570_v23, 0 }
 0x1f6   : > { %573 = vst.msk [vmem:[%s303_s10] sm:$0xff] %vm498_vm0, %v572_v24 }
 0x1f7 PF: > { %s18_s27 = sadd.s32 1, %s680_s27  }
 0x1f8   : > { %p15_p4 = scmp.ge.s32.totalorder %s18_s27, 4  }
 0x1fa   :  { %17 = sbr.rel (!%p15_p4) target bundleno = 1 (0x1), region = 82 }

// kernel: mbconv1_pallas.6
= control target key start
LH: loop header
LB: loop body
LE: loop exit
PB: predicated region body
PF: predicated region fallthrough
CT: control target
= control target key end

     0   :  { %s2001_s24 = smov 0   ;;  %s2003_s25 = smov 0   ;;  %s3294_s0 = inlined_call_operand.vmem [shape: f32[2,256,16], index: 0, kind: input, shape index: {}]   ;;  %s3295_s1 = inlined_call_operand.vmem [shape: f32[1,16], index: 1, kind: input, shape index: {}]   ;;  %s3296_s2 = inlined_call_operand.vmem [shape: f32[1,16], index: 2, kind: input, shape index: {}]   ;;  %s3297_s3 = inlined_call_operand.vmem [shape: f32[2,8,16], index: 3, kind: input, shape index: {}]   ;;  %s3298_s4 = inlined_call_operand.vmem [shape: f32[16,16], index: 4, kind: input, shape index: {}]   ;;  %s3299_s5 = inlined_call_operand.vmem [shape: f32[1,16], index: 5, kind: input, shape index: {}]   ;;  %s3300_s6 = inlined_call_operand.vmem [shape: f32[2,256,16], index: 6, kind: output, shape index: {0}]   ;;  %s3301_s7 = inlined_call_operand.vmem [shape: f32[2,1,2,16], index: 7, kind: output, shape index: {1}]  }
   0x1   :  { %s2005_s26 = smov 0  }
   0x2 LB: > { %s30_s27 = sadd.s32 1, %s1955_s25  ;;  %p1697_p0 = scmp.ge.s32.totalorder %s1959_s26, 1  ;;  %s1959_s26 = sphi %s2005_s26, %s18_s26   ;;  %s1955_s25 = sphi %s2003_s25, %s3544_s25   ;;  %s1951_s24 = sphi %s2001_s24, %s3543_s24  }
   0x3   : > { %p32_p1 = scmp.ge.s32.totalorder %s30_s27, 2  ;;  %p272_p2 = scmp.lt.s32.totalorder %s1959_s26, 3 }
   0x5   : > { %s3546_s27 = smov (%p32_p1, %s30_s27), 0  ;;  %p273_p3 = pnand %p1697_p0, %p272_p2 }
   0x6   : > { %p324_p4 = scmp.lt.s32.totalorder (!%p273_p3), %s1951_s24, 1 }
   0x7   : > { %276 = sbr.rel (%p273_p3) target bundleno = 350 (0x15e), region = 44 }
   0xc   : > { %v1133_v0 = vld [vmem:[%s3298_s4 + $0x8] sm:$0xff]  ;;  %v1132_v1 = vld [vmem:[%s3298_s4] sm:$0xff]  ;;  %s3548_s24 = smov (!%p324_p4, %s1951_s24), 1 }
   0xd   : > { %1249 = vmatpush.msra.mxu0 %v1133_v0  ;;  %1772 = vmatpush.msra.mxu1 %v1133_v0  ;;  %v2030_v2 = vld [vmem:[%s3295_s1] ss:$0 sm:$0xff]  ;;  %s1770_s11 = sshll.u32 %s3548_s24, 8  ;;  %s1700_s12 = sshll.u32 %s3548_s24, 3 }
   0xe   : > { %1773 = vmatpush.msra.mxu2 %v1133_v0  ;;  %1774 = vmatpush.msra.mxu3 %v1133_v0  ;;  %s2039_s15 = scalar_lea.vmem %s3294_s0, %s1770_s11  ;;  %s2044_s18 = scalar_lea.vmem %s3297_s3, %s1700_s12  ;;  %v2049_v3 = vld [vmem:[%s3296_s2] ss:$0 sm:$0xff] }
   0xf   : > { %1250 = vmatpush.msra.mxu0 %v1132_v1  ;;  %1775 = vmatpush.msra.mxu1 %v1132_v1  ;;  %v354_v4 = vld [vmem:[%s2039_s15] sm:$0xff]  ;;  %v355_v5 = vld [vmem:[%s2039_s15 + $0x8] sm:$0xff]  ;;  %v356_v8 = vld [vmem:[%s2039_s15 + $0x10] sm:$0xff]  ;;  %s3029_s10 = scalar_lea.vmem %s3300_s6, %s1770_s11  ;;  %s1703_s11 = sshll.u32 %s3548_s24, 1 }
  0x10   : > { %1776 = vmatpush.msra.mxu2 %v1132_v1  ;;  %1777 = vmatpush.msra.mxu3 %v1132_v1  ;;  %v390_v6 = vmul.f32 %v2030_v2, %v354_v4  ;;  %v391_v7 = vmul.f32 %v2030_v2, %v355_v5  ;;  %v362_v9 = vld [vmem:[%s2039_s15 + $0x40] sm:$0xff]  ;;  %v392_v10 = vmul.f32 %v2030_v2, %v356_v8  ;;  %v357_v12 = vld [vmem:[%s2039_s15 + $0x18] sm:$0xff]  ;;  %v363_v13 = vld [vmem:[%s2039_s15 + $0x48] sm:$0xff]  ;;  %s353_s14 = scalar_lea.vmem %s3301_s7, %s1703_s11 }
  0x11   : > { %v398_v11 = vmul.f32 %v2030_v2, %v362_v9  ;;  %v370_v14 = vld [vmem:[%s2039_s15 + $0x80] sm:$0xff]  ;;  %v393_v17 = vmul.f32 %v2030_v2, %v357_v12  ;;  %v399_v21 = vmul.f32 %v2030_v2, %v363_v13  ;;  %v364_v23 = vld [vmem:[%s2039_s15 + $0x50] sm:$0xff]  ;;  %v371_v27 = vld [vmem:[%s2039_s15 + $0x88] sm:$0xff] }
  0x12   : > { %v2063_v15 = vadd.f32 %v2049_v3, %v390_v6  ;;  %v2066_v16 = vadd.f32 %v2049_v3, %v391_v7  ;;  %v358_v18 = vld [vmem:[%s2039_s15 + $0x20] sm:$0xff]  ;;  %v2071_v19 = vadd.f32 %v2049_v3, %v392_v10  ;;  %v406_v22 = vmul.f32 %v2030_v2, %v370_v14  ;;  %v359_v45 = vld [vmem:[%s2039_s15 + $0x28] sm:$0xff]  ;;  %v365_v46 = vld [vmem:[%s2039_s15 + $0x58] sm:$0xff] }
  0x13   : > { %v2074_v20 = vadd.f32 %v2049_v3, %v398_v11  ;;  %v2082_v26 = vadd.f32 %v2049_v3, %v393_v17  ;;  %v2088_v30 = vadd.f32 %v2049_v3, %v399_v21  ;;  %v394_v31 = vmul.f32 %v2030_v2, %v358_v18 }
  0x14   : > { %v1704_v24 = vmul.f32 -1.442695, %v2063_v15  ;;  %v1705_v25 = vmul.f32 -1.442695, %v2066_v16  ;;  %v1706_v28 = vmul.f32 -1.442695, %v2071_v19  ;;  %v2093_v33 = vadd.f32 %v2049_v3, %v406_v22 }
  0x15   : > { %v1712_v29 = vmul.f32 -1.442695, %v2074_v20  ;;  %v1707_v32 = vmul.f32 -1.442695, %v2082_v26  ;;  %v400_v34 = vmul.f32 %v2030_v2, %v364_v23  ;;  %v1713_v35 = vmul.f32 -1.442695, %v2088_v30 }
  0x16   : > { %1806 = vpow2.f32 %v1704_v24  ;;  %v407_v36 = vmul.f32 %v2030_v2, %v371_v27  ;;  %v2099_v37 = vadd.f32 %v2049_v3, %v394_v31  ;;  %v1720_v38 = vmul.f32 -1.442695, %v2093_v33 }
  0x17   : > { %1808 = vpow2.f32 %v1705_v25  ;;  %v2103_v39 = vadd.f32 %v2049_v3, %v400_v34  ;;  %v2123_v54 = vmul.f32 %v2030_v2, %v359_v45  ;;  %v2126_v55 = vmul.f32 %v2030_v2, %v365_v46 }
  0x18   : > { %1810 = vpow2.f32 %v1706_v28  ;;  %v2106_v40 = vadd.f32 %v2049_v3, %v407_v36  ;;  %v1708_v44 = vmul.f32 -1.442695, %v2099_v37 }
  0x19   : > { %1812 = vpow2.f32 %v1712_v29  ;;  %v1714_v49 = vmul.f32 -1.442695, %v2103_v39 }
  0x1a   : > { %1814 = vpow2.f32 %v1707_v32  ;;  %v2118_v51 = vmul.f32 -1.442695, %v2106_v40 }
  0x1b   : > { %1816 = vpow2.f32 %v1713_v35 }
  0x1c   : > { %v1807_v41 = vpop.eup %1806  ;;  %1818 = vpow2.f32 %v1720_v38  ;;  %v2287_v38 = vadd.f32 %v2049_v3, %v2123_v54 }
  0x1d   : > { %v1809_v42 = vpop.eup %1808  ;;  %v2108_v43 = vadd.f32 1.0, %v1807_v41 }
  0x1e   : > { %v1811_v47 = vpop.eup %1810  ;;  %v2113_v48 = vadd.f32 1.0, %v1809_v42 }
  0x1f   : > { %v1813_v50 = vpop.eup %1812  ;;  %1820 = vrcp.f32 %v2108_v43  ;;  %v595_v53 = vand.u32 2147483647, %v2108_v43  ;;  %v597_v57 = vand.u32 2147483648, %v2108_v43  ;;  %v2129_v58 = vadd.f32 1.0, %v1811_v47 }
  0x20   : > { %v1815_v52 = vpop.eup %1814  ;;  %1822 = vrcp.f32 %v2113_v48  ;;  %v2131_v59 = vadd.f32 1.0, %v1813_v50  ;;  %v610_v60 = vand.u32 2147483647, %v2113_v48  ;;  %v612_v61 = vand.u32 2147483648, %v2113_v48  ;;  %v379_v50 = vld [vmem:[%s2039_s15 + $0xc8] sm:$0xff] }
  0x21   : > { %v1817_v56 = vpop.eup %1816  ;;  %1824 = vpow2.f32 %v1708_v44  ;;  %v2135_v62 = vadd.f32 1.0, %v1815_v52  ;;  %vm591_vm0 = vweird.f32 %v2108_v43  ;;  %vm606_vm1 = vweird.f32 %v2113_v48 }
  0x22   : > { %1826 = vpow2.f32 %v1714_v49  ;;  %v627_v63 = vand.u32 2147483648, %v2129_v58  ;;  %v1819_v0 = vpop.eup %1818  ;;  %vm2141_vm2 = vcmp.eq.f32.partialorder %v595_v53, 8.507059e+37  ;;  %v625_v4 = vand.u32 2147483647, %v2129_v58 }
  0x23   : > { %1828 = vrcp.f32 %v2129_v58  ;;  %v2147_v5 = vadd.f32 1.0, %v1817_v56  ;;  %v598_v7 = vor.u32 1.1754944e-38, %v597_v57  ;;  %v715_v8 = vand.u32 2147483647, %v2131_v59  ;;  %v372_v57 = vld [vmem:[%s2039_s15 + $0x90] sm:$0xff] }
  0x24   : > { %1830 = vrcp.f32 %v2131_v59  ;;  %v717_v9 = vand.u32 2147483648, %v2131_v59  ;;  %vm2155_vm3 = vcmp.eq.f32.partialorder %v610_v60, 8.507059e+37  ;;  %v613_v13 = vor.u32 1.1754944e-38, %v612_v61  ;;  %v2214_v61 = vld [vmem:[%s2044_s18] ss:$0 sm:$0xff] }
  0x25   : > { %v1821_v6 = vpop.eup %1820  ;;  %1832 = vrcp.f32 %v2135_v62  ;;  %vm621_vm4 = vweird.f32 %v2129_v58  ;;  %vm711_vm5 = vweird.f32 %v2131_v59  ;;  %v2163_v18 = vor.u32 1.1754944e-38, %v627_v63 }
  0x26   : > { %v2152_v10 = vpop.eup %1822  ;;  %v587_v11 = vmul.f32 %v1821_v6, %v2108_v43  ;;  %v640_v21 = vand.u32 2147483647, %v2135_v62  ;;  %v642_v22 = vand.u32 2147483648, %v2135_v62  ;;  %vm592_vm6 = vweird.f32 %v1821_v6 }
  0x27   : > { %v1825_v14 = vpop.eup %1824  ;;  %v602_v17 = vmul.f32 %v2152_v10, %v2113_v48  ;;  %vm2169_vm7 = vcmp.eq.f32.partialorder %v625_v4, 8.507059e+37  ;;  %vm636_vm8 = vweird.f32 %v2135_v62  ;;  %1834 = vrcp.f32 %v2147_v5  ;;  %vm2190_vm14 = vmor %vm591_vm0, %vm592_vm6 }
  0x28   : > { %v2167_v23 = vpop.eup %1826  ;;  %v588_v24 = vsub.f32 1.0, %v587_v11  ;;  %vm607_vm10 = vweird.f32 %v2152_v10  ;;  %vm2176_vm11 = vcmp.eq.f32.partialorder %v715_v8, 8.507059e+37  ;;  %v718_v31 = vor.u32 1.1754944e-38, %v717_v9 }
  0x29   : > { %v1829_v27 = vpop.eup %1828  ;;  %v603_v28 = vsub.f32 1.0, %v602_v17  ;;  %v730_v32 = vand.u32 2147483647, %v2147_v5  ;;  %vm2182_vm12 = vcmp.eq.f32.partialorder %v640_v21, 8.507059e+37  ;;  %v643_v46 = vor.u32 1.1754944e-38, %v642_v22  ;;  %vm2201_vm15 = vmor %vm606_vm1, %vm607_vm10 }
  0x2a   : > { %v1831_v34 = vpop.eup %1830  ;;  %v589_v35 = vmul.f32 %v1821_v6, %v588_v24  ;;  %v617_v36 = vmul.f32 %v1829_v27, %v2129_v58  ;;  %v732_v47 = vand.u32 2147483648, %v2147_v5  ;;  %vm622_vm0 = vweird.f32 %v1829_v27 }
  0x2b   : > { %v1833_v41 = vpop.eup %1832  ;;  %v604_v44 = vmul.f32 %v2152_v10, %v603_v28  ;;  %v707_v45 = vmul.f32 %v1831_v34, %v2131_v59  ;;  %vm712_vm6 = vweird.f32 %v1831_v34  ;;  %vm2207_vm9 = vcmp.eq.f32.partialorder %v730_v32, 8.507059e+37  ;;  %vm2226_vm1 = vmor %vm621_vm4, %vm622_vm0 }
  0x2c   : > { %v590_v49 = vadd.f32 %v1821_v6, %v589_v35  ;;  %v618_v43 = vsub.f32 1.0, %v617_v36  ;;  %v632_v52 = vmul.f32 %v1833_v41, %v2135_v62  ;;  %vm637_vm13 = vweird.f32 %v1833_v41 }
  0x2d   : > { %v605_v53 = vadd.f32 %v2152_v10, %v604_v44  ;;  %v708_v56 = vsub.f32 1.0, %v707_v45  ;;  %v1835_v60 = vpop.eup %1834  ;;  %v2216_v8 = vadd.f32 1.0, %v1819_v0  ;;  %vm2246_vm4 = vmor %vm636_vm8, %vm637_vm13  ;;  %v733_v35 = vor.u32 1.1754944e-38, %v732_v47 }
  0x2e   : > { %v594_v48 = vsel %vm2190_vm14, %v1821_v6, %v590_v49  ;;  %v619_v63 = vmul.f32 %v1829_v27, %v618_v43  ;;  %v633_v4 = vsub.f32 1.0, %v632_v52  ;;  %v722_v21 = vmul.f32 %v1835_v60, %v2147_v5 }
  0x2f   : > { %v599_v9 = vsel %vm2141_vm2, %v598_v7, %v594_v48  ;;  %v609_v11 = vsel %vm2201_vm15, %v2152_v10, %v605_v53  ;;  %v709_v6 = vmul.f32 %v1831_v34, %v708_v56  ;;  %vm2235_vm2 = vmor %vm711_vm5, %vm712_vm6  ;;  %v2239_v10 = vadd.f32 1.0, %v1825_v14  ;;  %v360_v48 = vld [vmem:[%s2039_s15 + $0x30] sm:$0xff] }
  0x30   : > { %v1066_v0 = vmul.f32 %v599_v9, %v2063_v15  ;;  %v620_v22 = vadd.f32 %v1829_v27, %v619_v63  ;;  %v634_v7 = vmul.f32 %v1833_v41, %v633_v4  ;;  %v614_v58 = vsel %vm2155_vm3, %v613_v13, %v609_v11 }
  0x31   : > { %v710_v24 = vadd.f32 %v1831_v34, %v709_v6  ;;  %v723_v28 = vsub.f32 1.0, %v722_v21  ;;  %vm727_vm10 = vweird.f32 %v1835_v60  ;;  %1836 = vrcp.f32 %v2216_v8 }
  0x32   : > { %v1100_v59 = vmul.f32 %v2214_v61, %v1066_v0  ;;  %v624_v32 = vsel %vm2226_vm1, %v1829_v27, %v620_v22  ;;  %v635_v14 = vadd.f32 %v1833_v41, %v634_v7  ;;  %vm3324_vm3 = vcmask 130048  }
  0x33   : > { %v629_v12 = vsel %vm2169_vm7, %v2163_v18, %v624_v32  ;;  %v714_v62 = vsel %vm2235_vm2, %v1831_v34, %v710_v24  ;;  %v724_v13 = vmul.f32 %v1835_v60, %v723_v28  ;;  %v1067_v36 = vmul.f32 %v614_v58, %v2066_v16  ;;  %vm3333_vm15 = vmmov %vm3324_vm3 }
  0x34   : > { %1736 = vmatmul.msk.f32.vlgmr.msra.gmra.mxu0 %vm3324_vm3, %v1100_v59  ;;  %v1068_v42 = vmul.f32 %v629_v12, %v2071_v19  ;;  %v719_v27 = vsel %vm2176_vm11, %v718_v31, %v714_v62  ;;  %v639_v44 = vsel %vm2246_vm4, %v1833_v41, %v635_v14  ;;  %vm3325_vm5 = vweird.f32 %v2147_v5  ;;  %vm3328_vm11 = vmmov %vm3324_vm3 }
  0x35   : > { %vm2268_vm7 = vmor %vm3325_vm5, %vm727_vm10  ;;  %v1074_v25 = vmul.f32 %v719_v27, %v2074_v20  ;;  %v644_v34 = vsel %vm2182_vm12, %v643_v46, %v639_v44  ;;  %v725_v16 = vadd.f32 %v1835_v60, %v724_v13  ;;  %v835_v19 = vand.u32 2147483647, %v2216_v8  ;;  %v366_v13 = vld [vmem:[%s2039_s15 + $0x60] sm:$0xff] }
  0x36   : > { %v1069_v29 = vmul.f32 %v644_v34, %v2082_v26  ;;  %v837_v31 = vand.u32 2147483648, %v2216_v8  ;;  %1838 = vrcp.f32 %v2239_v10  ;;  %v2280_v5 = vadd.f32 1.0, %v2167_v23  ;;  %vm3336_vm2 = vmmov %vm3324_vm3 }
  0x37   : > { %v1108_v41 = vmul.f32 %v2214_v61, %v1074_v25  ;;  %v729_v20 = vsel %vm2268_vm7, %v1835_v60, %v725_v16  ;;  %v2291_v45 = vadd.f32 %v2049_v3, %v2126_v55  ;;  %v1837_v26 = vpop.eup %1836  ;;  %v1101_v46 = vmul.f32 %v2214_v61, %v1067_v36  ;;  %v378_v60 = vld [vmem:[%s2039_s15 + $0xc0] sm:$0xff]  ;;  %vm3341_vm5 = vmmov %vm3336_vm2 }
  0x38   : > { %v734_v23 = vsel %vm2207_vm9, %v733_v35, %v729_v20  ;;  %vm831_vm8 = vweird.f32 %v2216_v8  ;;  %v655_v47 = vand.u32 2147483647, %v2239_v10  ;;  %v1102_v54 = vmul.f32 %v2214_v61, %v1068_v42  ;;  %v373_v35 = vld [vmem:[%s2039_s15 + $0x98] sm:$0xff] }
  0x39   : > { %1744 = vmatmul.msk.f32.vlgmr.msra.gmra.mxu1 %vm3328_vm11, %v1108_v41  ;;  %v1075_v55 = vmul.f32 %v734_v23, %v2088_v30  ;;  %v827_v49 = vmul.f32 %v1837_v26, %v2216_v8  ;;  %vm2302_vm12 = vcmp.eq.f32.partialorder %v835_v19, 8.507059e+37  ;;  %v2307_v43 = vmul.f32 %v2214_v61, %v1069_v29 }
  0x3a   : > { %v838_v52 = vor.u32 1.1754944e-38, %v837_v31  ;;  %vm651_vm9 = vweird.f32 %v2239_v10  ;;  %1840 = vrcp.f32 %v2280_v5  ;;  %vm832_vm13 = vweird.f32 %v1837_v26 }
  0x3b   : > { %v828_v53 = vsub.f32 1.0, %v827_v49  ;;  %vm2311_vm14 = vcmp.eq.f32.partialorder %v655_v47, 8.507059e+37  ;;  %v657_v30 = vand.u32 2147483648, %v2239_v10  ;;  %vm741_vm0 = vweird.f32 %v2280_v5  ;;  %vm2330_vm6 = vmor %vm831_vm8, %vm832_vm13 }
  0x3c   : > { %v1839_v63 = vpop.eup %1838  ;;  %1737 = vmatmul.msk.f32.gmra.mxu0 %vm3333_vm15, %v1101_v46  ;;  %1842 = vpow2.f32 %v2118_v51  ;;  %v1709_v4 = vmul.f32 -1.442695, %v2287_v38  ;;  %v1715_v9 = vmul.f32 -1.442695, %v2291_v45  ;;  %v1109_v11 = vmul.f32 %v2214_v61, %v1075_v55  ;;  %vm3344_vm8 = vmmov %vm3336_vm2 }
  0x3d   : > { %v829_v17 = vmul.f32 %v1837_v26, %v828_v53  ;;  %v647_v6 = vmul.f32 %v1839_v63, %v2239_v10  ;;  %v745_v21 = vand.u32 2147483647, %v2280_v5  ;;  %v408_v51 = vmul.f32 %v2030_v2, %v372_v57 }
  0x3e   : > { %1844 = vpow2.f32 %v1709_v4  ;;  %v414_v22 = vmul.f32 %v2030_v2, %v378_v60  ;;  %v396_v1 = vmul.f32 %v2030_v2, %v360_v48  ;;  %vm652_vm1 = vweird.f32 %v1839_v63 }
  0x3f   : > { %v830_v7 = vadd.f32 %v1837_v26, %v829_v17  ;;  %v648_v58 = vsub.f32 1.0, %v647_v6  ;;  %1846 = vpow2.f32 %v1715_v9  ;;  %v658_v15 = vor.u32 1.1754944e-38, %v657_v30  ;;  %vm2359_vm10 = vmor %vm651_vm9, %vm652_vm1 }
  0x40   : > { %v1841_v24 = vpop.eup %1840  ;;  %v747_v8 = vand.u32 2147483648, %v2280_v5  ;;  %v2339_v28 = vadd.f32 %v2049_v3, %v408_v51  ;;  %v2342_v59 = vadd.f32 %v2049_v3, %v414_v22  ;;  %vm2348_vm4 = vcmp.eq.f32.partialorder %v745_v21, 8.507059e+37  ;;  %vm3347_vm9 = vmmov %vm3336_vm2 }
  0x41   : > { %1745 = vmatmul.msk.f32.gmra.mxu1 %vm3336_vm2, %v1109_v11  ;;  %v834_v32 = vsel %vm2330_vm6, %v1837_v26, %v830_v7  ;;  %v649_v14 = vmul.f32 %v1839_v63, %v648_v58  ;;  %v737_v12 = vmul.f32 %v1841_v24, %v2280_v5  ;;  %vm742_vm3 = vweird.f32 %v1841_v24  ;;  %vm3350_vm6 = vmmov %vm3336_vm2 }
  0x42   : > { %v1843_v36 = vpop.eup %1842  ;;  %v839_v42 = vsel %vm2302_vm12, %v838_v52, %v834_v32  ;;  %v1722_v44 = vmul.f32 -1.442695, %v2339_v28  ;;  %v2365_v18 = vadd.f32 %v2049_v3, %v396_v1  ;;  %v1728_v10 = vmul.f32 -1.442695, %v2342_v59  ;;  %vm2383_vm7 = vmor %vm741_vm0, %vm742_vm3 }
  0x43   : > { %v1082_v25 = vmul.f32 %v839_v42, %v2093_v33  ;;  %v650_v34 = vadd.f32 %v1839_v63, %v649_v14  ;;  %v738_v16 = vsub.f32 1.0, %v737_v12  ;;  %v2368_v19 = vadd.f32 1.0, %v1843_v36 }
  0x44   : > { %v1845_v29 = vpop.eup %1844  ;;  %1738 = vmatmul.msk.f32.gmra.mxu0 %vm3341_vm5, %v1102_v54  ;;  %1848 = vpow2.f32 %v1722_v44  ;;  %v402_v31 = vmul.f32 %v2030_v2, %v366_v13  ;;  %v409_v41 = vmul.f32 %v2030_v2, %v373_v35  ;;  %v748_v54 = vor.u32 1.1754944e-38, %v747_v8 }
  0x45   : > { %v1847_v20 = vpop.eup %1846  ;;  %v1116_v26 = vmul.f32 %v2214_v61, %v1082_v25  ;;  %v654_v33 = vsel %vm2359_vm10, %v1839_v63, %v650_v34  ;;  %v739_v46 = vmul.f32 %v1841_v24, %v738_v16  ;;  %1850 = vrcp.f32 %v2368_v19 }
  0x46   : > { %v659_v23 = vsel %vm2311_vm14, %v658_v15, %v654_v33  ;;  %v850_v55 = vand.u32 2147483647, %v2368_v19  ;;  %v1710_v49 = vmul.f32 -1.442695, %v2365_v18  ;;  %v852_v53 = vand.u32 2147483648, %v2368_v19 }
  0x47   : > { %1752 = vmatmul.msk.f32.vlgmr.msra.gmra.mxu2 %vm3344_vm8, %v1116_v26  ;;  %v740_v52 = vadd.f32 %v1841_v24, %v739_v46  ;;  %v2392_v56 = vadd.f32 1.0, %v1845_v29  ;;  %v2394_v30 = vadd.f32 1.0, %v1847_v20  ;;  %v1070_v5 = vmul.f32 %v659_v23, %v2099_v37 }
  0x48   : > { %1852 = vpow2.f32 %v1728_v10  ;;  %v2398_v57 = vadd.f32 %v2049_v3, %v402_v31  ;;  %v2401_v60 = vadd.f32 %v2049_v3, %v409_v41  ;;  %vm846_vm11 = vweird.f32 %v2368_v19 }
  0x49   : > { %v744_v48 = vsel %vm2383_vm7, %v1841_v24, %v740_v52  ;;  %1854 = vrcp.f32 %v2392_v56  ;;  %v415_v63 = vmul.f32 %v2030_v2, %v379_v50  ;;  %vm2410_vm12 = vcmp.eq.f32.partialorder %v850_v55, 8.507059e+37 }
  0x4a   : > { %v1849_v4 = vpop.eup %1848  ;;  %v749_v37 = vsel %vm2348_vm4, %v748_v54, %v744_v48  ;;  %v670_v11 = vand.u32 2147483647, %v2392_v56  ;;  %v672_v17 = vand.u32 2147483648, %v2392_v56  ;;  %1856 = vrcp.f32 %v2394_v30 }
  0x4b   : > { %v1851_v6 = vpop.eup %1850  ;;  %v1076_v21 = vmul.f32 %v749_v37, %v2103_v39  ;;  %v853_v0 = vor.u32 1.1754944e-38, %v852_v53  ;;  %v760_v51 = vand.u32 2147483647, %v2394_v30  ;;  %v762_v22 = vand.u32 2147483648, %v2394_v30 }
  0x4c   : > { %1739 = vmatmul.msk.f32.gmra.mxu0 %vm3347_vm9, %v2307_v43  ;;  %v1104_v1 = vmul.f32 %v2214_v61, %v1070_v5  ;;  %v842_v7 = vmul.f32 %v1851_v6, %v2368_v19  ;;  %vm666_vm13 = vweird.f32 %v2392_v56  ;;  %v1716_v58 = vmul.f32 -1.442695, %v2398_v57 }
  0x4d   : > { %v1110_v24 = vmul.f32 %v2214_v61, %v1076_v21  ;;  %vm847_vm14 = vweird.f32 %v1851_v6  ;;  %vm756_vm15 = vweird.f32 %v2394_v30  ;;  %v2428_v39 = vadd.f32 1.0, %v1849_v4 }
  0x4e   : > { %v1853_v15 = vpop.eup %1852  ;;  %v843_v8 = vsub.f32 1.0, %v842_v7  ;;  %vm2430_vm0 = vcmp.eq.f32.partialorder %v670_v11, 8.507059e+37  ;;  %v673_v43 = vor.u32 1.1754944e-38, %v672_v17  ;;  %1858 = vpow2.f32 %v1710_v49  ;;  %vm2451_vm2 = vmor %vm846_vm11, %vm847_vm14 }
  0x4f   : > { %v1855_v14 = vpop.eup %1854  ;;  %1746 = vmatmul.msk.f32.gmra.mxu1 %vm3350_vm6, %v1110_v24  ;;  %vm2435_vm1 = vcmp.eq.f32.partialorder %v760_v51, 8.507059e+37  ;;  %v763_v62 = vor.u32 1.1754944e-38, %v762_v22  ;;  %1860 = vrcp.f32 %v2428_v39  ;;  %v1723_v13 = vmul.f32 -1.442695, %v2401_v60  ;;  %vm3363_vm14 = vmmov %vm3341_vm5  ;;  %v361_v24 = vld [vmem:[%s2039_s15 + $0x38] sm:$0xff] }
  0x50   : > { %v2442_v35 = vadd.f32 %v2049_v3, %v415_v63  ;;  %v1857_v36 = vpop.eup %1856  ;;  %v844_v42 = vmul.f32 %v1851_v6, %v843_v8  ;;  %v662_v27 = vmul.f32 %v1855_v14, %v2392_v56  ;;  %v865_v44 = vand.u32 2147483647, %v2428_v39  ;;  %vm3366_vm6 = vmmov %vm3341_vm5 }
  0x51   : > { %v2446_v25 = vadd.f32 1.0, %v1853_v15  ;;  %vm667_vm4 = vweird.f32 %v1855_v14  ;;  %v752_v16 = vmul.f32 %v1857_v36, %v2394_v30  ;;  %vm861_vm10 = vweird.f32 %v2428_v39 }
  0x52   : > { %v867_v29 = vand.u32 2147483648, %v2428_v39  ;;  %v845_v10 = vadd.f32 %v1851_v6, %v844_v42  ;;  %v663_v31 = vsub.f32 1.0, %v662_v27  ;;  %vm757_vm3 = vweird.f32 %v1857_v36  ;;  %vm2473_vm8 = vmor %vm666_vm13, %vm667_vm4 }
  0x53   : > { %1862 = vrcp.f32 %v2446_v25  ;;  %v753_v41 = vsub.f32 1.0, %v752_v16  ;;  %v955_v20 = vand.u32 2147483647, %v2446_v25  ;;  %v957_v19 = vand.u32 2147483648, %v2446_v25  ;;  %vm2482_vm11 = vmor %vm756_vm15, %vm757_vm3 }
  0x54   : > { %1864 = vpow2.f32 %v1716_v58  ;;  %v1859_v26 = vpop.eup %1858  ;;  %1740 = vmatmul.msk.f32.gmra.mxu0 %vm3341_vm5, %v1104_v1  ;;  %v849_v33 = vsel %vm2451_vm2, %v1851_v6, %v845_v10  ;;  %v664_v46 = vmul.f32 %v1855_v14, %v663_v31  ;;  %vm2464_vm7 = vcmp.eq.f32.partialorder %v865_v44, 8.507059e+37  ;;  %vm3369_vm4 = vmmov %vm3341_vm5 }
  0x55   : > { %1866 = vpow2.f32 %v1723_v13  ;;  %v1861_v47 = vpop.eup %1860  ;;  %v854_v54 = vsel %vm2410_vm12, %v853_v0, %v849_v33  ;;  %v754_v49 = vmul.f32 %v1857_v36, %v753_v41  ;;  %v868_v50 = vor.u32 1.1754944e-38, %v867_v29 }
  0x56   : > { %v1729_v52 = vmul.f32 -1.442695, %v2442_v35  ;;  %v1083_v53 = vmul.f32 %v854_v54, %v2106_v40  ;;  %v665_v5 = vadd.f32 %v1855_v14, %v664_v46  ;;  %v857_v56 = vmul.f32 %v1861_v47, %v2428_v39  ;;  %v374_v54 = vld [vmem:[%s2039_s15 + $0xa0] sm:$0xff] }
  0x57   : > { %vm951_vm12 = vweird.f32 %v2446_v25  ;;  %v755_v63 = vadd.f32 %v1857_v36, %v754_v49  ;;  %vm2488_vm9 = vcmp.eq.f32.partialorder %v955_v20, 8.507059e+37  ;;  %v958_v37 = vor.u32 1.1754944e-38, %v957_v19 }
  0x58   : > { %v2492_v9 = vadd.f32 1.0, %v1859_v26  ;;  %v1117_v30 = vmul.f32 %v2214_v61, %v1083_v53  ;;  %v669_v11 = vsel %vm2473_vm8, %v1855_v14, %v665_v5  ;;  %v858_v17 = vsub.f32 1.0, %v857_v56  ;;  %v380_v53 = vld [vmem:[%s2039_s15 + $0xd0] sm:$0xff]  ;;  %vm3372_vm8 = vmmov %vm3369_vm4 }
  0x59   : > { %v1863_v40 = vpop.eup %1862  ;;  %vm862_vm13 = vweird.f32 %v1861_v47  ;;  %v674_v21 = vsel %vm2430_vm0, %v673_v43, %v669_v11  ;;  %v759_v0 = vsel %vm2482_vm11, %v1857_v36, %v755_v63  ;;  %1868 = vpow2.f32 %v1729_v52 }
  0x5a   : > { %v1865_v6 = vpop.eup %1864  ;;  %v947_v51 = vmul.f32 %v1863_v40, %v2446_v25  ;;  %1753 = vmatmul.msk.f32.gmra.mxu2 %vm3363_vm14, %v1117_v30  ;;  %v1071_v1 = vmul.f32 %v674_v21, %v2287_v38  ;;  %v764_v7 = vsel %vm2435_vm1, %v763_v62, %v759_v0  ;;  %v859_v58 = vmul.f32 %v1861_v47, %v858_v17  ;;  %vm2511_vm15 = vmor %vm861_vm10, %vm862_vm13  ;;  %v367_v38 = vld [vmem:[%s2039_s15 + $0x68] sm:$0xff] }
  0x5b   : > { %v1867_v22 = vpop.eup %1866  ;;  %1870 = vrcp.f32 %v2492_v9  ;;  %v1077_v15 = vmul.f32 %v764_v7, %v2291_v45  ;;  %vm952_vm0 = vweird.f32 %v1863_v40  ;;  %v685_v43 = vand.u32 2147483647, %v2492_v9  ;;  %vm3379_vm14 = vmmov %vm3369_vm4 }
  0x5c   : > { %v948_v32 = vsub.f32 1.0, %v947_v51  ;;  %v1105_v14 = vmul.f32 %v2214_v61, %v1071_v1  ;;  %v860_v12 = vadd.f32 %v1861_v47, %v859_v58  ;;  %v687_v62 = vand.u32 2147483648, %v2492_v9  ;;  %vm2530_vm1 = vmor %vm951_vm12, %vm952_vm0 }
  0x5d   : > { %v2519_v13 = vadd.f32 1.0, %v1865_v6  ;;  %v1111_v45 = vmul.f32 %v2214_v61, %v1077_v15  ;;  %v2522_v39 = vadd.f32 1.0, %v1867_v22  ;;  %v397_v42 = vmul.f32 %v2030_v2, %v361_v24 }
  0x5e   : > { %v949_v36 = vmul.f32 %v1863_v40, %v948_v32  ;;  %1741 = vmatmul.msk.f32.gmra.mxu0 %vm3366_vm6, %v1105_v14  ;;  %v864_v27 = vsel %vm2511_vm15, %v1861_v47, %v860_v12  ;;  %vm681_vm2 = vweird.f32 %v2492_v9  ;;  %v403_v34 = vmul.f32 %v2030_v2, %v367_v38  ;;  %v375_v38 = vld [vmem:[%s2039_s15 + $0xa8] sm:$0xff] }
  0x5f   : > { %1872 = vrcp.f32 %v2519_v13  ;;  %v1869_v16 = vpop.eup %1868  ;;  %1747 = vmatmul.msk.f32.gmra.mxu1 %vm3369_vm4, %v1111_v45  ;;  %v869_v29 = vsel %vm2464_vm7, %v868_v50, %v864_v27  ;;  %vm2540_vm10 = vcmp.eq.f32.partialorder %v685_v43, 8.507059e+37  ;;  %v688_v31 = vor.u32 1.1754944e-38, %v687_v62  ;;  %v368_v43 = vld [vmem:[%s2039_s15 + $0x70] sm:$0xff] }
  0x60   : > { %v950_v10 = vadd.f32 %v1863_v40, %v949_v36  ;;  %v1084_v20 = vmul.f32 %v869_v29, %v2339_v28  ;;  %v775_v19 = vand.u32 2147483647, %v2519_v13  ;;  %v777_v26 = vand.u32 2147483648, %v2519_v13 }
  0x61   : > { %v1871_v41 = vpop.eup %1870  ;;  %1874 = vrcp.f32 %v2522_v39  ;;  %vm771_vm3 = vweird.f32 %v2519_v13  ;;  %v880_v23 = vand.u32 2147483647, %v2522_v39  ;;  %vm876_vm7 = vweird.f32 %v2522_v39 }
  0x62   : > { %v954_v33 = vsel %vm2530_vm1, %v1863_v40, %v950_v10  ;;  %v677_v46 = vmul.f32 %v1871_v41, %v2492_v9  ;;  %v1118_v47 = vmul.f32 %v2214_v61, %v1084_v20  ;;  %vm682_vm5 = vweird.f32 %v1871_v41 }
  0x63   : > { %v959_v28 = vsel %vm2488_vm9, %v958_v37, %v954_v33  ;;  %v882_v50 = vand.u32 2147483648, %v2522_v39  ;;  %v2560_v52 = vadd.f32 1.0, %v1869_v16  ;;  %vm2564_vm11 = vcmp.eq.f32.partialorder %v775_v19, 8.507059e+37  ;;  %vm2584_vm9 = vmor %vm681_vm2, %vm682_vm5 }
  0x64   : > { %v1090_v55 = vmul.f32 %v959_v28, %v2342_v59  ;;  %v678_v49 = vsub.f32 1.0, %v677_v46  ;;  %1754 = vmatmul.msk.f32.gmra.mxu2 %vm3372_vm8, %v1118_v47  ;;  %v778_v56 = vor.u32 1.1754944e-38, %v777_v26  ;;  %v2569_v63 = vadd.f32 %v2049_v3, %v397_v42  ;;  %vm3388_vm5 = vmmov %vm3369_vm4 }
  0x65   : > { %v1873_v5 = vpop.eup %1872  ;;  %v2572_v4 = vadd.f32 %v2049_v3, %v403_v34  ;;  %vm2576_vm12 = vcmp.eq.f32.partialorder %v880_v23, 8.507059e+37  ;;  %v410_v11 = vmul.f32 %v2030_v2, %v374_v54  ;;  %v883_v21 = vor.u32 1.1754944e-38, %v882_v50  ;;  %v381_v54 = vld [vmem:[%s2039_s15 + $0xd8] sm:$0xff] }
  0x66   : > { %v1124_v59 = vmul.f32 %v2214_v61, %v1090_v55  ;;  %v679_v37 = vmul.f32 %v1871_v41, %v678_v49  ;;  %v767_v40 = vmul.f32 %v1873_v5, %v2519_v13  ;;  %vm772_vm13 = vweird.f32 %v1873_v5 }
  0x67   : > { %v1875_v17 = vpop.eup %1874  ;;  %1876 = vrcp.f32 %v2560_v52  ;;  %v416_v0 = vmul.f32 %v2030_v2, %v380_v53  ;;  %vm966_vm15 = vweird.f32 %v2560_v52  ;;  %v970_v9 = vand.u32 2147483647, %v2560_v52  ;;  %vm2608_vm6 = vmor %vm771_vm3, %vm772_vm13 }
  0x68   : > { %1760 = vmatmul.msk.f32.vlgmr.msra.gmra.mxu3 %vm3379_vm14, %v1124_v59  ;;  %v680_v51 = vadd.f32 %v1871_v41, %v679_v37  ;;  %v768_v22 = vsub.f32 1.0, %v767_v40  ;;  %v872_v1 = vmul.f32 %v1875_v17, %v2522_v39  ;;  %vm877_vm0 = vweird.f32 %v1875_v17  ;;  %vm3394_vm14 = vmmov %vm3369_vm4 }
  0x69   : > { %v1711_v7 = vmul.f32 -1.442695, %v2569_v63  ;;  %v1717_v58 = vmul.f32 -1.442695, %v2572_v4  ;;  %v2599_v32 = vadd.f32 %v2049_v3, %v410_v11  ;;  %v972_v62 = vand.u32 2147483648, %v2560_v52  ;;  %vm2620_vm1 = vmor %vm876_vm7, %vm877_vm0 }
  0x6a   : > { %v684_v24 = vsel %vm2584_vm9, %v1871_v41, %v680_v51  ;;  %v769_v15 = vmul.f32 %v1873_v5, %v768_v22  ;;  %v873_v8 = vsub.f32 1.0, %v872_v1  ;;  %v2614_v45 = vadd.f32 %v2049_v3, %v416_v0  ;;  %vm3389_vm7 = vmmov %vm3369_vm4 }
  0x6b   : > { %v689_v14 = vsel %vm2540_vm10, %v688_v31, %v684_v24  ;;  %1878 = vpow2.f32 %v1711_v7  ;;  %v1724_v34 = vmul.f32 -1.442695, %v2599_v32  ;;  %v404_v29 = vmul.f32 %v2030_v2, %v368_v43 }
  0x6c   : > { %v1072_v36 = vmul.f32 %v689_v14, %v2365_v18  ;;  %v770_v42 = vadd.f32 %v1873_v5, %v769_v15  ;;  %v874_v27 = vmul.f32 %v1875_v17, %v873_v8  ;;  %1880 = vpow2.f32 %v1717_v58 }
  0x6d   : > { %v1877_v44 = vpop.eup %1876  ;;  %v1730_v16 = vmul.f32 -1.442695, %v2614_v45  ;;  %v411_v10 = vmul.f32 %v2030_v2, %v375_v38  ;;  %1882 = vpow2.f32 %v1724_v34  ;;  %v2635_v20 = vadd.f32 %v2049_v3, %v404_v29 }
  0x6e   : > { %v1106_v18 = vmul.f32 %v2214_v61, %v1072_v36  ;;  %v774_v25 = vsel %vm2608_vm6, %v1873_v5, %v770_v42  ;;  %v875_v31 = vadd.f32 %v1875_v17, %v874_v27  ;;  %v962_v39 = vmul.f32 %v1877_v44, %v2560_v52  ;;  %v369_v42 = vld [vmem:[%s2039_s15 + $0x78] sm:$0xff] }
  0x6f   : > { %v779_v41 = vsel %vm2564_vm11, %v778_v56, %v774_v25  ;;  %vm967_vm2 = vweird.f32 %v1877_v44  ;;  %1884 = vpow2.f32 %v1730_v16  ;;  %vm2643_vm10 = vcmp.eq.f32.partialorder %v970_v9, 8.507059e+37 }
  0x70   : > { %1742 = vmatmul.msk.f32.gmra.mxu0 %vm3369_vm4, %v1106_v18  ;;  %v1078_v19 = vmul.f32 %v779_v41, %v2398_v57  ;;  %v879_v26 = vsel %vm2620_vm1, %v1875_v17, %v875_v31  ;;  %v963_v33 = vsub.f32 1.0, %v962_v39  ;;  %v1718_v28 = vmul.f32 -1.442695, %v2635_v20  ;;  %vm2656_vm3 = vmor %vm966_vm15, %vm967_vm2  ;;  %v2722_v39 = vld [vmem:[%s3295_s1] ss:$0 sm:$0xff] }
  0x71   : > { %v1879_v46 = vpop.eup %1878  ;;  %v884_v23 = vsel %vm2576_vm12, %v883_v21, %v879_v26  ;;  %v973_v48 = vor.u32 1.1754944e-38, %v972_v62  ;;  %v2663_v59 = vadd.f32 %v2049_v3, %v411_v10  ;;  %v417_v52 = vmul.f32 %v2030_v2, %v381_v54  ;;  %v376_v10 = vld [vmem:[%s2039_s15 + $0xb0] sm:$0xff] }
  0x72   : > { %v1881_v55 = vpop.eup %1880  ;;  %v1112_v49 = vmul.f32 %v2214_v61, %v1078_v19  ;;  %v1085_v57 = vmul.f32 %v884_v23, %v2401_v60  ;;  %v964_v50 = vmul.f32 %v1877_v44, %v963_v33  ;;  %v2651_v53 = vadd.f32 1.0, %v1879_v46 }
  0x73   : > { %v2660_v56 = vadd.f32 1.0, %v1881_v55  ;;  %1886 = vpow2.f32 %v1718_v28  ;;  %v1883_v40 = vpop.eup %1882  ;;  %v1725_v1 = vmul.f32 -1.442695, %v2663_v59  ;;  %v2688_v7 = vadd.f32 %v2049_v3, %v417_v52 }
  0x74   : > { %1748 = vmatmul.msk.f32.gmra.mxu1 %vm3388_vm5, %v1112_v49  ;;  %v1119_v60 = vmul.f32 %v2214_v61, %v1085_v57  ;;  %v965_v37 = vadd.f32 %v1877_v44, %v964_v50  ;;  %1888 = vrcp.f32 %v2651_v53  ;;  %v700_v30 = vand.u32 2147483647, %v2651_v53 }
  0x75   : > { %1890 = vrcp.f32 %v2660_v56  ;;  %v1885_v11 = vpop.eup %1884  ;;  %v702_v6 = vand.u32 2147483648, %v2651_v53  ;;  %v790_v21 = vand.u32 2147483647, %v2660_v56  ;;  %v2676_v0 = vadd.f32 1.0, %v1883_v40 }
  0x76   : > { %1755 = vmatmul.msk.f32.gmra.mxu2 %vm3389_vm7, %v1119_v60  ;;  %v969_v17 = vsel %vm2656_vm3, %v1877_v44, %v965_v37  ;;  %v792_v51 = vand.u32 2147483648, %v2660_v56  ;;  %v2681_v22 = vadd.f32 1.0, %v1885_v11  ;;  %vm696_vm8 = vweird.f32 %v2651_v53 }
  0x77   : > { %v974_v2 = vsel %vm2643_vm10, %v973_v48, %v969_v17  ;;  %1892 = vrcp.f32 %v2676_v0  ;;  %vm786_vm11 = vweird.f32 %v2660_v56  ;;  %v895_v24 = vand.u32 2147483647, %v2676_v0  ;;  %v2750_v48 = vld [vmem:[%s3296_s2] ss:$0 sm:$0xff] }
  0x78   : > { %v1091_v9 = vmul.f32 %v974_v2, %v2442_v35  ;;  %v897_v15 = vand.u32 2147483648, %v2676_v0  ;;  %1894 = vrcp.f32 %v2681_v22  ;;  %vm2695_vm12 = vcmp.eq.f32.partialorder %v700_v30, 8.507059e+37 }
  0x79   : > { %v1887_v58 = vpop.eup %1886  ;;  %v703_v38 = vor.u32 1.1754944e-38, %v702_v6  ;;  %vm2699_vm9 = vcmp.eq.f32.partialorder %v790_v21, 8.507059e+37  ;;  %v793_v62 = vor.u32 1.1754944e-38, %v792_v51  ;;  %vm891_vm13 = vweird.f32 %v2676_v0 }
  0x7a   : > { %v1889_v8 = vpop.eup %1888  ;;  %v1125_v35 = vmul.f32 %v2214_v61, %v1091_v9  ;;  %v985_v36 = vand.u32 2147483647, %v2681_v22  ;;  %vm981_vm0 = vweird.f32 %v2681_v22  ;;  %v987_v44 = vand.u32 2147483648, %v2681_v22 }
  0x7b   : > { %v1891_v14 = vpop.eup %1890  ;;  %v692_v12 = vmul.f32 %v1889_v8, %v2651_v53  ;;  %vm697_vm15 = vweird.f32 %v1889_v8  ;;  %vm2711_vm6 = vcmp.eq.f32.partialorder %v895_v24, 8.507059e+37  ;;  %v898_v16 = vor.u32 1.1754944e-38, %v897_v15 }
  0x7c   : > { %1761 = vmatmul.msk.f32.gmra.mxu3 %vm3394_vm14, %v1125_v35  ;;  %v782_v27 = vmul.f32 %v1891_v14, %v2660_v56  ;;  %v2715_v29 = vadd.f32 1.0, %v1887_v58  ;;  %1896 = vpow2.f32 %v1725_v1  ;;  %vm787_vm1 = vweird.f32 %v1891_v14  ;;  %vm2734_vm4 = vmor %vm696_vm8, %vm697_vm15  ;;  %v382_v35 = vld [vmem:[%s2039_s15 + $0xe0] sm:$0xff] }
  0x7d   : > { %v693_v13 = vsub.f32 1.0, %v692_v12  ;;  %v1893_v18 = vpop.eup %1892  ;;  %v1731_v31 = vmul.f32 -1.442695, %v2688_v7  ;;  %v405_v41 = vmul.f32 %v2722_v39, %v369_v42  ;;  %vm2726_vm2 = vcmp.eq.f32.partialorder %v985_v36, 8.507059e+37  ;;  %vm2743_vm10 = vmor %vm786_vm11, %vm787_vm1 }
  0x7e   : > { %v783_v25 = vsub.f32 1.0, %v782_v27  ;;  %v1895_v19 = vpop.eup %1894  ;;  %v887_v33 = vmul.f32 %v1893_v18, %v2676_v0  ;;  %1898 = vrcp.f32 %v2715_v29  ;;  %v988_v54 = vor.u32 1.1754944e-38, %v987_v44 }
  0x7f   : > { %v694_v26 = vmul.f32 %v1889_v8, %v693_v13  ;;  %v977_v28 = vmul.f32 %v1895_v19, %v2681_v22  ;;  %v412_v55 = vmul.f32 %v2722_v39, %v376_v10  ;;  %vm892_vm3 = vweird.f32 %v1893_v18 }
  0x80   : > { %v784_v47 = vmul.f32 %v1891_v14, %v783_v25  ;;  %v888_v50 = vsub.f32 1.0, %v887_v33  ;;  %vm982_vm5 = vweird.f32 %v1895_v19  ;;  %1900 = vpow2.f32 %v1731_v31  ;;  %vm2765_vm8 = vmor %vm891_vm13, %vm892_vm3 }
  0x81   : > { %v695_v49 = vadd.f32 %v1889_v8, %v694_v26  ;;  %v978_v5 = vsub.f32 1.0, %v977_v28  ;;  %v2753_v60 = vadd.f32 %v2750_v48, %v405_v41  ;;  %vm801_vm7 = vweird.f32 %v2715_v29  ;;  %vm2777_vm11 = vmor %vm981_vm0, %vm982_vm5  ;;  %v384_v28 = vld [vmem:[%s2039_s15 + $0xf0] sm:$0xff] }
  0x82   : > { %v785_v53 = vadd.f32 %v1891_v14, %v784_v47  ;;  %v1897_v37 = vpop.eup %1896  ;;  %v889_v52 = vmul.f32 %v1893_v18, %v888_v50  ;;  %v805_v40 = vand.u32 2147483647, %v2715_v29  ;;  %v807_v0 = vand.u32 2147483648, %v2715_v29  ;;  %v383_v47 = vld [vmem:[%s2039_s15 + $0xe8] sm:$0xff] }
  0x83   : > { %v699_v56 = vsel %vm2734_vm4, %v1889_v8, %v695_v49  ;;  %v979_v6 = vmul.f32 %v1895_v19, %v978_v5  ;;  %v2769_v21 = vadd.f32 1.0, %v1897_v37  ;;  %v418_v42 = vmul.f32 %v2722_v39, %v382_v35 }
  0x84   : > { %v704_v30 = vsel %vm2695_vm12, %v703_v38, %v699_v56  ;;  %v789_v11 = vsel %vm2743_vm10, %v1891_v14, %v785_v53  ;;  %v1899_v2 = vpop.eup %1898  ;;  %v890_v9 = vadd.f32 %v1893_v18, %v889_v52  ;;  %vm806_vm15 = vcmp.eq.f32.partialorder %v805_v40, 8.507059e+37 }
  0x85   : > { %v1073_v51 = vmul.f32 %v704_v30, %v2569_v63  ;;  %v794_v1 = vsel %vm2699_vm9, %v793_v62, %v789_v11  ;;  %v980_v15 = vadd.f32 %v1895_v19, %v979_v6  ;;  %v797_v8 = vmul.f32 %v1899_v2, %v2715_v29  ;;  %vm3407_vm9 = vmmov %vm3394_vm14  ;;  %v385_v30 = vld [vmem:[%s2039_s15 + $0xf8] sm:$0xff] }
  0x86   : > { %v1079_v24 = vmul.f32 %v794_v1, %v2572_v4  ;;  %v1719_v63 = vmul.f32 -1.442695, %v2753_v60  ;;  %v894_v38 = vsel %vm2765_vm8, %v1893_v18, %v890_v9  ;;  %vm802_vm12 = vweird.f32 %v1899_v2  ;;  %v1901_v22 = vpop.eup %1900  ;;  %vm3408_vm13 = vmmov %vm3407_vm9 }
  0x87   : > { %v1107_v43 = vmul.f32 %v2214_v61, %v1073_v51  ;;  %1902 = vrcp.f32 %v2769_v21  ;;  %v899_v4 = vsel %vm2711_vm6, %v898_v16, %v894_v38  ;;  %v984_v14 = vsel %vm2777_vm11, %v1895_v19, %v980_v15  ;;  %vm2808_vm14 = vmor %vm801_vm7, %vm802_vm12 }
  0x88   : > { %v1113_v3 = vmul.f32 %v2214_v61, %v1079_v24  ;;  %v798_v12 = vsub.f32 1.0, %v797_v8  ;;  %v1086_v62 = vmul.f32 %v899_v4, %v2599_v32  ;;  %v989_v36 = vsel %vm2726_vm2, %v988_v54, %v984_v14  ;;  %vm3411_vm0 = vmmov %vm3407_vm9 }
  0x89   : > { %1743 = vmatmul.msk.f32.gmra.mxu0 %vm3407_vm9, %v1107_v43  ;;  %v1092_v27 = vmul.f32 %v989_v36, %v2614_v45  ;;  %v2802_v13 = vadd.f32 1.0, %v1901_v22  ;;  %1904 = vpow2.f32 %v1719_v63  ;;  %v808_v16 = vor.u32 1.1754944e-38, %v807_v0  ;;  %v377_v45 = vld [vmem:[%s2039_s15 + $0xb8] sm:$0xff]  ;;  %vm3412_vm6 = vmmov %vm3411_vm0 }
  0x8a   : > { %1749 = vmatmul.msk.f32.gmra.mxu1 %vm3408_vm13, %v1113_v3  ;;  %v799_v44 = vmul.f32 %v1899_v2, %v798_v12  ;;  %v1120_v34 = vmul.f32 %v2214_v61, %v1086_v62  ;;  %v910_v10 = vand.u32 2147483647, %v2769_v21  ;;  %v2814_v18 = vadd.f32 %v2750_v48, %v412_v55  ;;  %vm3417_vm5 = vmmov %vm3411_vm0 }
  0x8b   : > { %v1126_v25 = vmul.f32 %v2214_v61, %v1092_v27  ;;  %1906 = vrcp.f32 %v2802_v13  ;;  %v912_v41 = vand.u32 2147483648, %v2769_v21  ;;  %v2823_v26 = vadd.f32 %v2750_v48, %v418_v42  ;;  %vm3422_vm12 = vmmov %vm3411_vm0 }
  0x8c   : > { %v800_v31 = vadd.f32 %v1899_v2, %v799_v44  ;;  %1756 = vmatmul.msk.f32.gmra.mxu2 %vm3411_vm0, %v1120_v34  ;;  %v1726_v19 = vmul.f32 -1.442695, %v2814_v18  ;;  %vm906_vm1 = vweird.f32 %v2769_v21  ;;  %v413_v23 = vmul.f32 %v2722_v39, %v377_v45  ;;  %v2895_v44 = vld [vmem:[%s2044_s18] ss:$0 sm:$0xff] }
  0x8d   : > { %v1903_v29 = vpop.eup %1902  ;;  %1762 = vmatmul.msk.f32.gmra.mxu3 %vm3412_vm6, %v1126_v25  ;;  %vm2833_vm4 = vcmp.eq.f32.partialorder %v910_v10, 8.507059e+37  ;;  %v1732_v53 = vmul.f32 -1.442695, %v2823_v26  ;;  %v913_v37 = vor.u32 1.1754944e-38, %v912_v41  ;;  %v419_v52 = vmul.f32 %v2722_v39, %v383_v47  ;;  %vm3427_vm6 = vmmov %vm3417_vm5 }
  0x8e   : > { %v804_v33 = vsel %vm2808_vm14, %v1899_v2, %v800_v31  ;;  %v902_v46 = vmul.f32 %v1903_v29, %v2769_v21  ;;  %vm907_vm2 = vweird.f32 %v1903_v29  ;;  %1908 = vpow2.f32 %v1726_v19 }
  0x8f   : > { %v809_v54 = vsel %vm806_vm15, %v808_v16, %v804_v33  ;;  %v1905_v49 = vpop.eup %1904  ;;  %v2840_v5 = vadd.f32 %v2750_v48, %v413_v23  ;;  %v420_v40 = vmul.f32 %v2722_v39, %v384_v28  ;;  %1910 = vpow2.f32 %v1732_v53  ;;  %vm2852_vm10 = vmor %vm906_vm1, %vm907_vm2 }
  0x90   : > { %v1080_v57 = vmul.f32 %v809_v54, %v2635_v20  ;;  %v903_v50 = vsub.f32 1.0, %v902_v46  ;;  %v2842_v56 = vadd.f32 1.0, %v1905_v49  ;;  %vm996_vm3 = vweird.f32 %v2802_v13 }
  0x91   : > { %v1907_v11 = vpop.eup %1906  ;;  %v1727_v20 = vmul.f32 -1.442695, %v2840_v5  ;;  %v1000_v1 = vand.u32 2147483647, %v2802_v13  ;;  %v1002_v9 = vand.u32 2147483648, %v2802_v13  ;;  %v421_v21 = vmul.f32 %v2722_v39, %v385_v30 }
  0x92   : > { %v1114_v17 = vmul.f32 %v2214_v61, %v1080_v57  ;;  %v904_v6 = vmul.f32 %v1903_v29, %v903_v50  ;;  %v992_v51 = vmul.f32 %v1907_v11, %v2802_v13  ;;  %1912 = vrcp.f32 %v2842_v56 }
  0x93   : > { %1914 = vpow2.f32 %v1727_v20  ;;  %vm997_vm7 = vweird.f32 %v1907_v11  ;;  %v2864_v24 = vadd.f32 %v2750_v48, %v419_v52  ;;  %v2867_v15 = vadd.f32 %v2750_v48, %v420_v40 }
  0x94   : > { %1750 = vmatmul.msk.f32.gmra.mxu1 %vm3417_vm5, %v1114_v17  ;;  %v905_v61 = vadd.f32 %v1903_v29, %v904_v6  ;;  %v1909_v58 = vpop.eup %1908  ;;  %v993_v0 = vsub.f32 1.0, %v992_v51  ;;  %vm2875_vm8 = vcmp.eq.f32.partialorder %v1000_v1, 8.507059e+37  ;;  %vm2883_vm11 = vmor %vm996_vm3, %vm997_vm7  ;;  %v1003_v14 = vor.u32 1.1754944e-38, %v1002_v9 }
  0x95   : > { %v2871_v63 = vadd.f32 1.0, %v1909_v58  ;;  %v1733_v38 = vmul.f32 -1.442695, %v2864_v24  ;;  %v1911_v22 = vpop.eup %1910  ;;  %v2889_v12 = vadd.f32 %v2750_v48, %v421_v21  ;;  %v1734_v27 = vmul.f32 -1.442695, %v2867_v15 }
  0x96   : > { %v909_v8 = vsel %vm2852_vm10, %v1903_v29, %v905_v61  ;;  %v994_v43 = vmul.f32 %v1907_v11, %v993_v0  ;;  %v2891_v42 = vadd.f32 1.0, %v1911_v22  ;;  %v820_v32 = vand.u32 2147483647, %v2842_v56 }
  0x97   : > { %v914_v35 = vsel %vm2833_vm4, %v913_v37, %v909_v8  ;;  %1916 = vrcp.f32 %v2871_v63  ;;  %v822_v16 = vand.u32 2147483648, %v2842_v56  ;;  %vm816_vm9 = vweird.f32 %v2842_v56 }
  0x98   : > { %v1087_v3 = vmul.f32 %v914_v35, %v2663_v59  ;;  %v1913_v62 = vpop.eup %1912  ;;  %v995_v36 = vadd.f32 %v1907_v11, %v994_v43  ;;  %1918 = vpow2.f32 %v1733_v38  ;;  %v1735_v29 = vmul.f32 -1.442695, %v2889_v12 }
  0x99   : > { %v1915_v59 = vpop.eup %1914  ;;  %v812_v34 = vmul.f32 %v1913_v62, %v2842_v56  ;;  %1920 = vrcp.f32 %v2891_v42  ;;  %vm817_vm13 = vweird.f32 %v1913_v62  ;;  %vm2912_vm14 = vcmp.eq.f32.partialorder %v820_v32, 8.507059e+37 }
  0x9a   : > { %v1121_v13 = vmul.f32 %v2895_v44, %v1087_v3  ;;  %v999_v48 = vsel %vm2883_vm11, %v1907_v11, %v995_v36  ;;  %v2909_v31 = vadd.f32 1.0, %v1915_v59  ;;  %1922 = vpow2.f32 %v1734_v27  ;;  %vm2919_vm15 = vmor %vm816_vm9, %vm817_vm13 }
  0x9b   : > { %v1004_v10 = vsel %vm2875_vm8, %v1003_v14, %v999_v48  ;;  %v813_v45 = vsub.f32 1.0, %v812_v34  ;;  %v925_v46 = vand.u32 2147483647, %v2871_v63  ;;  %v927_v23 = vand.u32 2147483648, %v2871_v63 }
  0x9c   : > { %1757 = vmatmul.msk.f32.gmra.mxu2 %vm3422_vm12, %v1121_v13  ;;  %v1093_v25 = vmul.f32 %v1004_v10, %v2688_v7  ;;  %v823_v54 = vor.u32 1.1754944e-38, %v822_v16  ;;  %1924 = vrcp.f32 %v2909_v31  ;;  %vm921_vm0 = vweird.f32 %v2871_v63  ;;  %vm3438_vm12 = vmmov %vm3427_vm6 }
  0x9d   : > { %v1917_v41 = vpop.eup %1916  ;;  %v814_v19 = vmul.f32 %v1913_v62, %v813_v45  ;;  %v1015_v57 = vand.u32 2147483647, %v2891_v42  ;;  %v1017_v50 = vand.u32 2147483648, %v2891_v42  ;;  %1926 = vpow2.f32 %v1735_v29 }
  0x9e   : > { %v1919_v47 = vpop.eup %1918  ;;  %v1127_v28 = vmul.f32 %v2895_v44, %v1093_v25  ;;  %v917_v55 = vmul.f32 %v1917_v41, %v2871_v63  ;;  %vm922_vm1 = vweird.f32 %v1917_v41  ;;  %vm2933_vm2 = vcmp.eq.f32.partialorder %v925_v46, 8.507059e+37 }
  0x9f   : > { %v815_v49 = vadd.f32 %v1913_v62, %v814_v19  ;;  %v1921_v53 = vpop.eup %1920  ;;  %v2929_v56 = vadd.f32 1.0, %v1919_v47  ;;  %v928_v30 = vor.u32 1.1754944e-38, %v927_v23  ;;  %v940_v2 = vand.u32 2147483647, %v2909_v31  ;;  %vm2945_vm4 = vmor %vm921_vm0, %vm922_vm1 }
  0xa0   : > { %1763 = vmatmul.msk.f32.gmra.mxu3 %vm3427_vm6, %v1127_v28  ;;  %v918_v37 = vsub.f32 1.0, %v917_v55  ;;  %v1007_v11 = vmul.f32 %v1921_v53, %v2891_v42  ;;  %v1923_v17 = vpop.eup %1922  ;;  %vm1011_vm10 = vweird.f32 %v2891_v42  ;;  %vm1012_vm3 = vweird.f32 %v1921_v53  ;;  %vm3441_vm0 = vmmov %vm3427_vm6 }
  0xa1   : > { %v819_v52 = vsel %vm2919_vm15, %v1913_v62, %v815_v49  ;;  %1928 = vrcp.f32 %v2929_v56  ;;  %vm2950_vm5 = vcmp.eq.f32.partialorder %v1015_v57, 8.507059e+37  ;;  %v1018_v0 = vor.u32 1.1754944e-38, %v1017_v50  ;;  %vm2961_vm7 = vmor %vm1011_vm10, %vm1012_vm3  ;;  %v3017_v49 = vld [vmem:[%s3299_s5] ss:$0 sm:$0xff] }
  0xa2   : > { %v824_v6 = vsel %vm2912_vm14, %v823_v54, %v819_v52  ;;  %v919_v20 = vmul.f32 %v1917_v41, %v918_v37  ;;  %v1008_v61 = vsub.f32 1.0, %v1007_v11  ;;  %v1925_v9 = vpop.eup %1924  ;;  %v2954_v8 = vadd.f32 1.0, %v1923_v17 }
  0xa3   : > { %v1081_v51 = vmul.f32 %v824_v6, %v2753_v60  ;;  %v932_v35 = vmul.f32 %v1925_v9, %v2909_v31  ;;  %v942_v43 = vand.u32 2147483648, %v2909_v31  ;;  %v1927_v39 = vpop.eup %1926  ;;  %vm936_vm8 = vweird.f32 %v2909_v31 }
  0xa4   : > { %v920_v21 = vadd.f32 %v1917_v41, %v919_v20  ;;  %v1009_v63 = vmul.f32 %v1921_v53, %v1008_v61  ;;  %vm2966_vm11 = vcmp.eq.f32.partialorder %v940_v2, 8.507059e+37  ;;  %1930 = vrcp.f32 %v2954_v8 }
  0xa5   : > { %v1115_v60 = vmul.f32 %v2895_v44, %v1081_v51  ;;  %v933_v62 = vsub.f32 1.0, %v932_v35  ;;  %vm937_vm9 = vweird.f32 %v1925_v9  ;;  %v1030_v27 = vand.u32 2147483647, %v2929_v56 }
  0xa6   : > { %v924_v38 = vsel %vm2945_vm4, %v1917_v41, %v920_v21  ;;  %v1010_v14 = vadd.f32 %v1921_v53, %v1009_v63  ;;  %v1032_v59 = vand.u32 2147483648, %v2929_v56  ;;  %v2977_v13 = vadd.f32 1.0, %v1927_v39  ;;  %vm2987_vm13 = vmor %vm936_vm8, %vm937_vm9 }
  0xa7   : > { %1751 = vmatmul.msk.f32.gmra.mxu1 %vm3438_vm12, %v1115_v60  ;;  %v929_v4 = vsel %vm2933_vm2, %v928_v30, %v924_v38  ;;  %v1929_v36 = vpop.eup %1928  ;;  %v934_v32 = vmul.f32 %v1925_v9, %v933_v62  ;;  %v943_v48 = vor.u32 1.1754944e-38, %v942_v43  ;;  %vm1026_vm14 = vweird.f32 %v2929_v56  ;;  %vm3446_vm4 = vmmov %vm3441_vm0 }
  0xa8   : > { %v1088_v42 = vmul.f32 %v929_v4, %v2814_v18  ;;  %v1014_v34 = vsel %vm2961_vm7, %v1921_v53, %v1010_v14  ;;  %v1022_v16 = vmul.f32 %v1929_v36, %v2929_v56  ;;  %vm1027_vm15 = vweird.f32 %v1929_v36  ;;  %vm3449_vm7 = vmmov %vm3441_vm0 }
  0xa9   : > { %v1019_v45 = vsel %vm2950_vm5, %v1018_v0, %v1014_v34  ;;  %v935_v29 = vadd.f32 %v1925_v9, %v934_v32  ;;  %1932 = vrcp.f32 %v2977_v13  ;;  %vm2995_vm6 = vcmp.eq.f32.partialorder %v1030_v27, 8.507059e+37  ;;  %vm3007_vm1 = vmor %vm1026_vm14, %vm1027_vm15 }
  0xaa   : > { %v1122_v10 = vmul.f32 %v2895_v44, %v1088_v42  ;;  %v1094_v25 = vmul.f32 %v1019_v45, %v2823_v26  ;;  %v1023_v41 = vsub.f32 1.0, %v1022_v16  ;;  %v1931_v19 = vpop.eup %1930  ;;  %v1033_v31 = vor.u32 1.1754944e-38, %v1032_v59  ;;  %vm3450_vm12 = vmmov %vm3441_vm0 }
  0xab   : > { %v939_v23 = vsel %vm2987_vm13, %v1925_v9, %v935_v29  ;;  %v1037_v26 = vmul.f32 %v1931_v19, %v2954_v8  ;;  %vm1041_vm2 = vweird.f32 %v2954_v8  ;;  %v1045_v54 = vand.u32 2147483647, %v2954_v8  ;;  %vm3451_vm9 = vmmov %vm3441_vm0 }
  0xac   : > { %1758 = vmatmul.msk.f32.gmra.mxu2 %vm3441_vm0, %v1122_v10  ;;  %v1128_v46 = vmul.f32 %v2895_v44, %v1094_v25  ;;  %v1024_v47 = vmul.f32 %v1929_v36, %v1023_v41  ;;  %v944_v28 = vsel %vm2966_vm11, %v943_v48, %v939_v23  ;;  %v1047_v55 = vand.u32 2147483648, %v2954_v8  ;;  %vm3452_vm15 = vmmov %vm3441_vm0 }
  0xad   : > { %v1089_v57 = vmul.f32 %v944_v28, %v2840_v5  ;;  %v1038_v53 = vsub.f32 1.0, %v1037_v26  ;;  %vm1042_vm10 = vweird.f32 %v1931_v19  ;;  %vm1046_vm5 = vcmp.eq.f32.partialorder %v1045_v54, 8.507059e+37 }
  0xae   : > { %1764 = vmatmul.msk.f32.gmra.mxu3 %vm3446_vm4, %v1128_v46  ;;  %v1025_v50 = vadd.f32 %v1929_v36, %v1024_v47  ;;  %vm3035_vm3 = vmor %vm1041_vm2, %vm1042_vm10  ;;  %v1048_v17 = vor.u32 1.1754944e-38, %v1047_v55  ;;  %vm1056_vm8 = vweird.f32 %v2977_v13  ;;  %v1062_v61 = vand.u32 2147483648, %v2977_v13 }
  0xaf   : > { %v1933_v37 = vpop.eup %1932  ;;  %v1123_v56 = vmul.f32 %v2895_v44, %v1089_v57  ;;  %v1039_v40 = vmul.f32 %v1931_v19, %v1038_v53  ;;  %vm3455_vm2 = vmmov %vm3441_vm0 }
  0xb0   : > { %v1029_v52 = vsel %vm3007_vm1, %v1929_v36, %v1025_v50  ;;  %v1052_v6 = vmul.f32 %v1933_v37, %v2977_v13  ;;  %vm1057_vm11 = vweird.f32 %v1933_v37  ;;  %v1063_v43 = vor.u32 1.1754944e-38, %v1062_v61  ;;  %vm3454_vm1 = vmmov %vm3441_vm0 }
  0xb1   : > { %v1252_v30 = vpop.f32.mrf.mxu0  ;;  %v1034_v5 = vsel %vm2995_vm6, %v1033_v31, %v1029_v52  ;;  %v1040_v51 = vadd.f32 %v1931_v19, %v1039_v40  ;;  %vm1058_vm13 = vmor %vm1056_vm8, %vm1057_vm11 }
  0xb2   : > { %v1253_v20 = vadd.f32 %v3017_v49, %v1252_v30  ;;  %v1095_v2 = vmul.f32 %v1034_v5, %v2864_v24  ;;  %v1053_v1 = vsub.f32 1.0, %v1052_v6  ;;  %v1060_v24 = vand.u32 2147483647, %v2977_v13  ;;  %vm3453_vm6 = vmmov %vm3441_vm0 }
  0xb3   : > { %v1044_v21 = vsel %vm3035_vm3, %v1931_v19, %v1040_v51  ;;  %vm3456_vm4 = vmmov %vm3441_vm0 }
  0xb4   : > { %1759 = vmatmul.msk.f32.gmra.mxu2 %vm3449_vm7, %v1123_v56  ;;  %1348 = vst.msk [vmem:[%s3029_s10] sm:$0xff] %vm3450_vm12, %v1253_v20  ;;  %v1129_v9 = vmul.f32 %v2895_v44, %v1095_v2  ;;  %v1049_v58 = vsel %vm1046_vm5, %v1048_v17, %v1044_v21  ;;  %v1054_v0 = vmul.f32 %v1933_v37, %v1053_v1  ;;  %vm1061_vm14 = vcmp.eq.f32.partialorder %v1060_v24, 8.507059e+37  ;;  %vm3457_vm10 = vmmov %vm3441_vm0 }
  0xb5   : > { %v1096_v60 = vmul.f32 %v1049_v58, %v2867_v15  ;;  %v1451_v22 = vmul.f32 %v1253_v20, %v1253_v20  ;;  %v1380_v15 = vsel %vm3441_vm0, %v1253_v20, 0.0  ;;  %vm3458_vm3 = vmmov %vm3441_vm0 }
  0xb6   : > { %v1276_v8 = vpop.f32.mrf.mxu1  ;;  %1765 = vmatmul.msk.f32.gmra.mxu3 %vm3451_vm9, %v1129_v9  ;;  %v1055_v35 = vadd.f32 %v1933_v37, %v1054_v0  ;;  %vm3459_vm5 = vmmov %vm3441_vm0 }
  0xb7   : > { %v3054_v63 = vadd.f32 %v3017_v49, %v1276_v8  ;;  %v1130_v4 = vmul.f32 %v2895_v44, %v1096_v60  ;;  %v1483_v27 = vsel %vm3455_vm2, %v1451_v22, 0.0  ;;  %vm3460_vm7 = vmmov %vm3441_vm0 }
  0xb8   : > { %v1059_v38 = vsel %vm1058_vm13, %v1933_v37, %v1055_v35  ;;  %vm3461_vm8 = vmmov %vm3441_vm0 }
  0xb9   : > { %v1255_v39 = vpop.f32.mrf.mxu0  ;;  %1356 = vst.msk [vmem:[%s3029_s10 + $0x40] sm:$0xff] %vm3452_vm15, %v3054_v63  ;;  %v1064_v14 = vsel %vm1061_vm14, %v1063_v43, %v1059_v38  ;;  %vm3462_vm11 = vmmov %vm3441_vm0 }
  0xba   : > { %v1256_v3 = vadd.f32 %v3017_v49, %v1255_v39  ;;  %v1097_v34 = vmul.f32 %v1064_v14, %v2889_v12  ;;  %vm3463_vm12 = vmmov %vm3441_vm0 }
  0xbb   : > { %vm3464_vm9 = vmmov %vm3441_vm0 }
  0xbc   : > { %1349 = vst.msk [vmem:[%s3029_s10 + $0x8] sm:$0xff] %vm3453_vm6, %v1256_v3  ;;  %v1381_v62 = vsel %vm3454_vm1, %v1256_v3, 0.0  ;;  %v1452_v36 = vmul.f32 %v1256_v3, %v1256_v3  ;;  %v1131_v45 = vmul.f32 %v2895_v44, %v1097_v34  ;;  %vm3465_vm13 = vmmov %vm3441_vm0 }
  0xbd   : > { %v1382_v42 = vadd.f32 %v1381_v62, %v1380_v15  ;;  %vm3466_vm14 = vmmov %vm3441_vm0 }
  0xbe   : > { %v1484_v59 = vsel %vm3456_vm4, %v1452_v36, 0.0  ;;  %v1279_v13 = vpop.f32.mrf.mxu1  ;;  %1766 = vmatmul.msk.f32.gmra.mxu3 %vm3457_vm10, %v1130_v4  ;;  %vm3467_vm15 = vmmov %vm3441_vm0 }
  0xbf   : > { %v1485_v32 = vadd.f32 %v1484_v59, %v1483_v27  ;;  %v3070_v48 = vadd.f32 %v3017_v49, %v1279_v13  ;;  %vm3468_vm6 = vmmov %vm3441_vm0  ;;  %v1459_v59 = vmul.f32 %v3054_v63, %v3054_v63 }
  0xc0   : > { %vm3469_vm1 = vmmov %vm3441_vm0 }
  0xc1   : > { %v1258_v16 = vpop.f32.mrf.mxu0  ;;  %1357 = vst.msk [vmem:[%s3029_s10 + $0x48] sm:$0xff] %vm3458_vm3, %v3070_v48  ;;  %vm3470_vm2 = vmmov %vm3441_vm0 }
  0xc2   : > { %v1259_v10 = vadd.f32 %v3017_v49, %v1258_v16  ;;  %vm3471_vm4 = vmmov %vm3441_vm0 }
  0xc3   : > { %vm3472_vm10 = vmmov %vm3441_vm0 }
  0xc4   : > { %1350 = vst.msk [vmem:[%s3029_s10 + $0x10] sm:$0xff] %vm3459_vm5, %v1259_v10  ;;  %v1383_v18 = vsel %vm3460_vm7, %v1259_v10, 0.0  ;;  %v1453_v25 = vmul.f32 %v1259_v10, %v1259_v10  ;;  %vm3473_vm3 = vmmov %vm3441_vm0 }
  0xc5   : > { %v1384_v12 = vadd.f32 %v1383_v18, %v1382_v42  ;;  %vm3474_vm5 = vmmov %vm3441_vm0 }
  0xc6   : > { %v1486_v29 = vsel %vm3461_vm8, %v1453_v25, 0.0  ;;  %1767 = vmatmul.msk.f32.gmra.mxu3 %vm3462_vm11, %v1131_v45  ;;  %vm3475_vm7 = vmmov %vm3441_vm0  ;;  %v1460_v45 = vmul.f32 %v3070_v48, %v3070_v48 }
  0xc7   : > { %v1487_v41 = vadd.f32 %v1486_v29, %v1485_v32  ;;  %vm3476_vm8 = vmmov %vm3441_vm0 }
  0xc8   : > { %vm3477_vm11 = vmmov %vm3441_vm0 }
  0xc9   : > { %v1261_v19 = vpop.f32.mrf.mxu0 }
  0xca   : > { %v1262_v33 = vadd.f32 %v3017_v49, %v1261_v19  ;;  %v1300_v31 = vpop.f32.mrf.mxu2 }
  0xcb   : > { %v3084_v44 = vadd.f32 %v3017_v49, %v1300_v31 }
  0xcc   : > { %1351 = vst.msk [vmem:[%s3029_s10 + $0x18] sm:$0xff] %vm3463_vm12, %v1262_v33  ;;  %v1385_v46 = vsel %vm3464_vm9, %v1262_v33, 0.0  ;;  %v1454_v23 = vmul.f32 %v1262_v33, %v1262_v33  ;;  %v1282_v47 = vpop.f32.mrf.mxu1  ;;  %vm3478_vm12 = vmmov %vm3441_vm0 }
  0xcd   : > { %v1386_v26 = vadd.f32 %v1385_v46, %v1384_v12  ;;  %v3090_v28 = vadd.f32 %v3017_v49, %v1282_v47  ;;  %1364 = vst.msk [vmem:[%s3029_s10 + $0x80] sm:$0xff] %vm3465_vm13, %v3084_v44  ;;  %vm3479_vm9 = vmmov %vm3441_vm0 }
  0xce   : > { %v1488_v7 = vsel %vm3466_vm14, %v1454_v23, 0.0  ;;  %vm3480_vm13 = vmmov %vm3441_vm0 }
  0xcf   : > { %v1489_v54 = vadd.f32 %v1488_v7, %v1487_v41  ;;  %1358 = vst.msk [vmem:[%s3029_s10 + $0x50] sm:$0xff] %vm3467_vm15, %v3090_v28  ;;  %vm3481_vm14 = vmmov %vm3441_vm0  ;;  %v1461_v19 = vmul.f32 %v3090_v28, %v3090_v28 }
  0xd0   : > { %vm3482_vm15 = vmmov %vm3441_vm0 }
  0xd1   : > { %v1264_v55 = vpop.f32.mrf.mxu0 }
  0xd2   : > { %v1265_v57 = vadd.f32 %v3017_v49, %v1264_v55 }
  0xd4   : > { %1352 = vst.msk [vmem:[%s3029_s10 + $0x20] sm:$0xff] %vm3441_vm0, %v1265_v57  ;;  %v1387_v50 = vsel %vm3468_vm6, %v1265_v57, 0.0  ;;  %v1455_v53 = vmul.f32 %v1265_v57, %v1265_v57  ;;  %vm3483_vm6 = vmmov %vm3441_vm0 }
  0xd5   : > { %v1388_v37 = vadd.f32 %v1387_v50, %v1386_v26 }
  0xd6   : > { %v1490_v56 = vsel %vm3469_vm1, %v1455_v53, 0.0  ;;  %vm3484_vm1 = vmmov %vm3441_vm0 }
  0xd7   : > { %v1491_v52 = vadd.f32 %v1490_v56, %v1489_v54 }
  0xdb   : > { %v1267_v40 = vpop.f32.mrf.mxu0 }
  0xdc   : > { %v1268_v30 = vadd.f32 %v3017_v49, %v1267_v40  ;;  %v1285_v5 = vpop.f32.mrf.mxu1 }
  0xdd   : > { %v1286_v11 = vadd.f32 %v3017_v49, %v1285_v5  ;;  %v1303_v17 = vpop.f32.mrf.mxu2 }
  0xde   : > { %1353 = vst.msk [vmem:[%s3029_s10 + $0x28] sm:$0xff] %vm3470_vm2, %v1268_v30  ;;  %v3109_v6 = vadd.f32 %v3017_v49, %v1303_v17  ;;  %v1456_v35 = vmul.f32 %v1268_v30, %v1268_v30  ;;  %v1389_v43 = vsel %vm3479_vm9, %v1268_v30, 0.0  ;;  %vm3485_vm2 = vmmov %vm3441_vm0 }
  0xdf   : > { %1359 = vst.msk [vmem:[%s3029_s10 + $0x58] sm:$0xff] %vm3471_vm4, %v1286_v11  ;;  %v1390_v3 = vadd.f32 %v1389_v43, %v1388_v37  ;;  %v1395_v10 = vsel %vm3485_vm2, %v3054_v63, 0.0  ;;  %vm3486_vm4 = vmmov %vm3441_vm0  ;;  %v1462_v23 = vmul.f32 %v1286_v11, %v1286_v11 }
  0xe0   : > { %1365 = vst.msk [vmem:[%s3029_s10 + $0x88] sm:$0xff] %vm3472_vm10, %v3109_v6  ;;  %v1492_v38 = vsel %vm3480_vm13, %v1456_v35, 0.0  ;;  %vm3487_vm10 = vmmov %vm3441_vm0 }
  0xe1   : > { %v1493_v36 = vadd.f32 %v1492_v38, %v1491_v52  ;;  %v1498_v29 = vsel %vm3487_vm10, %v1459_v59, 0.0  ;;  %vm3494_vm9 = vmmov %vm3441_vm0 }
  0xe2   : > { %vm3495_vm13 = vmmov %vm3441_vm0 }
  0xe3   : > { %vm3500_vm2 = vmmov %vm3441_vm0 }
  0xe4   : > { %vm3502_vm10 = vmmov %vm3441_vm0 }
  0xe7   : > { %v1306_v20 = vpop.f32.mrf.mxu2 }
  0xe8   : > { %v3117_v2 = vadd.f32 %v3017_v49, %v1306_v20 }
  0xea   : > { %1366 = vst.msk [vmem:[%s3029_s10 + $0x90] sm:$0xff] %vm3473_vm3, %v3117_v2  ;;  %vm3488_vm3 = vmmov %vm3441_vm0 }
  0xeb   : > { %v1324_v51 = vpop.f32.mrf.mxu3  ;;  %v1397_v41 = vsel %vm3488_vm3, %v3070_v48, 0.0  ;;  %vm3503_vm3 = vmmov %vm3441_vm0 }
  0xec   : > { %v3123_v1 = vadd.f32 %v3017_v49, %v1324_v51 }
  0xed   : > { %v1270_v61 = vpop.f32.mrf.mxu0 }
  0xee   : > { %v1271_v9 = vadd.f32 %v3017_v49, %v1270_v61  ;;  %1372 = vst.msk [vmem:[%s3029_s10 + $0xc0] sm:$0xff] %vm3474_vm5, %v3123_v1  ;;  %vm3489_vm5 = vmmov %vm3441_vm0 }
  0xef   : > { %v1500_v46 = vsel %vm3489_vm5, %v1460_v45, 0.0  ;;  %vm3504_vm5 = vmmov %vm3441_vm0 }
  0xf0   : > { %1354 = vst.msk [vmem:[%s3029_s10 + $0x30] sm:$0xff] %vm3475_vm7, %v1271_v9  ;;  %v1457_v39 = vmul.f32 %v1271_v9, %v1271_v9  ;;  %v1391_v22 = vsel %vm3481_vm14, %v1271_v9, 0.0  ;;  %vm3490_vm7 = vmmov %vm3441_vm0 }
  0xf1   : > { %v1288_v21 = vpop.f32.mrf.mxu1  ;;  %v1392_v42 = vadd.f32 %v1391_v22, %v1390_v3  ;;  %v1399_v63 = vsel %vm3490_vm7, %v3090_v28, 0.0  ;;  %vm3496_vm14 = vmmov %vm3441_vm0 }
  0xf2   : > { %v1289_v24 = vadd.f32 %v3017_v49, %v1288_v21  ;;  %v1494_v14 = vsel %vm3482_vm15, %v1457_v39, 0.0  ;;  %vm3497_vm15 = vmmov %vm3441_vm0 }
  0xf3   : > { %v1495_v32 = vadd.f32 %v1494_v14, %v1493_v36  ;;  %vm3505_vm7 = vmmov %vm3441_vm0 }
  0xf4   : > { %1360 = vst.msk [vmem:[%s3029_s10 + $0x60] sm:$0xff] %vm3476_vm8, %v1289_v24  ;;  %vm3491_vm8 = vmmov %vm3441_vm0  ;;  %v1463_v30 = vmul.f32 %v1289_v24, %v1289_v24  ;;  %v1403_v5 = vsel %vm3497_vm15, %v1289_v24, 0.0 }
  0xf5   : > { %v1502_v54 = vsel %vm3491_vm8, %v1461_v19, 0.0  ;;  %vm3506_vm8 = vmmov %vm3441_vm0 }
  0xf6   : > { %v1506_v17 = vsel %vm3441_vm0, %v1463_v30, 0.0  ;;  %v1411_v59 = vsel %vm3506_vm8, %v3084_v44, 0.0  ;;  %vm3512_vm15 = vmmov %vm3441_vm0 }
  0xf7   : > { %vm3521_vm8 = vmmov %vm3441_vm0 }
  0xf9   : > { %v1309_v58 = vpop.f32.mrf.mxu2 }
  0xfa   : > { %v3135_v0 = vadd.f32 %v3017_v49, %v1309_v58 }
  0xfc   : > { %1367 = vst.msk [vmem:[%s3029_s10 + $0x98] sm:$0xff] %vm3477_vm11, %v3135_v0  ;;  %vm3492_vm11 = vmmov %vm3441_vm0 }
  0xfd   : > { %v1401_v48 = vsel %vm3492_vm11, %v1286_v11, 0.0  ;;  %vm3507_vm11 = vmmov %vm3441_vm0 }
  0xff   : > { %v1327_v8 = vpop.f32.mrf.mxu3 }
 0x100   : > { %v3141_v60 = vadd.f32 %v3017_v49, %v1327_v8 }
 0x102   : > { %1373 = vst.msk [vmem:[%s3029_s10 + $0xc8] sm:$0xff] %vm3478_vm12, %v3141_v60  ;;  %vm3493_vm12 = vmmov %vm3441_vm0 }
 0x103   : > { %v1504_v52 = vsel %vm3493_vm12, %v1462_v23, 0.0  ;;  %vm3508_vm12 = vmmov %vm3441_vm0 }
 0x106   : > { %v1273_v4 = vpop.f32.mrf.mxu0 }
 0x107   : > { %v1274_v15 = vadd.f32 %v3017_v49, %v1273_v4  ;;  %v1291_v62 = vpop.f32.mrf.mxu1 }
 0x108   : > { %v1292_v27 = vadd.f32 %v3017_v49, %v1291_v62  ;;  %v1467_v62 = vmul.f32 %v3084_v44, %v3084_v44 }
 0x109   : > { %1355 = vst.msk [vmem:[%s3029_s10 + $0x38] sm:$0xff] %vm3441_vm0, %v1274_v15  ;;  %v1393_v13 = vsel %vm3483_vm6, %v1274_v15, 0.0  ;;  %v1458_v34 = vmul.f32 %v1274_v15, %v1274_v15  ;;  %vm3498_vm6 = vmmov %vm3441_vm0 }
 0x10a   : > { %v1394_v16 = vadd.f32 %v1393_v13, %v1392_v42  ;;  %1361 = vst.msk [vmem:[%s3029_s10 + $0x68] sm:$0xff] %vm3484_vm1, %v1292_v27  ;;  %v1464_v20 = vmul.f32 %v1292_v27, %v1292_v27  ;;  %v1405_v9 = vsel %vm3498_vm6, %v1292_v27, 0.0  ;;  %vm3499_vm1 = vmmov %vm3441_vm0  ;;  %v1468_v13 = vmul.f32 %v3109_v6, %v3109_v6 }
 0x10b   : > { %v1496_v18 = vsel %vm3486_vm4, %v1458_v34, 0.0  ;;  %vm3501_vm4 = vmmov %vm3441_vm0 }
 0x10c   : > { %v1396_v25 = vadd.f32 %v1395_v10, %v1394_v16  ;;  %v1497_v12 = vadd.f32 %v1496_v18, %v1495_v32  ;;  %v1508_v8 = vsel %vm3499_vm1, %v1464_v20, 0.0  ;;  %v1514_v10 = vsel %vm3508_vm12, %v1467_v62, 0.0  ;;  %vm3513_vm6 = vmmov %vm3441_vm0 }
 0x10d   : > { %v1469_v18 = vmul.f32 %v3117_v2, %v3117_v2  ;;  %vm3514_vm1 = vmmov %vm3441_vm0 }
 0x10e   : > { %v1398_v33 = vadd.f32 %v1397_v41, %v1396_v25  ;;  %v1499_v31 = vadd.f32 %v1498_v29, %v1497_v12  ;;  %v1470_v41 = vmul.f32 %v3135_v0, %v3135_v0  ;;  %vm3523_vm12 = vmmov %vm3441_vm0 }
 0x10f   : > { %v1312_v7 = vpop.f32.mrf.mxu2 }
 0x110   : > { %v1501_v47 = vadd.f32 %v1500_v46, %v1499_v31  ;;  %v1400_v26 = vadd.f32 %v1399_v63, %v1398_v33  ;;  %v1313_v57 = vadd.f32 %v3017_v49, %v1312_v7  ;;  %v1330_v50 = vpop.f32.mrf.mxu3  ;;  %v1518_v31 = vsel %vm3512_vm15, %v1469_v18, 0.0  ;;  %vm3527_vm15 = vmmov %vm3441_vm0 }
 0x111   : > { %v1294_v55 = vpop.f32.mrf.mxu1  ;;  %v3177_v28 = vadd.f32 %v3017_v49, %v1330_v50 }
 0x112   : > { %v1402_v53 = vadd.f32 %v1401_v48, %v1400_v26  ;;  %v1503_v37 = vadd.f32 %v1502_v54, %v1501_v47  ;;  %v1295_v56 = vadd.f32 %v3017_v49, %v1294_v55  ;;  %1368 = vst.msk [vmem:[%s3029_s10 + $0xa0] sm:$0xff] %vm3494_vm9, %v1313_v57  ;;  %vm3509_vm9 = vmmov %vm3441_vm0  ;;  %v1471_v46 = vmul.f32 %v1313_v57, %v1313_v57 }
 0x113   : > { %1374 = vst.msk [vmem:[%s3029_s10 + $0xd0] sm:$0xff] %vm3496_vm14, %v3177_v28  ;;  %v1413_v45 = vsel %vm3509_vm9, %v3109_v6, 0.0  ;;  %vm3511_vm14 = vmmov %vm3441_vm0  ;;  %v1417_v6 = vsel %vm3441_vm0, %v3135_v0, 0.0  ;;  %v1419_v7 = vsel %vm3514_vm1, %v1313_v57, 0.0  ;;  %v1477_v62 = vmul.f32 %v3177_v28, %v3177_v28 }
 0x114   : > { %v1505_v40 = vadd.f32 %v1504_v52, %v1503_v37  ;;  %1362 = vst.msk [vmem:[%s3029_s10 + $0x70] sm:$0xff] %vm3495_vm13, %v1295_v56  ;;  %v1404_v11 = vadd.f32 %v1403_v5, %v1402_v53  ;;  %v1465_v35 = vmul.f32 %v1295_v56, %v1295_v56  ;;  %v1407_v24 = vsel %vm3501_vm4, %v1295_v56, 0.0  ;;  %vm3510_vm13 = vmmov %vm3441_vm0 }
 0x115   : > { %v1516_v29 = vsel %vm3510_vm13, %v1468_v13, 0.0  ;;  %v1415_v44 = vsel %vm3511_vm14, %v3117_v2, 0.0  ;;  %v1520_v2 = vsel %vm3513_vm6, %v1470_v41, 0.0  ;;  %vm3516_vm4 = vmmov %vm3441_vm0 }
 0x116   : > { %v1507_v51 = vadd.f32 %v1506_v17, %v1505_v40  ;;  %v1406_v58 = vadd.f32 %v1405_v9, %v1404_v11  ;;  %v1510_v4 = vsel %vm3502_vm10, %v1465_v35, 0.0  ;;  %v1522_v53 = vsel %vm3516_vm4, %v1471_v46, 0.0  ;;  %vm3517_vm10 = vmmov %vm3441_vm0 }
 0x117   : > { %v1475_v9 = vmul.f32 %v3123_v1, %v3123_v1  ;;  %vm3524_vm9 = vmmov %vm3441_vm0 }
 0x118   : > { %v1509_v43 = vadd.f32 %v1508_v8, %v1507_v51  ;;  %v1408_v38 = vadd.f32 %v1407_v24, %v1406_v58  ;;  %v1427_v24 = vsel %vm3524_vm9, %v3123_v1, 0.0  ;;  %vm3525_vm13 = vmmov %vm3441_vm0 }
 0x119   : > { %vm3526_vm14 = vmmov %vm3441_vm0 }
 0x11a   : > { %v1511_v15 = vadd.f32 %v1510_v4, %v1509_v43  ;;  %vm3528_vm6 = vmmov %vm3441_vm0 }
 0x11b   : > { %vm3529_vm1 = vmmov %vm3441_vm0 }
 0x11c   : > { %vm3531_vm4 = vmmov %vm3441_vm0 }
 0x11d   : > { %vm3539_vm9 = vmmov %vm3441_vm0 }
 0x11f   : > { %v1315_v61 = vpop.f32.mrf.mxu2 }
 0x120   : > { %v1316_v21 = vadd.f32 %v3017_v49, %v1315_v61 }
 0x122   : > { %1369 = vst.msk [vmem:[%s3029_s10 + $0xa8] sm:$0xff] %vm3500_vm2, %v1316_v21  ;;  %v1472_v54 = vmul.f32 %v1316_v21, %v1316_v21  ;;  %vm3515_vm2 = vmmov %vm3441_vm0  ;;  %v1421_v0 = vsel %vm3517_vm10, %v1316_v21, 0.0 }
 0x123   : > { %v1333_v39 = vpop.f32.mrf.mxu3  ;;  %vm3532_vm10 = vmmov %vm3441_vm0 }
 0x124   : > { %v1297_v22 = vpop.f32.mrf.mxu1  ;;  %v3196_v3 = vadd.f32 %v3017_v49, %v1333_v39  ;;  %v1476_v39 = vmul.f32 %v3141_v60, %v3141_v60 }
 0x125   : > { %v1298_v14 = vadd.f32 %v3017_v49, %v1297_v22 }
 0x126   : > { %1375 = vst.msk [vmem:[%s3029_s10 + $0xd8] sm:$0xff] %vm3503_vm3, %v3196_v3  ;;  %vm3518_vm3 = vmmov %vm3441_vm0  ;;  %v1532_v1 = vsel %vm3528_vm6, %v1476_v39, 0.0 }
 0x127   : > { %1363 = vst.msk [vmem:[%s3029_s10 + $0x78] sm:$0xff] %vm3504_vm5, %v1298_v14  ;;  %v1409_v36 = vsel %vm3505_vm7, %v1298_v14, 0.0  ;;  %v1466_v42 = vmul.f32 %v1298_v14, %v1298_v14  ;;  %v1524_v30 = vsel %vm3518_vm3, %v1472_v54, 0.0  ;;  %vm3519_vm5 = vmmov %vm3441_vm0  ;;  %v1530_v14 = vsel %vm3527_vm15, %v1475_v9, 0.0 }
 0x128   : > { %v1410_v27 = vadd.f32 %v1409_v36, %v1408_v38  ;;  %vm3520_vm7 = vmmov %vm3441_vm0 }
 0x129   : > { %v1512_v34 = vsel %vm3507_vm11, %v1466_v42, 0.0  ;;  %vm3522_vm11 = vmmov %vm3441_vm0 }
 0x12a   : > { %v1412_v32 = vadd.f32 %v1411_v59, %v1410_v27  ;;  %v1513_v16 = vadd.f32 %v1512_v34, %v1511_v15  ;;  %v1429_v15 = vsel %vm3441_vm0, %v3141_v60, 0.0  ;;  %v1431_v27 = vsel %vm3529_vm1, %v3177_v28, 0.0  ;;  %vm3533_vm3 = vmmov %vm3441_vm0 }
 0x12b   : > { %v1478_v59 = vmul.f32 %v3196_v3, %v3196_v3  ;;  %v1433_v60 = vsel %vm3531_vm4, %v3196_v3, 0.0  ;;  %vm3542_vm15 = vmmov %vm3441_vm0 }
 0x12c   : > { %v1414_v25 = vadd.f32 %v1413_v45, %v1412_v32  ;;  %v1515_v12 = vadd.f32 %v1514_v10, %v1513_v16 }
 0x12e   : > { %v1517_v19 = vadd.f32 %v1516_v29, %v1515_v12  ;;  %v1416_v33 = vadd.f32 %v1415_v44, %v1414_v25  ;;  %v1536_v12 = vsel %vm3532_vm10, %v1478_v59, 0.0 }
 0x12f   : > { %v1318_v63 = vpop.f32.mrf.mxu2 }
 0x130   : > { %v1418_v23 = vadd.f32 %v1417_v6, %v1416_v33  ;;  %v1519_v47 = vadd.f32 %v1518_v31, %v1517_v19  ;;  %v1319_v26 = vadd.f32 %v3017_v49, %v1318_v63 }
 0x131   : > { %v1336_v50 = vpop.f32.mrf.mxu3 }
 0x132   : > { %v1420_v48 = vadd.f32 %v1419_v7, %v1418_v23  ;;  %v1521_v55 = vadd.f32 %v1520_v2, %v1519_v47  ;;  %1370 = vst.msk [vmem:[%s3029_s10 + $0xb0] sm:$0xff] %vm3515_vm2, %v1319_v26  ;;  %v1337_v37 = vadd.f32 %v3017_v49, %v1336_v50  ;;  %v1473_v40 = vmul.f32 %v1319_v26, %v1319_v26  ;;  %vm3530_vm2 = vmmov %vm3441_vm0 }
 0x133   : > { %v1423_v5 = vsel %vm3520_vm7, %v1319_v26, 0.0  ;;  %v1534_v32 = vsel %vm3530_vm2, %v1477_v62, 0.0  ;;  %vm3535_vm7 = vmmov %vm3441_vm0 }
 0x134   : > { %v1422_v56 = vadd.f32 %v1421_v0, %v1420_v48  ;;  %v1523_v52 = vadd.f32 %v1522_v53, %v1521_v55  ;;  %1376 = vst.msk [vmem:[%s3029_s10 + $0xe0] sm:$0xff] %vm3519_vm5, %v1337_v37  ;;  %v1526_v20 = vsel %vm3521_vm8, %v1473_v40, 0.0  ;;  %v1479_v16 = vmul.f32 %v1337_v37, %v1337_v37  ;;  %vm3534_vm5 = vmmov %vm3441_vm0 }
 0x135   : > { %v1435_v28 = vsel %vm3533_vm3, %v1337_v37, 0.0  ;;  %vm3536_vm8 = vmmov %vm3441_vm0 }
 0x136   : > { %v1525_v57 = vadd.f32 %v1524_v30, %v1523_v52  ;;  %v1424_v11 = vadd.f32 %v1423_v5, %v1422_v56  ;;  %v1538_v19 = vsel %vm3535_vm7, %v1479_v16, 0.0 }
 0x137   : > { %v1321_v17 = vpop.f32.mrf.mxu2 }
 0x138   : > { %v1322_v51 = vadd.f32 %v3017_v49, %v1321_v17  ;;  %v1527_v61 = vadd.f32 %v1526_v20, %v1525_v57 }
 0x139   : > { %v1339_v8 = vpop.f32.mrf.mxu3 }
 0x13a   : > { %1371 = vst.msk [vmem:[%s3029_s10 + $0xb8] sm:$0xff] %vm3522_vm11, %v1322_v51  ;;  %v1425_v21 = vsel %vm3523_vm12, %v1322_v51, 0.0  ;;  %v1474_v58 = vmul.f32 %v1322_v51, %v1322_v51  ;;  %v1340_v43 = vadd.f32 %v3017_v49, %v1339_v8  ;;  %vm3537_vm11 = vmmov %vm3441_vm0 }
 0x13b   : > { %v1426_v35 = vadd.f32 %v1425_v21, %v1424_v11  ;;  %vm3538_vm12 = vmmov %vm3441_vm0 }
 0x13c   : > { %v1528_v38 = vsel %vm3525_vm13, %v1474_v58, 0.0  ;;  %1377 = vst.msk [vmem:[%s3029_s10 + $0xe8] sm:$0xff] %vm3526_vm14, %v1340_v43  ;;  %v1480_v29 = vmul.f32 %v1340_v43, %v1340_v43  ;;  %v1437_v3 = vsel %vm3536_vm8, %v1340_v43, 0.0  ;;  %vm3540_vm13 = vmmov %vm3441_vm0 }
 0x13d   : > { %v1428_v22 = vadd.f32 %v1427_v24, %v1426_v35  ;;  %v1529_v4 = vadd.f32 %v1528_v38, %v1527_v61  ;;  %vm3541_vm14 = vmmov %vm3441_vm0  ;;  %vm1449_vm0 = vcmask 122880  }
 0x13e   : > { %v1540_v46 = vsel %vm3537_vm11, %v1480_v29, 0.0 }
 0x13f   : > { %v1430_v36 = vadd.f32 %v1429_v15, %v1428_v22  ;;  %v1531_v42 = vadd.f32 %v1530_v14, %v1529_v4 }
 0x141   : > { %v1533_v13 = vadd.f32 %v1532_v1, %v1531_v42  ;;  %v1432_v34 = vadd.f32 %v1431_v27, %v1430_v36  ;;  %v1342_v10 = vpop.f32.mrf.mxu3 }
 0x142   : > { %v1343_v25 = vadd.f32 %v3017_v49, %v1342_v10 }
 0x143   : > { %v1434_v45 = vadd.f32 %v1433_v60, %v1432_v34  ;;  %v1535_v18 = vadd.f32 %v1534_v32, %v1533_v13 }
 0x144   : > { %1378 = vst.msk [vmem:[%s3029_s10 + $0xf0] sm:$0xff] %vm3534_vm5, %v1343_v25  ;;  %v1481_v6 = vmul.f32 %v1343_v25, %v1343_v25  ;;  %v1439_v23 = vsel %vm3538_vm12, %v1343_v25, 0.0 }
 0x145   : > { %v1436_v44 = vadd.f32 %v1435_v28, %v1434_v45  ;;  %v1537_v41 = vadd.f32 %v1536_v12, %v1535_v18 }
 0x146   : > { %v1542_v2 = vsel %vm3539_vm9, %v1481_v6, 0.0 }
 0x147   : > { %v1438_v33 = vadd.f32 %v1437_v3, %v1436_v44  ;;  %v1539_v31 = vadd.f32 %v1538_v19, %v1537_v41 }
 0x149   : > { %v1541_v63 = vadd.f32 %v1540_v46, %v1539_v31  ;;  %v1440_v47 = vadd.f32 %v1439_v23, %v1438_v33  ;;  %v1345_v26 = vpop.f32.mrf.mxu3 }
 0x14a   : > { %v1346_v7 = vadd.f32 %v3017_v49, %v1345_v26 }
 0x14b   : > { %v1543_v54 = vadd.f32 %v1542_v2, %v1541_v63 }
 0x14c   : > { %1379 = vst.msk [vmem:[%s3029_s10 + $0xf8] sm:$0xff] %vm3540_vm13, %v1346_v7  ;;  %v1441_v48 = vsel %vm3541_vm14, %v1346_v7, 0.0  ;;  %v1482_v55 = vmul.f32 %v1346_v7, %v1346_v7 }
 0x14d   : > { %v1442_v50 = vadd.f32 %v1441_v48, %v1440_v47 }
 0x14e   : > { %v1544_v53 = vsel %vm3542_vm15, %v1482_v55, 0.0 }
 0x14f   : > { %v1443_v0 = vrot.slane %v1442_v50, 4  ;;  %v1545_v37 = vadd.f32 %v1544_v53, %v1543_v54 }
 0x151   : > { %v1444_v56 = vadd.f32 %v1443_v0, %v1442_v50  ;;  %v1546_v52 = vrot.slane %v1545_v37, 4 }
 0x153   : > { %v1445_v40 = vrot.slane %v1444_v56, 2  ;;  %v1547_v30 = vadd.f32 %v1546_v52, %v1545_v37 }
 0x155   : > { %v1446_v57 = vadd.f32 %v1445_v40, %v1444_v56  ;;  %v1548_v5 = vrot.slane %v1547_v30, 2 }
 0x157   : > { %v1447_v11 = vrot.slane %v1446_v57, 1  ;;  %v1549_v49 = vadd.f32 %v1548_v5, %v1547_v30 }
 0x159   : > { %v1448_v17 = vadd.f32 %v1447_v11, %v1446_v57  ;;  %v1550_v20 = vrot.slane %v1549_v49, 1 }
 0x15b   : > { %1450 = vst.msk [vmem:[%s353_s14] sm:$0x1] %vm1449_vm0, %v1448_v17  ;;  %v1551_v51 = vadd.f32 %v1550_v20, %v1549_v49 }
 0x15d   : > { %1552 = vst.msk [vmem:[%s353_s14 + $0x1] sm:$0x1] %vm1449_vm0, %v1551_v51 }
 0x15e PF: > { %s18_s26 = sadd.s32 1, %s1959_s26   ;;  %s3543_s24 = smov %s1955_s25 }
 0x15f   : > { %p15_p5 = scmp.ge.s32.totalorder %s18_s26, 4   ;;  %s3544_s25 = smov %s3546_s27 }
 0x161   :  { %17 = sbr.rel (!%p15_p5) target bundleno = 2 (0x2), region = 89 }

// kernel: mbconv1_pallas.7
= control target key start
LH: loop header
LB: loop body
LE: loop exit
PB: predicated region body
PF: predicated region fallthrough
CT: control target
= control target key end

     0   :  { %s523_s15 = smov 0   ;;  %s525_s16 = smov 0   ;;  %s565_s0 = inlined_call_operand.vmem [shape: f32[2,16,256], index: 0, kind: input, shape index: {}]   ;;  %s566_s1 = inlined_call_operand.vmem [shape: f32[1,256], index: 1, kind: input, shape index: {}]   ;;  %s567_s2 = inlined_call_operand.vmem [shape: f32[1,256], index: 2, kind: input, shape index: {}]   ;;  %s568_s3 = inlined_call_operand.vmem [shape: f32[2,16,256], index: 3, kind: input, shape index: {}]   ;;  %s569_s4 = inlined_call_operand.vmem [shape: f32[2,16,256], index: 4, kind: output, shape index: {}]  }
   0x1   :  { %s527_s17 = smov 0  }
   0x2 LB: > { %s26_s18 = sadd.s32 1, %s492_s16  ;;  %p438_p0 = scmp.ge.s32.totalorder %s496_s17, 1  ;;  %s496_s17 = sphi %s527_s17, %s14_s17   ;;  %s492_s16 = sphi %s525_s16, %s571_s16   ;;  %s488_s15 = sphi %s523_s15, %s570_s15  }
   0x3   : > { %p28_p1 = scmp.ge.s32.totalorder %s26_s18, 2  ;;  %p202_p2 = scmp.lt.s32.totalorder %s496_s17, 3 }
   0x5   : > { %s573_s18 = smov (%p28_p1, %s26_s18), 0  ;;  %p203_p3 = pnand %p438_p0, %p202_p2 }
   0x6   : > { %p249_p4 = scmp.lt.s32.totalorder (!%p203_p3), %s488_s15, 1 }
   0x7   : > { %206 = sbr.rel (%p203_p3) target bundleno = 26 (0x1a), region = 36 }
   0xc   : > { %v285_v0 = vld [vmem:[%s566_s1] sm:$0x3]  ;;  %s575_s15 = smov (!%p249_p4, %s488_s15), 1 }
   0xd   : > { %v295_v1 = vld [vmem:[%s567_s2] sm:$0x3]  ;;  %v287_v2 = vperm.slane %v285_v0, 0  ;;  %v288_v3 = vperm.slane %v285_v0, 1  ;;  %s447_s23 = sshll.u32 %s575_s15, 5 }
   0xe   : > { %s257_s26 = scalar_lea.vmem %s565_s0, %s447_s23  ;;  %s268_s29 = scalar_lea.vmem %s568_s3, %s447_s23  ;;  %v297_v4 = vperm.slane %v295_v1, 0  ;;  %v298_v5 = vperm.slane %v295_v1, 1 }
   0xf   : > { %v281_v6 = vld [vmem:[%s257_s26] sm:$0xff]  ;;  %v282_v7 = vld [vmem:[%s257_s26 + $0x8] sm:$0xff]  ;;  %v283_v10 = vld [vmem:[%s257_s26 + $0x10] sm:$0xff]  ;;  %s279_s6 = scalar_lea.vmem %s569_s4, %s447_s23 }
  0x10   : > { %v291_v8 = vmul.f32 %v287_v2, %v281_v6  ;;  %v292_v9 = vmul.f32 %v288_v3, %v282_v7  ;;  %v305_v11 = vld [vmem:[%s268_s29] sm:$0xff]  ;;  %v306_v12 = vld [vmem:[%s268_s29 + $0x8] sm:$0xff]  ;;  %v293_v13 = vmul.f32 %v287_v2, %v283_v10  ;;  %v284_v14 = vld [vmem:[%s257_s26 + $0x18] sm:$0xff] }
  0x11   : > { %v307_v17 = vld [vmem:[%s268_s29 + $0x10] sm:$0xff]  ;;  %v294_v18 = vmul.f32 %v288_v3, %v284_v14  ;;  %v308_v20 = vld [vmem:[%s268_s29 + $0x18] sm:$0xff] }
  0x12   : > { %v301_v15 = vadd.f32 %v297_v4, %v291_v8  ;;  %v302_v16 = vadd.f32 %v298_v5, %v292_v9  ;;  %v303_v19 = vadd.f32 %v297_v4, %v293_v13 }
  0x13   : > { %v304_v23 = vadd.f32 %v298_v5, %v294_v18 }
  0x14   : > { %v309_v21 = vadd.f32 %v305_v11, %v301_v15  ;;  %v310_v22 = vadd.f32 %v306_v12, %v302_v16  ;;  %v311_v24 = vadd.f32 %v307_v17, %v303_v19 }
  0x15   : > { %v312_v25 = vadd.f32 %v308_v20, %v304_v23 }
  0x16   : > { %313 = vst [vmem:[%s279_s6] sm:$0xff] %v309_v21 }
  0x17   : > { %314 = vst [vmem:[%s279_s6 + $0x8] sm:$0xff] %v310_v22 }
  0x18   : > { %315 = vst [vmem:[%s279_s6 + $0x10] sm:$0xff] %v311_v24 }
  0x19   : > { %316 = vst [vmem:[%s279_s6 + $0x18] sm:$0xff] %v312_v25 }
  0x1a PF: > { %s14_s17 = sadd.s32 1, %s496_s17   ;;  %s570_s15 = smov %s492_s16 }
  0x1b   : > { %p11_p5 = scmp.ge.s32.totalorder %s14_s17, 4   ;;  %s571_s16 = smov %s573_s18 }
  0x1d   :  { %13 = sbr.rel (!%p11_p5) target bundleno = 2 (0x2), region = 69 }

</bundles_post_ra>
